<compile_context>
chip_gen: v6e
topology: v6e:2x2x1
jax: 0.10.0
libtpu: 0.0.40
codegen_flags: <defaults>
</compile_context>

<pallas_src>
import functools
import math

import jax
import jax.numpy as jnp
from jax import lax
from jax.experimental import pallas as pl
from jax.experimental.pallas import tpu as pltpu


def _layernorm(x, g, b, eps=1e-5):
    # OpenAI-style layernorm (epsilon inside the sqrt), matching the reference.
    u = jnp.mean(x, axis=-1, keepdims=True)
    xc = x - u
    s = jnp.mean(xc * xc, axis=-1, keepdims=True)
    return g * (xc * lax.rsqrt(s + eps)) + b


def _gelu(x):
    return 0.5 * x * (1.0 + jnp.tanh(math.sqrt(2.0 / math.pi) * (x + 0.044715 * x ** 3)))


def _split_heads(t, n_head, use_einshape):
    """(S, H) -> (n_head, S, Dh) with a single lane-aware relayout."""
    S, H = t.shape
    Dh = H // n_head
    if use_einshape:
        return pltpu.einshape("s(hd)->hsd", t, h=n_head, d=Dh)
    # Fallback: per-head lane slices + stack (proven lowering path).
    return jnp.stack([t[:, h * Dh:(h + 1) * Dh] for h in range(n_head)], axis=0)


def _merge_heads(o, use_einshape):
    """(n_head, S, Dh) -> (S, H)."""
    n_head, S, Dh = o.shape
    if use_einshape:
        return pltpu.einshape("hsd->s(hd)", o)
    return jnp.concatenate([o[h] for h in range(n_head)], axis=-1)


def stack_kernel(x_ref, mask_ref,
                 wattn_ref, battn_ref, wproj_ref, bproj_ref,
                 g1_ref, b1_ref,
                 wfc_ref, bfc_ref, wp2_ref, bp2_ref,
                 g2_ref, b2_ref,
                 out_ref,
                 bias_ref,
                 *, n_head, kv_tile, fc_chunk, use_einshape):
    S, H = out_ref.shape
    Dh = H // n_head
    l = pl.program_id(1)

    # Layer 0 (once per batch row): seed the VMEM-resident hidden state and
    # build the additive attention bias ((causal & seq-mask) - 1) * 1e9 into a
    # persistent VMEM scratch so it is not rebuilt every layer.
    @pl.when(l == 0)
    def _():
        out_ref[...] = x_ref[...]
        row = lax.broadcasted_iota(jnp.int32, (S, S), 0)
        col = lax.broadcasted_iota(jnp.int32, (S, S), 1)
        b_eff = (row >= col).astype(jnp.float32) * mask_ref[...]   # (S, S)
        bias_ref[...] = (b_eff - 1.0) * 1e9                        # -1e9 where masked

    x = out_ref[...]                                   # (S, H) f32, running hidden

    # --- Attention: c_attn (Conv1D rf=1 == dense) ---
    # 1/sqrt(Dh) is already folded into the q columns of w_attn / b_attn.
    qkv = (jnp.dot(x.astype(jnp.bfloat16), wattn_ref[...],
                   preferred_element_type=jnp.float32)
           + battn_ref[...]).astype(jnp.bfloat16)      # (S, 3H), single bf16 cast
    qh = _split_heads(qkv[:, 0 * H:1 * H], n_head, use_einshape)   # (nH, S, Dh)
    kh = _split_heads(qkv[:, 1 * H:2 * H], n_head, use_einshape)
    vh = _split_heads(qkv[:, 2 * H:3 * H], n_head, use_einshape)

    # Online-softmax over key tiles: peak score tensor is (nH, S, kv_tile)
    # instead of (nH, S, S).  Additive bias only (numerically equivalent to
    # the reference's w*b + -1e9*(1-b) after softmax).
    m_i = jnp.full((n_head, S, 1), -jnp.inf, jnp.float32)
    l_i = jnp.zeros((n_head, S, 1), jnp.float32)
    acc = jnp.zeros((n_head, S, Dh), jnp.float32)
    for t0 in range(0, S, kv_tile):
        k_t = kh[:, t0:t0 + kv_tile, :]
        v_t = vh[:, t0:t0 + kv_tile, :]
        s = jnp.einsum('hqd,hkd->hqk', qh, k_t,
                       preferred_element_type=jnp.float32)         # (nH, S, Tk)
        s = s + bias_ref[:, t0:t0 + kv_tile]                       # broadcast over heads
        m_new = jnp.maximum(m_i, jnp.max(s, axis=-1, keepdims=True))
        alpha = jnp.exp(m_i - m_new)
        p = jnp.exp(s - m_new)
        l_i = alpha * l_i + jnp.sum(p, axis=-1, keepdims=True)
        acc = alpha * acc + jnp.einsum('hqk,hkd->hqd', p.astype(jnp.bfloat16), v_t,
                                       preferred_element_type=jnp.float32)
        m_i = m_new
    o = acc * pl.reciprocal(l_i, approx=True)          # EUP divide, (nH, S, Dh)

    # merge heads (lane-dense) and c_proj
    a = _merge_heads(o, use_einshape)                  # (S, H)
    a = jnp.dot(a.astype(jnp.bfloat16), wproj_ref[...],
                preferred_element_type=jnp.float32) + bproj_ref[...]

    # --- residual + ln_1 ---
    n = _layernorm(x + a, g1_ref[...], b1_ref[...])

    # --- MLP (c_fc -> gelu -> c_proj), tiled over the 4H dimension ---
    nb = n.astype(jnp.bfloat16)
    m = jnp.zeros((S, H), jnp.float32)
    for c0 in range(0, 4 * H, fc_chunk):
        hmid = _gelu(jnp.dot(nb, wfc_ref[:, c0:c0 + fc_chunk],
                             preferred_element_type=jnp.float32)
                     + bfc_ref[:, c0:c0 + fc_chunk])
        m = m + jnp.dot(hmid.astype(jnp.bfloat16), wp2_ref[c0:c0 + fc_chunk, :],
                        preferred_element_type=jnp.float32)
    m = m + bp2_ref[...]

    # --- residual + ln_2 -> next layer's input (stays in VMEM) ---
    out_ref[...] = _layernorm(n + m, g2_ref[...], b2_ref[...])


def _pick_vmem_limit_bytes():
    # Generation-aware VMEM budget: ~56 MiB on v7x (64 MiB/TC), ~110 MiB on
    # v5e/v6e (128 MiB), leaving headroom for Mosaic-internal scratch.
    try:
        cap = int(pltpu.get_tpu_info().vmem_capacity_bytes)
        return int(min(max(cap - 8 * 2 ** 20, 32 * 2 ** 20), 110 * 2 ** 20))
    except Exception:
        return 32 * 2 ** 20   # conservative fallback if the query is unavailable


def transformer_stack(h0, mask3, p, *, n_layers, n_head):
    """All transformer Blocks fused in one pallas_call.

    h0: (B,S,H) f32 summed embeddings, mask3: (B,1,S) f32 sequence mask.
    The reference deep-copies a single Block, so one weight set serves all layers.
    """
    B, S, H = h0.shape
    Dh = H // n_head

    # Fold the 1/sqrt(Dh) attention scale into the q columns of c_attn
    # (constant transform, fuses with the bf16 cast) — no per-layer VALU mul.
    scale = 1.0 / math.sqrt(Dh)
    w_attn = p['w_attn'].at[:, :H].multiply(scale)
    b_attn = p['b_attn'].at[:, :H].multiply(scale)

    # Matmul weights in bf16 (halves HBM traffic & VMEM); biases / LN params f32.
    weights = [
        w_attn.astype(jnp.bfloat16), b_attn,
        p['w_proj'].astype(jnp.bfloat16), p['b_proj'],
        p['g1'], p['b1'],
        p['w_fc'].astype(jnp.bfloat16), p['b_fc'],
        p['w_p2'].astype(jnp.bfloat16), p['b_p2'],
        p['g2'], p['b2'],
    ]

    # Key-tile size for the online-softmax loop (256 for v6e/v7x MXU width;
    # single tile when S <= 256).  MLP 4H chunk size 512.
    kv_tile = S if (S <= 256 or S % 256 != 0) else 256
    fc_chunk = 4 * H if (4 * H <= 512 or (4 * H) % 512 != 0) else 512
    vmem_limit = _pick_vmem_limit_bytes()

    def make_call(single_buffer_weights, einshape_heads):
        def rep(arr):
            nd = arr.ndim
            kwargs = {}
            if single_buffer_weights:
                # Constant index map -> block never re-DMA'd; single-buffering
                # halves the resident-weight VMEM footprint.
                kwargs["pipeline_mode"] = pl.Buffered(1)
            return pl.BlockSpec(arr.shape, lambda b, l, _nd=nd: (0,) * _nd, **kwargs)

        in_specs = ([
            pl.BlockSpec((None, S, H), lambda b, l: (b, 0, 0)),   # layer-0 seed
            pl.BlockSpec((None, 1, S), lambda b, l: (b, 0, 0)),   # sequence mask
        ] + [rep(w) for w in weights])

        kern = functools.partial(stack_kernel, n_head=n_head, kv_tile=kv_tile,
                                 fc_chunk=fc_chunk, use_einshape=einshape_heads)
        return pl.pallas_call(
            kern,
            out_shape=jax.ShapeDtypeStruct((B, S, H), jnp.float32),
            grid=(B, n_layers),
            in_specs=in_specs,
            out_specs=pl.BlockSpec((None, S, H), lambda b, l: (b, 0, 0)),
            scratch_shapes=[pltpu.VMEM((S, S), jnp.float32)],     # additive mask bias
            compiler_params=pltpu.CompilerParams(
                dimension_semantics=("parallel", "arbitrary"),
                vmem_limit_bytes=vmem_limit),
        )

    # Preferred configuration first; fall back if this jax/Mosaic build lacks
    # pl.Buffered(1) on top-level specs or grouped pltpu.einshape equations.
    attempts = (
        dict(single_buffer_weights=True, einshape_heads=True),
        dict(single_buffer_weights=True, einshape_heads=False),
        dict(single_buffer_weights=False, einshape_heads=True),
        dict(single_buffer_weights=False, einshape_heads=False),
    )
    last_err = None
    for cfg in attempts:
        try:
            return make_call(**cfg)(h0, mask3, *weights)
        except Exception as e:           # noqa: BLE001 - compatibility fallback
            last_err = e
    raise last_err


def init_block_params(key, H):
    # Conv1D weights ~ N(0, 0.02), biases zero; LayerNorm g=1, b=0.
    k0, k1, k2, k3 = jax.random.split(key, 4)
    return {
        'w_attn': 0.02 * jax.random.normal(k0, (H, 3 * H), jnp.float32),
        'b_attn': jnp.zeros((1, 3 * H), jnp.float32),
        'w_proj': 0.02 * jax.random.normal(k1, (H, H), jnp.float32),
        'b_proj': jnp.zeros((1, H), jnp.float32),
        'g1': jnp.ones((1, H), jnp.float32),
        'b1': jnp.zeros((1, H), jnp.float32),
        'w_fc': 0.02 * jax.random.normal(k2, (H, 4 * H), jnp.float32),
        'b_fc': jnp.zeros((1, 4 * H), jnp.float32),
        'w_p2': 0.02 * jax.random.normal(k3, (4 * H, H), jnp.float32),
        'b_p2': jnp.zeros((1, H), jnp.float32),
        'g2': jnp.ones((1, H), jnp.float32),
        'b2': jnp.zeros((1, H), jnp.float32),
    }


def transformer_model(x_ids, seq_mask, emb_table, block_params, *, n_layers, n_head):
    """x_ids: (B, S, K) int32, seq_mask: (B, S) f32."""
    # embedding gather + sum over the K composed ids per position (plain-JAX glue)
    e = emb_table[x_ids]                 # (B, S, K, H)
    h = e.sum(axis=2)                    # (B, S, H)
    mask3 = seq_mask[:, None, :]         # (B, 1, S)
    return transformer_stack(h, mask3, block_params, n_layers=n_layers, n_head=n_head)


def reference_forward(x_ids, seq_mask, emb_table, p, *, n_layers, n_head):
    """Pure-JAX f32 reference, faithful to the PyTorch module (eval mode)."""
    h = emb_table[x_ids].sum(axis=2)                    # (B, S, H)
    B, S, H = h.shape
    Dh = H // n_head
    causal = jnp.tril(jnp.ones((S, S), jnp.float32))

    def ln(x, g, b, eps=1e-5):
        u = x.mean(-1, keepdims=True)
        s = ((x - u) ** 2).mean(-1, keepdims=True)
        return g * (x - u) / jnp.sqrt(s + eps) + b

    def split(t):
        return t.reshape(B, S, n_head, Dh).transpose(0, 2, 1, 3)   # (B, nH, S, Dh)

    for _ in range(n_layers):
        qkv = h @ p['w_attn'] + p['b_attn']
        q, k, v = jnp.split(qkv, 3, axis=-1)
        q, k, v = split(q), split(k), split(v)
        w = jnp.einsum('bhqd,bhkd->bhqk', q, k) / math.sqrt(Dh)
        b_eff = causal[None, None] * seq_mask[:, None, None, :]
        w = w * b_eff + -1e9 * (1.0 - b_eff)
        w = jax.nn.softmax(w, axis=-1)
        a = jnp.einsum('bhqk,bhkd->bhqd', w, v)
        a = a.transpose(0, 2, 1, 3).reshape(B, S, H)
        a = a @ p['w_proj'] + p['b_proj']
        n = ln(h + a, p['g1'], p['b1'])
        fc = n @ p['w_fc'] + p['b_fc']
        act = 0.5 * fc * (1.0 + jnp.tanh(math.sqrt(2.0 / math.pi) * (fc + 0.044715 * fc ** 3)))
        m = act @ p['w_p2'] + p['b_p2']
        h = ln(n + m, p['g2'], p['b2'])
    return h


if __name__ == "__main__":
    # cfg: hSize=128, nH=4, nL=2, afn='gelu'; n_ctx >= S.  H=128 keeps the
    # last (lane) dim dense; B, S, K stay small.
    B, S, K = 2, 8, 2
    H, nH, nL = 128, 4, 2
    vocab = 100

    key = jax.random.PRNGKey(0)
    k_ids, k_mask, k_emb, k_par = jax.random.split(key, 4)

    x_ids = jax.random.randint(k_ids, (B, S, K), 1, vocab, dtype=jnp.int32)
    seq_mask = jnp.ones((B, S), jnp.float32).at[:, -2:].set(0.0)   # mask last 2 keys
    emb_table = 0.02 * jax.random.normal(k_emb, (vocab, H), jnp.float32)
    block_params = init_block_params(k_par, H)

    out = transformer_model(x_ids, seq_mask, emb_table, block_params,
                            n_layers=nL, n_head=nH)
    out = jax.block_until_ready(out)
    assert out.shape == (B, S, H)

    # Tolerance-asserted pure-JAX reference (bf16 matmuls + approx reciprocal
    # introduce small deviations from the f32 reference).
    ref = reference_forward(x_ids, seq_mask, emb_table, block_params,
                            n_layers=nL, n_head=nH)
    err = float(jnp.max(jnp.abs(out - ref)))
    assert err < 1e-1, f"max |out - ref| = {err}"

    print("KERNEL_OK")
</pallas_src>

<mosaic_0001>
module attributes {stable_mosaic.version = 11 : i64} {
  func.func @stack_kernel(%arg0: i32, %arg1: i32, %arg2: memref<1x8x128xf32, #tpu.memory_space<vmem>>, %arg3: memref<1x1x8xf32, #tpu.memory_space<vmem>>, %arg4: memref<128x384xbf16, #tpu.memory_space<vmem>>, %arg5: memref<1x384xf32, #tpu.memory_space<vmem>>, %arg6: memref<128x128xbf16, #tpu.memory_space<vmem>>, %arg7: memref<1x128xf32, #tpu.memory_space<vmem>>, %arg8: memref<1x128xf32, #tpu.memory_space<vmem>>, %arg9: memref<1x128xf32, #tpu.memory_space<vmem>>, %arg10: memref<128x512xbf16, #tpu.memory_space<vmem>>, %arg11: memref<1x512xf32, #tpu.memory_space<vmem>>, %arg12: memref<512x128xbf16, #tpu.memory_space<vmem>>, %arg13: memref<1x128xf32, #tpu.memory_space<vmem>>, %arg14: memref<1x128xf32, #tpu.memory_space<vmem>>, %arg15: memref<1x128xf32, #tpu.memory_space<vmem>>, %arg16: memref<1x8x128xf32, #tpu.memory_space<vmem>>, %arg17: memref<8x8xf32, #tpu.memory_space<vmem>>) attributes {dimension_semantics = [#tpu.dimension_semantics<parallel>, #tpu.dimension_semantics<arbitrary>], iteration_bounds = array<i64: 2, 2>, scalar_prefetch = 0 : i64, scratch_operands = 1 : i64, tpu.core_type = #tpu.core_type<tc>, window_params = [{transform_indices = @transform_0, window_bounds = array<i64: 1, 8, 128>}, {transform_indices = @transform_1, window_bounds = array<i64: 1, 1, 8>}, {pipeline_mode = #tpu.pipeline_mode<synchronous>, transform_indices = @transform_2, window_bounds = array<i64: 128, 384>}, {pipeline_mode = #tpu.pipeline_mode<synchronous>, transform_indices = @transform_3, window_bounds = array<i64: 1, 384>}, {pipeline_mode = #tpu.pipeline_mode<synchronous>, transform_indices = @transform_4, window_bounds = array<i64: 128, 128>}, {pipeline_mode = #tpu.pipeline_mode<synchronous>, transform_indices = @transform_5, window_bounds = array<i64: 1, 128>}, {pipeline_mode = #tpu.pipeline_mode<synchronous>, transform_indices = @transform_6, window_bounds = array<i64: 1, 128>}, {pipeline_mode = #tpu.pipeline_mode<synchronous>, transform_indices = @transform_7, window_bounds = array<i64: 1, 128>}, {pipeline_mode = #tpu.pipeline_mode<synchronous>, transform_indices = @transform_8, window_bounds = array<i64: 128, 512>}, {pipeline_mode = #tpu.pipeline_mode<synchronous>, transform_indices = @transform_9, window_bounds = array<i64: 1, 512>}, {pipeline_mode = #tpu.pipeline_mode<synchronous>, transform_indices = @transform_10, window_bounds = array<i64: 512, 128>}, {pipeline_mode = #tpu.pipeline_mode<synchronous>, transform_indices = @transform_11, window_bounds = array<i64: 1, 128>}, {pipeline_mode = #tpu.pipeline_mode<synchronous>, transform_indices = @transform_12, window_bounds = array<i64: 1, 128>}, {pipeline_mode = #tpu.pipeline_mode<synchronous>, transform_indices = @transform_13, window_bounds = array<i64: 1, 128>}, {transform_indices = @transform_14, window_bounds = array<i64: 1, 8, 128>}]} {
    %c0_i32 = arith.constant 0 : i32
    %0 = arith.cmpi eq, %arg1, %c0_i32 : i32
    %1 = arith.extui %0 : i1 to i32
    %c0_i32_0 = arith.constant 0 : i32
    %2 = arith.cmpi ne, %1, %c0_i32_0 : i32
    scf.if %2 {
      %c0_57 = arith.constant 0 : index
      %c0_58 = arith.constant 0 : index
      %c0_59 = arith.constant 0 : index
      %161 = vector.load %arg2[%c0_57, %c0_58, %c0_59] : memref<1x8x128xf32, #tpu.memory_space<vmem>>, vector<1x8x128xf32>
      %162 = vector.shape_cast %161 : vector<1x8x128xf32> to vector<8x128xf32>
      %c0_60 = arith.constant 0 : index
      %c0_61 = arith.constant 0 : index
      %c0_62 = arith.constant 0 : index
      %163 = vector.load %arg16[%c0_60, %c0_61, %c0_62] : memref<1x8x128xf32, #tpu.memory_space<vmem>>, vector<1x8x128xf32>
      %164 = vector.shape_cast %163 : vector<1x8x128xf32> to vector<8x128xf32>
      %165 = vector.shape_cast %162 : vector<8x128xf32> to vector<1x8x128xf32>
      tpu.vector_store %arg16[%c0_60, %c0_61, %c0_62], %165 {strides = array<i32>} : memref<1x8x128xf32, #tpu.memory_space<vmem>>, vector<1x8x128xf32>,
      %166 = tpu.iota {dimensions = array<i32: 0>} : vector<8x8xi32>
      %167 = tpu.iota {dimensions = array<i32: 1>} : vector<8x8xi32>
      %168 = arith.cmpi sge, %166, %167 : vector<8x8xi32>
      %169 = arith.extui %168 : vector<8x8xi1> to vector<8x8xi32>
      %170 = arith.sitofp %169 : vector<8x8xi32> to vector<8x8xf32>
      %c0_63 = arith.constant 0 : index
      %c0_64 = arith.constant 0 : index
      %c0_65 = arith.constant 0 : index
      %171 = vector.load %arg3[%c0_63, %c0_64, %c0_65] : memref<1x1x8xf32, #tpu.memory_space<vmem>>, vector<1x1x8xf32>
      %172 = vector.shape_cast %171 : vector<1x1x8xf32> to vector<1x8xf32>
      %173 = vector.broadcast %172 : vector<1x8xf32> to vector<8x8xf32>
      %174 = arith.mulf %170, %173 : vector<8x8xf32>
      %cst_66 = arith.constant 1.000000e+00 : f32
      %175 = vector.broadcast %cst_66 : f32 to vector<8x8xf32>
      %176 = arith.subf %174, %175 : vector<8x8xf32>
      %cst_67 = arith.constant 1.000000e+09 : f32
      %177 = vector.broadcast %cst_67 : f32 to vector<8x8xf32>
      %178 = arith.mulf %176, %177 : vector<8x8xf32>
      %c0_68 = arith.constant 0 : index
      %c0_69 = arith.constant 0 : index
      %179 = vector.load %arg17[%c0_68, %c0_69] : memref<8x8xf32, #tpu.memory_space<vmem>>, vector<8x8xf32>
      tpu.vector_store %arg17[%c0_68, %c0_69], %178 {strides = array<i32>} : memref<8x8xf32, #tpu.memory_space<vmem>>, vector<8x8xf32>,
    } else {
    }
    %c0 = arith.constant 0 : index
    %c0_1 = arith.constant 0 : index
    %c0_2 = arith.constant 0 : index
    %3 = vector.load %arg16[%c0, %c0_1, %c0_2] : memref<1x8x128xf32, #tpu.memory_space<vmem>>, vector<1x8x128xf32>
    %4 = vector.shape_cast %3 : vector<1x8x128xf32> to vector<8x128xf32>
    %5 = arith.truncf %4 : vector<8x128xf32> to vector<8x128xbf16>
    %c0_3 = arith.constant 0 : index
    %c0_4 = arith.constant 0 : index
    %6 = vector.load %arg4[%c0_3, %c0_4] : memref<128x384xbf16, #tpu.memory_space<vmem>>, vector<128x384xbf16>
    %cst = arith.constant dense<0.000000e+00> : vector<8x384xf32>
    %7 = tpu.matmul %5, %6, %cst {dimension_numbers = #tpu.dot_dimension_numbers<[1], [0], [0], [1], [0, 0, 1, 1], [], []>} : vector<8x128xbf16>, vector<128x384xbf16>, vector<8x384xf32> -> vector<8x384xf32>
    %c0_5 = arith.constant 0 : index
    %c0_6 = arith.constant 0 : index
    %8 = vector.load %arg5[%c0_5, %c0_6] : memref<1x384xf32, #tpu.memory_space<vmem>>, vector<1x384xf32>
    %9 = vector.broadcast %8 : vector<1x384xf32> to vector<8x384xf32>
    %10 = arith.addf %7, %9 : vector<8x384xf32>
    %11 = arith.truncf %10 : vector<8x384xf32> to vector<8x384xbf16>
    %12 = vector.extract_strided_slice %11 {offsets = [0, 0], sizes = [8, 128], strides = [1, 1]} : vector<8x384xbf16> to vector<8x128xbf16>
    %13 = vector.extract_strided_slice %12 {offsets = [0, 0], sizes = [8, 32], strides = [1, 1]} : vector<8x128xbf16> to vector<8x32xbf16>
    %14 = vector.extract_strided_slice %12 {offsets = [0, 32], sizes = [8, 32], strides = [1, 1]} : vector<8x128xbf16> to vector<8x32xbf16>
    %15 = vector.extract_strided_slice %12 {offsets = [0, 64], sizes = [8, 32], strides = [1, 1]} : vector<8x128xbf16> to vector<8x32xbf16>
    %16 = vector.extract_strided_slice %12 {offsets = [0, 96], sizes = [8, 32], strides = [1, 1]} : vector<8x128xbf16> to vector<8x32xbf16>
    %17 = vector.shape_cast %13 : vector<8x32xbf16> to vector<1x8x32xbf16>
    %18 = vector.shape_cast %14 : vector<8x32xbf16> to vector<1x8x32xbf16>
    %19 = vector.shape_cast %15 : vector<8x32xbf16> to vector<1x8x32xbf16>
    %20 = vector.shape_cast %16 : vector<8x32xbf16> to vector<1x8x32xbf16>
    %21 = tpu.concatenate %17, %18, %19, %20 in 0 : vector<1x8x32xbf16>, vector<1x8x32xbf16>, vector<1x8x32xbf16>, vector<1x8x32xbf16> -> vector<4x8x32xbf16>
    %22 = vector.extract_strided_slice %11 {offsets = [0, 128], sizes = [8, 128], strides = [1, 1]} : vector<8x384xbf16> to vector<8x128xbf16>
    %23 = vector.extract_strided_slice %22 {offsets = [0, 0], sizes = [8, 32], strides = [1, 1]} : vector<8x128xbf16> to vector<8x32xbf16>
    %24 = vector.extract_strided_slice %22 {offsets = [0, 32], sizes = [8, 32], strides = [1, 1]} : vector<8x128xbf16> to vector<8x32xbf16>
    %25 = vector.extract_strided_slice %22 {offsets = [0, 64], sizes = [8, 32], strides = [1, 1]} : vector<8x128xbf16> to vector<8x32xbf16>
    %26 = vector.extract_strided_slice %22 {offsets = [0, 96], sizes = [8, 32], strides = [1, 1]} : vector<8x128xbf16> to vector<8x32xbf16>
    %27 = vector.shape_cast %23 : vector<8x32xbf16> to vector<1x8x32xbf16>
    %28 = vector.shape_cast %24 : vector<8x32xbf16> to vector<1x8x32xbf16>
    %29 = vector.shape_cast %25 : vector<8x32xbf16> to vector<1x8x32xbf16>
    %30 = vector.shape_cast %26 : vector<8x32xbf16> to vector<1x8x32xbf16>
    %31 = tpu.concatenate %27, %28, %29, %30 in 0 : vector<1x8x32xbf16>, vector<1x8x32xbf16>, vector<1x8x32xbf16>, vector<1x8x32xbf16> -> vector<4x8x32xbf16>
    %32 = vector.extract_strided_slice %11 {offsets = [0, 256], sizes = [8, 128], strides = [1, 1]} : vector<8x384xbf16> to vector<8x128xbf16>
    %33 = vector.extract_strided_slice %32 {offsets = [0, 0], sizes = [8, 32], strides = [1, 1]} : vector<8x128xbf16> to vector<8x32xbf16>
    %34 = vector.extract_strided_slice %32 {offsets = [0, 32], sizes = [8, 32], strides = [1, 1]} : vector<8x128xbf16> to vector<8x32xbf16>
    %35 = vector.extract_strided_slice %32 {offsets = [0, 64], sizes = [8, 32], strides = [1, 1]} : vector<8x128xbf16> to vector<8x32xbf16>
    %36 = vector.extract_strided_slice %32 {offsets = [0, 96], sizes = [8, 32], strides = [1, 1]} : vector<8x128xbf16> to vector<8x32xbf16>
    %37 = vector.shape_cast %33 : vector<8x32xbf16> to vector<1x8x32xbf16>
    %38 = vector.shape_cast %34 : vector<8x32xbf16> to vector<1x8x32xbf16>
    %39 = vector.shape_cast %35 : vector<8x32xbf16> to vector<1x8x32xbf16>
    %40 = vector.shape_cast %36 : vector<8x32xbf16> to vector<1x8x32xbf16>
    %41 = tpu.concatenate %37, %38, %39, %40 in 0 : vector<1x8x32xbf16>, vector<1x8x32xbf16>, vector<1x8x32xbf16>, vector<1x8x32xbf16> -> vector<4x8x32xbf16>
    %cst_7 = arith.constant 0xFF800000 : f32
    %42 = vector.broadcast %cst_7 : f32 to vector<4x8x1xf32>
    %cst_8 = arith.constant 0.000000e+00 : f32
    %43 = vector.broadcast %cst_8 : f32 to vector<4x8x1xf32>
    %cst_9 = arith.constant 0.000000e+00 : f32
    %44 = vector.broadcast %cst_9 : f32 to vector<4x8x32xf32>
    "tpu.trace_start"() <{level = 10 : i32, message = "hqd,hkd->hqk"}> : () -> ()
    %cst_10 = arith.constant dense<0.000000e+00> : vector<4x8x8xf32>
    %45 = tpu.matmul %21, %31, %cst_10 {dimension_numbers = #tpu.dot_dimension_numbers<[2], [2], [1], [1], [0, 0, 0, 1, 1, 1], [0], [0]>} : vector<4x8x32xbf16>, vector<4x8x32xbf16>, vector<4x8x8xf32> -> vector<4x8x8xf32>
    "tpu.trace_stop"() : () -> ()
    %c0_11 = arith.constant 0 : index
    %c0_12 = arith.constant 0 : index
    %46 = vector.load %arg17[%c0_11, %c0_12] : memref<8x8xf32, #tpu.memory_space<vmem>>, vector<8x8xf32>
    %47 = vector.shape_cast %46 : vector<8x8xf32> to vector<1x8x8xf32>
    %48 = vector.broadcast %47 : vector<1x8x8xf32> to vector<4x8x8xf32>
    %49 = arith.addf %45, %48 : vector<4x8x8xf32>
    %cst_13 = arith.constant dense<0xFF800000> : vector<4x8xf32>
    %50 = vector.multi_reduction <maximumf>, %49, %cst_13 [2] : vector<4x8x8xf32> to vector<4x8xf32>
    %51 = vector.shape_cast %50 : vector<4x8xf32> to vector<4x8x1xf32>
    %52 = arith.maximumf %42, %51 : vector<4x8x1xf32>
    %53 = arith.subf %42, %52 : vector<4x8x1xf32>
    %54 = math.exp %53 : vector<4x8x1xf32>
    %55 = vector.broadcast %52 : vector<4x8x1xf32> to vector<4x8x8xf32>
    %56 = arith.subf %49, %55 : vector<4x8x8xf32>
    %57 = math.exp %56 : vector<4x8x8xf32>
    %58 = arith.mulf %54, %43 : vector<4x8x1xf32>
    %cst_14 = arith.constant dense<0.000000e+00> : vector<4x8xf32>
    %59 = vector.multi_reduction <add>, %57, %cst_14 [2] : vector<4x8x8xf32> to vector<4x8xf32>
    %60 = vector.shape_cast %59 : vector<4x8xf32> to vector<4x8x1xf32>
    %61 = arith.addf %58, %60 : vector<4x8x1xf32>
    %62 = vector.broadcast %54 : vector<4x8x1xf32> to vector<4x8x32xf32>
    %63 = arith.mulf %62, %44 : vector<4x8x32xf32>
    %64 = arith.truncf %57 : vector<4x8x8xf32> to vector<4x8x8xbf16>
    "tpu.trace_start"() <{level = 10 : i32, message = "hqk,hkd->hqd"}> : () -> ()
    %cst_15 = arith.constant dense<0.000000e+00> : vector<4x8x32xf32>
    %65 = tpu.matmul %64, %41, %cst_15 {dimension_numbers = #tpu.dot_dimension_numbers<[2], [1], [1], [2], [0, 0, 0, 1, 1, 2], [0], [0]>} : vector<4x8x8xbf16>, vector<4x8x32xbf16>, vector<4x8x32xf32> -> vector<4x8x32xf32>
    "tpu.trace_stop"() : () -> ()
    %66 = arith.addf %63, %65 : vector<4x8x32xf32>
    %67 = tpu.reciprocal %61 {approx = true} : vector<4x8x1xf32> -> vector<4x8x1xf32>
    %68 = vector.broadcast %67 : vector<4x8x1xf32> to vector<4x8x32xf32>
    %69 = arith.mulf %66, %68 : vector<4x8x32xf32>
    %70 = vector.extract_strided_slice %69 {offsets = [0, 0, 0], sizes = [1, 8, 32], strides = [1, 1, 1]} : vector<4x8x32xf32> to vector<1x8x32xf32>
    %71 = vector.shape_cast %70 : vector<1x8x32xf32> to vector<8x32xf32>
    %72 = vector.extract_strided_slice %69 {offsets = [1, 0, 0], sizes = [1, 8, 32], strides = [1, 1, 1]} : vector<4x8x32xf32> to vector<1x8x32xf32>
    %73 = vector.shape_cast %72 : vector<1x8x32xf32> to vector<8x32xf32>
    %74 = vector.extract_strided_slice %69 {offsets = [2, 0, 0], sizes = [1, 8, 32], strides = [1, 1, 1]} : vector<4x8x32xf32> to vector<1x8x32xf32>
    %75 = vector.shape_cast %74 : vector<1x8x32xf32> to vector<8x32xf32>
    %76 = vector.extract_strided_slice %69 {offsets = [3, 0, 0], sizes = [1, 8, 32], strides = [1, 1, 1]} : vector<4x8x32xf32> to vector<1x8x32xf32>
    %77 = vector.shape_cast %76 : vector<1x8x32xf32> to vector<8x32xf32>
    %78 = tpu.concatenate %71, %73, %75, %77 in 1 : vector<8x32xf32>, vector<8x32xf32>, vector<8x32xf32>, vector<8x32xf32> -> vector<8x128xf32>
    %79 = arith.truncf %78 : vector<8x128xf32> to vector<8x128xbf16>
    %c0_16 = arith.constant 0 : index
    %c0_17 = arith.constant 0 : index
    %80 = vector.load %arg6[%c0_16, %c0_17] : memref<128x128xbf16, #tpu.memory_space<vmem>>, vector<128x128xbf16>
    %cst_18 = arith.constant dense<0.000000e+00> : vector<8x128xf32>
    %81 = tpu.matmul %79, %80, %cst_18 {dimension_numbers = #tpu.dot_dimension_numbers<[1], [0], [0], [1], [0, 0, 1, 1], [], []>} : vector<8x128xbf16>, vector<128x128xbf16>, vector<8x128xf32> -> vector<8x128xf32>
    %c0_19 = arith.constant 0 : index
    %c0_20 = arith.constant 0 : index
    %82 = vector.load %arg7[%c0_19, %c0_20] : memref<1x128xf32, #tpu.memory_space<vmem>>, vector<1x128xf32>
    %83 = vector.broadcast %82 : vector<1x128xf32> to vector<8x128xf32>
    %84 = arith.addf %81, %83 : vector<8x128xf32>
    %85 = arith.addf %4, %84 : vector<8x128xf32>
    %c0_21 = arith.constant 0 : index
    %c0_22 = arith.constant 0 : index
    %86 = vector.load %arg8[%c0_21, %c0_22] : memref<1x128xf32, #tpu.memory_space<vmem>>, vector<1x128xf32>
    %c0_23 = arith.constant 0 : index
    %c0_24 = arith.constant 0 : index
    %87 = vector.load %arg9[%c0_23, %c0_24] : memref<1x128xf32, #tpu.memory_space<vmem>>, vector<1x128xf32>
    %cst_25 = arith.constant dense<0.000000e+00> : vector<8xf32>
    %88 = vector.multi_reduction <add>, %85, %cst_25 [1] : vector<8x128xf32> to vector<8xf32>
    %89 = vector.shape_cast %88 : vector<8xf32> to vector<8x1xf32>
    %cst_26 = arith.constant 1.280000e+02 : f32
    %90 = vector.broadcast %cst_26 : f32 to vector<8x1xf32>
    %91 = arith.divf %89, %90 : vector<8x1xf32>
    %92 = vector.broadcast %91 : vector<8x1xf32> to vector<8x128xf32>
    %93 = arith.subf %85, %92 : vector<8x128xf32>
    %94 = arith.mulf %93, %93 : vector<8x128xf32>
    %cst_27 = arith.constant dense<0.000000e+00> : vector<8xf32>
    %95 = vector.multi_reduction <add>, %94, %cst_27 [1] : vector<8x128xf32> to vector<8xf32>
    %96 = vector.shape_cast %95 : vector<8xf32> to vector<8x1xf32>
    %cst_28 = arith.constant 1.280000e+02 : f32
    %97 = vector.broadcast %cst_28 : f32 to vector<8x1xf32>
    %98 = arith.divf %96, %97 : vector<8x1xf32>
    %cst_29 = arith.constant 9.99999974E-6 : f32
    %99 = vector.broadcast %cst_29 : f32 to vector<8x1xf32>
    %100 = arith.addf %98, %99 : vector<8x1xf32>
    %101 = math.rsqrt %100 : vector<8x1xf32>
    %102 = vector.broadcast %101 : vector<8x1xf32> to vector<8x128xf32>
    %103 = arith.mulf %93, %102 : vector<8x128xf32>
    %104 = vector.broadcast %86 : vector<1x128xf32> to vector<8x128xf32>
    %105 = arith.mulf %104, %103 : vector<8x128xf32>
    %106 = vector.broadcast %87 : vector<1x128xf32> to vector<8x128xf32>
    %107 = arith.addf %105, %106 : vector<8x128xf32>
    %108 = arith.truncf %107 : vector<8x128xf32> to vector<8x128xbf16>
    %cst_30 = arith.constant 0.000000e+00 : f32
    %109 = vector.broadcast %cst_30 : f32 to vector<8x128xf32>
    %c0_31 = arith.constant 0 : index
    %c0_32 = arith.constant 0 : index
    %110 = vector.load %arg10[%c0_31, %c0_32] : memref<128x512xbf16, #tpu.memory_space<vmem>>, vector<128x512xbf16>
    %cst_33 = arith.constant dense<0.000000e+00> : vector<8x512xf32>
    %111 = tpu.matmul %108, %110, %cst_33 {dimension_numbers = #tpu.dot_dimension_numbers<[1], [0], [0], [1], [0, 0, 1, 1], [], []>} : vector<8x128xbf16>, vector<128x512xbf16>, vector<8x512xf32> -> vector<8x512xf32>
    %c0_34 = arith.constant 0 : index
    %c0_35 = arith.constant 0 : index
    %112 = vector.load %arg11[%c0_34, %c0_35] : memref<1x512xf32, #tpu.memory_space<vmem>>, vector<1x512xf32>
    %113 = vector.broadcast %112 : vector<1x512xf32> to vector<8x512xf32>
    %114 = arith.addf %111, %113 : vector<8x512xf32>
    %cst_36 = arith.constant 5.000000e-01 : f32
    %115 = vector.broadcast %cst_36 : f32 to vector<8x512xf32>
    %116 = arith.mulf %115, %114 : vector<8x512xf32>
    %117 = arith.mulf %114, %114 : vector<8x512xf32>
    %118 = arith.mulf %114, %117 : vector<8x512xf32>
    %cst_37 = arith.constant 4.471500e-02 : f32
    %119 = vector.broadcast %cst_37 : f32 to vector<8x512xf32>
    %120 = arith.mulf %119, %118 : vector<8x512xf32>
    %121 = arith.addf %114, %120 : vector<8x512xf32>
    %cst_38 = arith.constant 0.797884583 : f32
    %122 = vector.broadcast %cst_38 : f32 to vector<8x512xf32>
    %123 = arith.mulf %122, %121 : vector<8x512xf32>
    %124 = math.tanh %123 : vector<8x512xf32>
    %cst_39 = arith.constant 1.000000e+00 : f32
    %125 = vector.broadcast %cst_39 : f32 to vector<8x512xf32>
    %126 = arith.addf %125, %124 : vector<8x512xf32>
    %127 = arith.mulf %116, %126 : vector<8x512xf32>
    %128 = arith.truncf %127 : vector<8x512xf32> to vector<8x512xbf16>
    %c0_40 = arith.constant 0 : index
    %c0_41 = arith.constant 0 : index
    %129 = vector.load %arg12[%c0_40, %c0_41] : memref<512x128xbf16, #tpu.memory_space<vmem>>, vector<512x128xbf16>
    %cst_42 = arith.constant dense<0.000000e+00> : vector<8x128xf32>
    %130 = tpu.matmul %128, %129, %cst_42 {dimension_numbers = #tpu.dot_dimension_numbers<[1], [0], [0], [1], [0, 0, 1, 1], [], []>} : vector<8x512xbf16>, vector<512x128xbf16>, vector<8x128xf32> -> vector<8x128xf32>
    %131 = arith.addf %109, %130 : vector<8x128xf32>
    %c0_43 = arith.constant 0 : index
    %c0_44 = arith.constant 0 : index
    %132 = vector.load %arg13[%c0_43, %c0_44] : memref<1x128xf32, #tpu.memory_space<vmem>>, vector<1x128xf32>
    %133 = vector.broadcast %132 : vector<1x128xf32> to vector<8x128xf32>
    %134 = arith.addf %131, %133 : vector<8x128xf32>
    %135 = arith.addf %107, %134 : vector<8x128xf32>
    %c0_45 = arith.constant 0 : index
    %c0_46 = arith.constant 0 : index
    %136 = vector.load %arg14[%c0_45, %c0_46] : memref<1x128xf32, #tpu.memory_space<vmem>>, vector<1x128xf32>
    %c0_47 = arith.constant 0 : index
    %c0_48 = arith.constant 0 : index
    %137 = vector.load %arg15[%c0_47, %c0_48] : memref<1x128xf32, #tpu.memory_space<vmem>>, vector<1x128xf32>
    %cst_49 = arith.constant dense<0.000000e+00> : vector<8xf32>
    %138 = vector.multi_reduction <add>, %135, %cst_49 [1] : vector<8x128xf32> to vector<8xf32>
    %139 = vector.shape_cast %138 : vector<8xf32> to vector<8x1xf32>
    %cst_50 = arith.constant 1.280000e+02 : f32
    %140 = vector.broadcast %cst_50 : f32 to vector<8x1xf32>
    %141 = arith.divf %139, %140 : vector<8x1xf32>
    %142 = vector.broadcast %141 : vector<8x1xf32> to vector<8x128xf32>
    %143 = arith.subf %135, %142 : vector<8x128xf32>
    %144 = arith.mulf %143, %143 : vector<8x128xf32>
    %cst_51 = arith.constant dense<0.000000e+00> : vector<8xf32>
    %145 = vector.multi_reduction <add>, %144, %cst_51 [1] : vector<8x128xf32> to vector<8xf32>
    %146 = vector.shape_cast %145 : vector<8xf32> to vector<8x1xf32>
    %cst_52 = arith.constant 1.280000e+02 : f32
    %147 = vector.broadcast %cst_52 : f32 to vector<8x1xf32>
    %148 = arith.divf %146, %147 : vector<8x1xf32>
    %cst_53 = arith.constant 9.99999974E-6 : f32
    %149 = vector.broadcast %cst_53 : f32 to vector<8x1xf32>
    %150 = arith.addf %148, %149 : vector<8x1xf32>
    %151 = math.rsqrt %150 : vector<8x1xf32>
    %152 = vector.broadcast %151 : vector<8x1xf32> to vector<8x128xf32>
    %153 = arith.mulf %143, %152 : vector<8x128xf32>
    %154 = vector.broadcast %136 : vector<1x128xf32> to vector<8x128xf32>
    %155 = arith.mulf %154, %153 : vector<8x128xf32>
    %156 = vector.broadcast %137 : vector<1x128xf32> to vector<8x128xf32>
    %157 = arith.addf %155, %156 : vector<8x128xf32>
    %c0_54 = arith.constant 0 : index
    %c0_55 = arith.constant 0 : index
    %c0_56 = arith.constant 0 : index
    %158 = vector.load %arg16[%c0_54, %c0_55, %c0_56] : memref<1x8x128xf32, #tpu.memory_space<vmem>>, vector<1x8x128xf32>
    %159 = vector.shape_cast %158 : vector<1x8x128xf32> to vector<8x128xf32>
    %160 = vector.shape_cast %157 : vector<8x128xf32> to vector<1x8x128xf32>
    tpu.vector_store %arg16[%c0_54, %c0_55, %c0_56], %160 {strides = array<i32>} : memref<1x8x128xf32, #tpu.memory_space<vmem>>, vector<1x8x128xf32>,
    return
  }
  func.func @transform_0(%arg0: i32, %arg1: i32) -> (i32, i32, i32) {
    %c0_i32 = arith.constant 0 : i32
    %c0_i32_0 = arith.constant 0 : i32
    %c0_i32_1 = arith.constant 0 : i32
    return %arg0, %c0_i32, %c0_i32_0 : i32, i32, i32
  }
  func.func @transform_1(%arg0: i32, %arg1: i32) -> (i32, i32, i32) {
    %c0_i32 = arith.constant 0 : i32
    %c0_i32_0 = arith.constant 0 : i32
    %c0_i32_1 = arith.constant 0 : i32
    return %arg0, %c0_i32, %c0_i32_0 : i32, i32, i32
  }
  func.func @transform_2(%arg0: i32, %arg1: i32) -> (i32, i32) {
    %c0_i32 = arith.constant 0 : i32
    %c0_i32_0 = arith.constant 0 : i32
    %c0_i32_1 = arith.constant 0 : i32
    return %c0_i32, %c0_i32_0 : i32, i32
  }
  func.func @transform_3(%arg0: i32, %arg1: i32) -> (i32, i32) {
    %c0_i32 = arith.constant 0 : i32
    %c0_i32_0 = arith.constant 0 : i32
    %c0_i32_1 = arith.constant 0 : i32
    return %c0_i32, %c0_i32_0 : i32, i32
  }
  func.func @transform_4(%arg0: i32, %arg1: i32) -> (i32, i32) {
    %c0_i32 = arith.constant 0 : i32
    %c0_i32_0 = arith.constant 0 : i32
    %c0_i32_1 = arith.constant 0 : i32
    return %c0_i32, %c0_i32_0 : i32, i32
  }
  func.func @transform_5(%arg0: i32, %arg1: i32) -> (i32, i32) {
    %c0_i32 = arith.constant 0 : i32
    %c0_i32_0 = arith.constant 0 : i32
    %c0_i32_1 = arith.constant 0 : i32
    return %c0_i32, %c0_i32_0 : i32, i32
  }
  func.func @transform_6(%arg0: i32, %arg1: i32) -> (i32, i32) {
    %c0_i32 = arith.constant 0 : i32
    %c0_i32_0 = arith.constant 0 : i32
    %c0_i32_1 = arith.constant 0 : i32
    return %c0_i32, %c0_i32_0 : i32, i32
  }
  func.func @transform_7(%arg0: i32, %arg1: i32) -> (i32, i32) {
    %c0_i32 = arith.constant 0 : i32
    %c0_i32_0 = arith.constant 0 : i32
    %c0_i32_1 = arith.constant 0 : i32
    return %c0_i32, %c0_i32_0 : i32, i32
  }
  func.func @transform_8(%arg0: i32, %arg1: i32) -> (i32, i32) {
    %c0_i32 = arith.constant 0 : i32
    %c0_i32_0 = arith.constant 0 : i32
    %c0_i32_1 = arith.constant 0 : i32
    return %c0_i32, %c0_i32_0 : i32, i32
  }
  func.func @transform_9(%arg0: i32, %arg1: i32) -> (i32, i32) {
    %c0_i32 = arith.constant 0 : i32
    %c0_i32_0 = arith.constant 0 : i32
    %c0_i32_1 = arith.constant 0 : i32
    return %c0_i32, %c0_i32_0 : i32, i32
  }
  func.func @transform_10(%arg0: i32, %arg1: i32) -> (i32, i32) {
    %c0_i32 = arith.constant 0 : i32
    %c0_i32_0 = arith.constant 0 : i32
    %c0_i32_1 = arith.constant 0 : i32
    return %c0_i32, %c0_i32_0 : i32, i32
  }
  func.func @transform_11(%arg0: i32, %arg1: i32) -> (i32, i32) {
    %c0_i32 = arith.constant 0 : i32
    %c0_i32_0 = arith.constant 0 : i32
    %c0_i32_1 = arith.constant 0 : i32
    return %c0_i32, %c0_i32_0 : i32, i32
  }
  func.func @transform_12(%arg0: i32, %arg1: i32) -> (i32, i32) {
    %c0_i32 = arith.constant 0 : i32
    %c0_i32_0 = arith.constant 0 : i32
    %c0_i32_1 = arith.constant 0 : i32
    return %c0_i32, %c0_i32_0 : i32, i32
  }
  func.func @transform_13(%arg0: i32, %arg1: i32) -> (i32, i32) {
    %c0_i32 = arith.constant 0 : i32
    %c0_i32_0 = arith.constant 0 : i32
    %c0_i32_1 = arith.constant 0 : i32
    return %c0_i32, %c0_i32_0 : i32, i32
  }
  func.func @transform_14(%arg0: i32, %arg1: i32) -> (i32, i32, i32) {
    %c0_i32 = arith.constant 0 : i32
    %c0_i32_0 = arith.constant 0 : i32
    %c0_i32_1 = arith.constant 0 : i32
    return %arg0, %c0_i32, %c0_i32_0 : i32, i32, i32
  }
}

module attributes {stable_mosaic.version = 11 : i64} {
  func.func @stack_kernel(%arg0: i32, %arg1: i32, %arg2: memref<1x8x128xf32, #tpu.memory_space<vmem>>, %arg3: memref<1x1x8xf32, #tpu.memory_space<vmem>>, %arg4: memref<128x384xbf16, #tpu.memory_space<vmem>>, %arg5: memref<1x384xf32, #tpu.memory_space<vmem>>, %arg6: memref<128x128xbf16, #tpu.memory_space<vmem>>, %arg7: memref<1x128xf32, #tpu.memory_space<vmem>>, %arg8: memref<1x128xf32, #tpu.memory_space<vmem>>, %arg9: memref<1x128xf32, #tpu.memory_space<vmem>>, %arg10: memref<128x512xbf16, #tpu.memory_space<vmem>>, %arg11: memref<1x512xf32, #tpu.memory_space<vmem>>, %arg12: memref<512x128xbf16, #tpu.memory_space<vmem>>, %arg13: memref<1x128xf32, #tpu.memory_space<vmem>>, %arg14: memref<1x128xf32, #tpu.memory_space<vmem>>, %arg15: memref<1x128xf32, #tpu.memory_space<vmem>>, %arg16: memref<1x8x128xf32, #tpu.memory_space<vmem>>, %arg17: memref<8x8xf32, #tpu.memory_space<vmem>>) attributes {dimension_semantics = [#tpu.dimension_semantics<parallel>, #tpu.dimension_semantics<arbitrary>], iteration_bounds = array<i64: 2, 2>, scalar_prefetch = 0 : i64, scratch_operands = 1 : i64, tpu.core_type = #tpu.core_type<tc>, window_params = [{transform_indices = @transform_0, window_bounds = array<i64: 1, 8, 128>}, {transform_indices = @transform_1, window_bounds = array<i64: 1, 1, 8>}, {pipeline_mode = #tpu.pipeline_mode<synchronous>, transform_indices = @transform_2, window_bounds = array<i64: 128, 384>}, {pipeline_mode = #tpu.pipeline_mode<synchronous>, transform_indices = @transform_3, window_bounds = array<i64: 1, 384>}, {pipeline_mode = #tpu.pipeline_mode<synchronous>, transform_indices = @transform_4, window_bounds = array<i64: 128, 128>}, {pipeline_mode = #tpu.pipeline_mode<synchronous>, transform_indices = @transform_5, window_bounds = array<i64: 1, 128>}, {pipeline_mode = #tpu.pipeline_mode<synchronous>, transform_indices = @transform_6, window_bounds = array<i64: 1, 128>}, {pipeline_mode = #tpu.pipeline_mode<synchronous>, transform_indices = @transform_7, window_bounds = array<i64: 1, 128>}, {pipeline_mode = #tpu.pipeline_mode<synchronous>, transform_indices = @transform_8, window_bounds = array<i64: 128, 512>}, {pipeline_mode = #tpu.pipeline_mode<synchronous>, transform_indices = @transform_9, window_bounds = array<i64: 1, 512>}, {pipeline_mode = #tpu.pipeline_mode<synchronous>, transform_indices = @transform_10, window_bounds = array<i64: 512, 128>}, {pipeline_mode = #tpu.pipeline_mode<synchronous>, transform_indices = @transform_11, window_bounds = array<i64: 1, 128>}, {pipeline_mode = #tpu.pipeline_mode<synchronous>, transform_indices = @transform_12, window_bounds = array<i64: 1, 128>}, {pipeline_mode = #tpu.pipeline_mode<synchronous>, transform_indices = @transform_13, window_bounds = array<i64: 1, 128>}, {transform_indices = @transform_14, window_bounds = array<i64: 1, 8, 128>}]} {
    %c0_i32 = arith.constant 0 : i32
    %0 = arith.cmpi eq, %arg1, %c0_i32 : i32
    %1 = arith.extui %0 : i1 to i32
    %c0_i32_0 = arith.constant 0 : i32
    %2 = arith.cmpi ne, %1, %c0_i32_0 : i32
    scf.if %2 {
      %c0_57 = arith.constant 0 : index
      %c0_58 = arith.constant 0 : index
      %c0_59 = arith.constant 0 : index
      %161 = vector.load %arg2[%c0_57, %c0_58, %c0_59] : memref<1x8x128xf32, #tpu.memory_space<vmem>>, vector<1x8x128xf32>
      %162 = vector.shape_cast %161 : vector<1x8x128xf32> to vector<8x128xf32>
      %c0_60 = arith.constant 0 : index
      %c0_61 = arith.constant 0 : index
      %c0_62 = arith.constant 0 : index
      %163 = vector.load %arg16[%c0_60, %c0_61, %c0_62] : memref<1x8x128xf32, #tpu.memory_space<vmem>>, vector<1x8x128xf32>
      %164 = vector.shape_cast %163 : vector<1x8x128xf32> to vector<8x128xf32>
      %165 = vector.shape_cast %162 : vector<8x128xf32> to vector<1x8x128xf32>
      tpu.vector_store %arg16[%c0_60, %c0_61, %c0_62], %165 {strides = array<i32>} : memref<1x8x128xf32, #tpu.memory_space<vmem>>, vector<1x8x128xf32>,
      %166 = tpu.iota {dimensions = array<i32: 0>} : vector<8x8xi32>
      %167 = tpu.iota {dimensions = array<i32: 1>} : vector<8x8xi32>
      %168 = arith.cmpi sge, %166, %167 : vector<8x8xi32>
      %169 = arith.extui %168 : vector<8x8xi1> to vector<8x8xi32>
      %170 = arith.sitofp %169 : vector<8x8xi32> to vector<8x8xf32>
      %c0_63 = arith.constant 0 : index
      %c0_64 = arith.constant 0 : index
      %c0_65 = arith.constant 0 : index
      %171 = vector.load %arg3[%c0_63, %c0_64, %c0_65] : memref<1x1x8xf32, #tpu.memory_space<vmem>>, vector<1x1x8xf32>
      %172 = vector.shape_cast %171 : vector<1x1x8xf32> to vector<1x8xf32>
      %173 = vector.broadcast %172 : vector<1x8xf32> to vector<8x8xf32>
      %174 = arith.mulf %170, %173 : vector<8x8xf32>
      %cst_66 = arith.constant 1.000000e+00 : f32
      %175 = vector.broadcast %cst_66 : f32 to vector<8x8xf32>
      %176 = arith.subf %174, %175 : vector<8x8xf32>
      %cst_67 = arith.constant 1.000000e+09 : f32
      %177 = vector.broadcast %cst_67 : f32 to vector<8x8xf32>
      %178 = arith.mulf %176, %177 : vector<8x8xf32>
      %c0_68 = arith.constant 0 : index
      %c0_69 = arith.constant 0 : index
      %179 = vector.load %arg17[%c0_68, %c0_69] : memref<8x8xf32, #tpu.memory_space<vmem>>, vector<8x8xf32>
      tpu.vector_store %arg17[%c0_68, %c0_69], %178 {strides = array<i32>} : memref<8x8xf32, #tpu.memory_space<vmem>>, vector<8x8xf32>,
    } else {
    }
    %c0 = arith.constant 0 : index
    %c0_1 = arith.constant 0 : index
    %c0_2 = arith.constant 0 : index
    %3 = vector.load %arg16[%c0, %c0_1, %c0_2] : memref<1x8x128xf32, #tpu.memory_space<vmem>>, vector<1x8x128xf32>
    %4 = vector.shape_cast %3 : vector<1x8x128xf32> to vector<8x128xf32>
    %5 = arith.truncf %4 : vector<8x128xf32> to vector<8x128xbf16>
    %c0_3 = arith.constant 0 : index
    %c0_4 = arith.constant 0 : index
    %6 = vector.load %arg4[%c0_3, %c0_4] : memref<128x384xbf16, #tpu.memory_space<vmem>>, vector<128x384xbf16>
    %cst = arith.constant dense<0.000000e+00> : vector<8x384xf32>
    %7 = tpu.matmul %5, %6, %cst {dimension_numbers = #tpu.dot_dimension_numbers<[1], [0], [0], [1], [0, 0, 1, 1], [], []>} : vector<8x128xbf16>, vector<128x384xbf16>, vector<8x384xf32> -> vector<8x384xf32>
    %c0_5 = arith.constant 0 : index
    %c0_6 = arith.constant 0 : index
    %8 = vector.load %arg5[%c0_5, %c0_6] : memref<1x384xf32, #tpu.memory_space<vmem>>, vector<1x384xf32>
    %9 = vector.broadcast %8 : vector<1x384xf32> to vector<8x384xf32>
    %10 = arith.addf %7, %9 : vector<8x384xf32>
    %11 = arith.truncf %10 : vector<8x384xf32> to vector<8x384xbf16>
    %12 = vector.extract_strided_slice %11 {offsets = [0, 0], sizes = [8, 128], strides = [1, 1]} : vector<8x384xbf16> to vector<8x128xbf16>
    %13 = vector.extract_strided_slice %12 {offsets = [0, 0], sizes = [8, 32], strides = [1, 1]} : vector<8x128xbf16> to vector<8x32xbf16>
    %14 = vector.extract_strided_slice %12 {offsets = [0, 32], sizes = [8, 32], strides = [1, 1]} : vector<8x128xbf16> to vector<8x32xbf16>
    %15 = vector.extract_strided_slice %12 {offsets = [0, 64], sizes = [8, 32], strides = [1, 1]} : vector<8x128xbf16> to vector<8x32xbf16>
    %16 = vector.extract_strided_slice %12 {offsets = [0, 96], sizes = [8, 32], strides = [1, 1]} : vector<8x128xbf16> to vector<8x32xbf16>
    %17 = vector.shape_cast %13 : vector<8x32xbf16> to vector<1x8x32xbf16>
    %18 = vector.shape_cast %14 : vector<8x32xbf16> to vector<1x8x32xbf16>
    %19 = vector.shape_cast %15 : vector<8x32xbf16> to vector<1x8x32xbf16>
    %20 = vector.shape_cast %16 : vector<8x32xbf16> to vector<1x8x32xbf16>
    %21 = tpu.concatenate %17, %18, %19, %20 in 0 : vector<1x8x32xbf16>, vector<1x8x32xbf16>, vector<1x8x32xbf16>, vector<1x8x32xbf16> -> vector<4x8x32xbf16>
    %22 = vector.extract_strided_slice %11 {offsets = [0, 128], sizes = [8, 128], strides = [1, 1]} : vector<8x384xbf16> to vector<8x128xbf16>
    %23 = vector.extract_strided_slice %22 {offsets = [0, 0], sizes = [8, 32], strides = [1, 1]} : vector<8x128xbf16> to vector<8x32xbf16>
    %24 = vector.extract_strided_slice %22 {offsets = [0, 32], sizes = [8, 32], strides = [1, 1]} : vector<8x128xbf16> to vector<8x32xbf16>
    %25 = vector.extract_strided_slice %22 {offsets = [0, 64], sizes = [8, 32], strides = [1, 1]} : vector<8x128xbf16> to vector<8x32xbf16>
    %26 = vector.extract_strided_slice %22 {offsets = [0, 96], sizes = [8, 32], strides = [1, 1]} : vector<8x128xbf16> to vector<8x32xbf16>
    %27 = vector.shape_cast %23 : vector<8x32xbf16> to vector<1x8x32xbf16>
    %28 = vector.shape_cast %24 : vector<8x32xbf16> to vector<1x8x32xbf16>
    %29 = vector.shape_cast %25 : vector<8x32xbf16> to vector<1x8x32xbf16>
    %30 = vector.shape_cast %26 : vector<8x32xbf16> to vector<1x8x32xbf16>
    %31 = tpu.concatenate %27, %28, %29, %30 in 0 : vector<1x8x32xbf16>, vector<1x8x32xbf16>, vector<1x8x32xbf16>, vector<1x8x32xbf16> -> vector<4x8x32xbf16>
    %32 = vector.extract_strided_slice %11 {offsets = [0, 256], sizes = [8, 128], strides = [1, 1]} : vector<8x384xbf16> to vector<8x128xbf16>
    %33 = vector.extract_strided_slice %32 {offsets = [0, 0], sizes = [8, 32], strides = [1, 1]} : vector<8x128xbf16> to vector<8x32xbf16>
    %34 = vector.extract_strided_slice %32 {offsets = [0, 32], sizes = [8, 32], strides = [1, 1]} : vector<8x128xbf16> to vector<8x32xbf16>
    %35 = vector.extract_strided_slice %32 {offsets = [0, 64], sizes = [8, 32], strides = [1, 1]} : vector<8x128xbf16> to vector<8x32xbf16>
    %36 = vector.extract_strided_slice %32 {offsets = [0, 96], sizes = [8, 32], strides = [1, 1]} : vector<8x128xbf16> to vector<8x32xbf16>
    %37 = vector.shape_cast %33 : vector<8x32xbf16> to vector<1x8x32xbf16>
    %38 = vector.shape_cast %34 : vector<8x32xbf16> to vector<1x8x32xbf16>
    %39 = vector.shape_cast %35 : vector<8x32xbf16> to vector<1x8x32xbf16>
    %40 = vector.shape_cast %36 : vector<8x32xbf16> to vector<1x8x32xbf16>
    %41 = tpu.concatenate %37, %38, %39, %40 in 0 : vector<1x8x32xbf16>, vector<1x8x32xbf16>, vector<1x8x32xbf16>, vector<1x8x32xbf16> -> vector<4x8x32xbf16>
    %cst_7 = arith.constant 0xFF800000 : f32
    %42 = vector.broadcast %cst_7 : f32 to vector<4x8x1xf32>
    %cst_8 = arith.constant 0.000000e+00 : f32
    %43 = vector.broadcast %cst_8 : f32 to vector<4x8x1xf32>
    %cst_9 = arith.constant 0.000000e+00 : f32
    %44 = vector.broadcast %cst_9 : f32 to vector<4x8x32xf32>
    "tpu.trace_start"() <{level = 10 : i32, message = "hqd,hkd->hqk"}> : () -> ()
    %cst_10 = arith.constant dense<0.000000e+00> : vector<4x8x8xf32>
    %45 = tpu.matmul %21, %31, %cst_10 {dimension_numbers = #tpu.dot_dimension_numbers<[2], [2], [1], [1], [0, 0, 0, 1, 1, 1], [0], [0]>} : vector<4x8x32xbf16>, vector<4x8x32xbf16>, vector<4x8x8xf32> -> vector<4x8x8xf32>
    "tpu.trace_stop"() : () -> ()
    %c0_11 = arith.constant 0 : index
    %c0_12 = arith.constant 0 : index
    %46 = vector.load %arg17[%c0_11, %c0_12] : memref<8x8xf32, #tpu.memory_space<vmem>>, vector<8x8xf32>
    %47 = vector.shape_cast %46 : vector<8x8xf32> to vector<1x8x8xf32>
    %48 = vector.broadcast %47 : vector<1x8x8xf32> to vector<4x8x8xf32>
    %49 = arith.addf %45, %48 : vector<4x8x8xf32>
    %cst_13 = arith.constant dense<0xFF800000> : vector<4x8xf32>
    %50 = vector.multi_reduction <maximumf>, %49, %cst_13 [2] : vector<4x8x8xf32> to vector<4x8xf32>
    %51 = vector.shape_cast %50 : vector<4x8xf32> to vector<4x8x1xf32>
    %52 = arith.maximumf %42, %51 : vector<4x8x1xf32>
    %53 = arith.subf %42, %52 : vector<4x8x1xf32>
    %54 = math.exp %53 : vector<4x8x1xf32>
    %55 = vector.broadcast %52 : vector<4x8x1xf32> to vector<4x8x8xf32>
    %56 = arith.subf %49, %55 : vector<4x8x8xf32>
    %57 = math.exp %56 : vector<4x8x8xf32>
    %58 = arith.mulf %54, %43 : vector<4x8x1xf32>
    %cst_14 = arith.constant dense<0.000000e+00> : vector<4x8xf32>
    %59 = vector.multi_reduction <add>, %57, %cst_14 [2] : vector<4x8x8xf32> to vector<4x8xf32>
    %60 = vector.shape_cast %59 : vector<4x8xf32> to vector<4x8x1xf32>
    %61 = arith.addf %58, %60 : vector<4x8x1xf32>
    %62 = vector.broadcast %54 : vector<4x8x1xf32> to vector<4x8x32xf32>
    %63 = arith.mulf %62, %44 : vector<4x8x32xf32>
    %64 = arith.truncf %57 : vector<4x8x8xf32> to vector<4x8x8xbf16>
    "tpu.trace_start"() <{level = 10 : i32, message = "hqk,hkd->hqd"}> : () -> ()
    %cst_15 = arith.constant dense<0.000000e+00> : vector<4x8x32xf32>
    %65 = tpu.matmul %64, %41, %cst_15 {dimension_numbers = #tpu.dot_dimension_numbers<[2], [1], [1], [2], [0, 0, 0, 1, 1, 2], [0], [0]>} : vector<4x8x8xbf16>, vector<4x8x32xbf16>, vector<4x8x32xf32> -> vector<4x8x32xf32>
    "tpu.trace_stop"() : () -> ()
    %66 = arith.addf %63, %65 : vector<4x8x32xf32>
    %67 = tpu.reciprocal %61 {approx = true} : vector<4x8x1xf32> -> vector<4x8x1xf32>
    %68 = vector.broadcast %67 : vector<4x8x1xf32> to vector<4x8x32xf32>
    %69 = arith.mulf %66, %68 : vector<4x8x32xf32>
    %70 = vector.extract_strided_slice %69 {offsets = [0, 0, 0], sizes = [1, 8, 32], strides = [1, 1, 1]} : vector<4x8x32xf32> to vector<1x8x32xf32>
    %71 = vector.shape_cast %70 : vector<1x8x32xf32> to vector<8x32xf32>
    %72 = vector.extract_strided_slice %69 {offsets = [1, 0, 0], sizes = [1, 8, 32], strides = [1, 1, 1]} : vector<4x8x32xf32> to vector<1x8x32xf32>
    %73 = vector.shape_cast %72 : vector<1x8x32xf32> to vector<8x32xf32>
    %74 = vector.extract_strided_slice %69 {offsets = [2, 0, 0], sizes = [1, 8, 32], strides = [1, 1, 1]} : vector<4x8x32xf32> to vector<1x8x32xf32>
    %75 = vector.shape_cast %74 : vector<1x8x32xf32> to vector<8x32xf32>
    %76 = vector.extract_strided_slice %69 {offsets = [3, 0, 0], sizes = [1, 8, 32], strides = [1, 1, 1]} : vector<4x8x32xf32> to vector<1x8x32xf32>
    %77 = vector.shape_cast %76 : vector<1x8x32xf32> to vector<8x32xf32>
    %78 = tpu.concatenate %71, %73, %75, %77 in 1 : vector<8x32xf32>, vector<8x32xf32>, vector<8x32xf32>, vector<8x32xf32> -> vector<8x128xf32>
    %79 = arith.truncf %78 : vector<8x128xf32> to vector<8x128xbf16>
    %c0_16 = arith.constant 0 : index
    %c0_17 = arith.constant 0 : index
    %80 = vector.load %arg6[%c0_16, %c0_17] : memref<128x128xbf16, #tpu.memory_space<vmem>>, vector<128x128xbf16>
    %cst_18 = arith.constant dense<0.000000e+00> : vector<8x128xf32>
    %81 = tpu.matmul %79, %80, %cst_18 {dimension_numbers = #tpu.dot_dimension_numbers<[1], [0], [0], [1], [0, 0, 1, 1], [], []>} : vector<8x128xbf16>, vector<128x128xbf16>, vector<8x128xf32> -> vector<8x128xf32>
    %c0_19 = arith.constant 0 : index
    %c0_20 = arith.constant 0 : index
    %82 = vector.load %arg7[%c0_19, %c0_20] : memref<1x128xf32, #tpu.memory_space<vmem>>, vector<1x128xf32>
    %83 = vector.broadcast %82 : vector<1x128xf32> to vector<8x128xf32>
    %84 = arith.addf %81, %83 : vector<8x128xf32>
    %85 = arith.addf %4, %84 : vector<8x128xf32>
    %c0_21 = arith.constant 0 : index
    %c0_22 = arith.constant 0 : index
    %86 = vector.load %arg8[%c0_21, %c0_22] : memref<1x128xf32, #tpu.memory_space<vmem>>, vector<1x128xf32>
    %c0_23 = arith.constant 0 : index
    %c0_24 = arith.constant 0 : index
    %87 = vector.load %arg9[%c0_23, %c0_24] : memref<1x128xf32, #tpu.memory_space<vmem>>, vector<1x128xf32>
    %cst_25 = arith.constant dense<0.000000e+00> : vector<8xf32>
    %88 = vector.multi_reduction <add>, %85, %cst_25 [1] : vector<8x128xf32> to vector<8xf32>
    %89 = vector.shape_cast %88 : vector<8xf32> to vector<8x1xf32>
    %cst_26 = arith.constant 1.280000e+02 : f32
    %90 = vector.broadcast %cst_26 : f32 to vector<8x1xf32>
    %91 = arith.divf %89, %90 : vector<8x1xf32>
    %92 = vector.broadcast %91 : vector<8x1xf32> to vector<8x128xf32>
    %93 = arith.subf %85, %92 : vector<8x128xf32>
    %94 = arith.mulf %93, %93 : vector<8x128xf32>
    %cst_27 = arith.constant dense<0.000000e+00> : vector<8xf32>
    %95 = vector.multi_reduction <add>, %94, %cst_27 [1] : vector<8x128xf32> to vector<8xf32>
    %96 = vector.shape_cast %95 : vector<8xf32> to vector<8x1xf32>
    %cst_28 = arith.constant 1.280000e+02 : f32
    %97 = vector.broadcast %cst_28 : f32 to vector<8x1xf32>
    %98 = arith.divf %96, %97 : vector<8x1xf32>
    %cst_29 = arith.constant 9.99999974E-6 : f32
    %99 = vector.broadcast %cst_29 : f32 to vector<8x1xf32>
    %100 = arith.addf %98, %99 : vector<8x1xf32>
    %101 = math.rsqrt %100 : vector<8x1xf32>
    %102 = vector.broadcast %101 : vector<8x1xf32> to vector<8x128xf32>
    %103 = arith.mulf %93, %102 : vector<8x128xf32>
    %104 = vector.broadcast %86 : vector<1x128xf32> to vector<8x128xf32>
    %105 = arith.mulf %104, %103 : vector<8x128xf32>
    %106 = vector.broadcast %87 : vector<1x128xf32> to vector<8x128xf32>
    %107 = arith.addf %105, %106 : vector<8x128xf32>
    %108 = arith.truncf %107 : vector<8x128xf32> to vector<8x128xbf16>
    %cst_30 = arith.constant 0.000000e+00 : f32
    %109 = vector.broadcast %cst_30 : f32 to vector<8x128xf32>
    %c0_31 = arith.constant 0 : index
    %c0_32 = arith.constant 0 : index
    %110 = vector.load %arg10[%c0_31, %c0_32] : memref<128x512xbf16, #tpu.memory_space<vmem>>, vector<128x512xbf16>
    %cst_33 = arith.constant dense<0.000000e+00> : vector<8x512xf32>
    %111 = tpu.matmul %108, %110, %cst_33 {dimension_numbers = #tpu.dot_dimension_numbers<[1], [0], [0], [1], [0, 0, 1, 1], [], []>} : vector<8x128xbf16>, vector<128x512xbf16>, vector<8x512xf32> -> vector<8x512xf32>
    %c0_34 = arith.constant 0 : index
    %c0_35 = arith.constant 0 : index
    %112 = vector.load %arg11[%c0_34, %c0_35] : memref<1x512xf32, #tpu.memory_space<vmem>>, vector<1x512xf32>
    %113 = vector.broadcast %112 : vector<1x512xf32> to vector<8x512xf32>
    %114 = arith.addf %111, %113 : vector<8x512xf32>
    %cst_36 = arith.constant 5.000000e-01 : f32
    %115 = vector.broadcast %cst_36 : f32 to vector<8x512xf32>
    %116 = arith.mulf %115, %114 : vector<8x512xf32>
    %117 = arith.mulf %114, %114 : vector<8x512xf32>
    %118 = arith.mulf %114, %117 : vector<8x512xf32>
    %cst_37 = arith.constant 4.471500e-02 : f32
    %119 = vector.broadcast %cst_37 : f32 to vector<8x512xf32>
    %120 = arith.mulf %119, %118 : vector<8x512xf32>
    %121 = arith.addf %114, %120 : vector<8x512xf32>
    %cst_38 = arith.constant 0.797884583 : f32
    %122 = vector.broadcast %cst_38 : f32 to vector<8x512xf32>
    %123 = arith.mulf %122, %121 : vector<8x512xf32>
    %124 = math.tanh %123 : vector<8x512xf32>
    %cst_39 = arith.constant 1.000000e+00 : f32
    %125 = vector.broadcast %cst_39 : f32 to vector<8x512xf32>
    %126 = arith.addf %125, %124 : vector<8x512xf32>
    %127 = arith.mulf %116, %126 : vector<8x512xf32>
    %128 = arith.truncf %127 : vector<8x512xf32> to vector<8x512xbf16>
    %c0_40 = arith.constant 0 : index
    %c0_41 = arith.constant 0 : index
    %129 = vector.load %arg12[%c0_40, %c0_41] : memref<512x128xbf16, #tpu.memory_space<vmem>>, vector<512x128xbf16>
    %cst_42 = arith.constant dense<0.000000e+00> : vector<8x128xf32>
    %130 = tpu.matmul %128, %129, %cst_42 {dimension_numbers = #tpu.dot_dimension_numbers<[1], [0], [0], [1], [0, 0, 1, 1], [], []>} : vector<8x512xbf16>, vector<512x128xbf16>, vector<8x128xf32> -> vector<8x128xf32>
    %131 = arith.addf %109, %130 : vector<8x128xf32>
    %c0_43 = arith.constant 0 : index
    %c0_44 = arith.constant 0 : index
    %132 = vector.load %arg13[%c0_43, %c0_44] : memref<1x128xf32, #tpu.memory_space<vmem>>, vector<1x128xf32>
    %133 = vector.broadcast %132 : vector<1x128xf32> to vector<8x128xf32>
    %134 = arith.addf %131, %133 : vector<8x128xf32>
    %135 = arith.addf %107, %134 : vector<8x128xf32>
    %c0_45 = arith.constant 0 : index
    %c0_46 = arith.constant 0 : index
    %136 = vector.load %arg14[%c0_45, %c0_46] : memref<1x128xf32, #tpu.memory_space<vmem>>, vector<1x128xf32>
    %c0_47 = arith.constant 0 : index
    %c0_48 = arith.constant 0 : index
    %137 = vector.load %arg15[%c0_47, %c0_48] : memref<1x128xf32, #tpu.memory_space<vmem>>, vector<1x128xf32>
    %cst_49 = arith.constant dense<0.000000e+00> : vector<8xf32>
    %138 = vector.multi_reduction <add>, %135, %cst_49 [1] : vector<8x128xf32> to vector<8xf32>
    %139 = vector.shape_cast %138 : vector<8xf32> to vector<8x1xf32>
    %cst_50 = arith.constant 1.280000e+02 : f32
    %140 = vector.broadcast %cst_50 : f32 to vector<8x1xf32>
    %141 = arith.divf %139, %140 : vector<8x1xf32>
    %142 = vector.broadcast %141 : vector<8x1xf32> to vector<8x128xf32>
    %143 = arith.subf %135, %142 : vector<8x128xf32>
    %144 = arith.mulf %143, %143 : vector<8x128xf32>
    %cst_51 = arith.constant dense<0.000000e+00> : vector<8xf32>
    %145 = vector.multi_reduction <add>, %144, %cst_51 [1] : vector<8x128xf32> to vector<8xf32>
    %146 = vector.shape_cast %145 : vector<8xf32> to vector<8x1xf32>
    %cst_52 = arith.constant 1.280000e+02 : f32
    %147 = vector.broadcast %cst_52 : f32 to vector<8x1xf32>
    %148 = arith.divf %146, %147 : vector<8x1xf32>
    %cst_53 = arith.constant 9.99999974E-6 : f32
    %149 = vector.broadcast %cst_53 : f32 to vector<8x1xf32>
    %150 = arith.addf %148, %149 : vector<8x1xf32>
    %151 = math.rsqrt %150 : vector<8x1xf32>
    %152 = vector.broadcast %151 : vector<8x1xf32> to vector<8x128xf32>
    %153 = arith.mulf %143, %152 : vector<8x128xf32>
    %154 = vector.broadcast %136 : vector<1x128xf32> to vector<8x128xf32>
    %155 = arith.mulf %154, %153 : vector<8x128xf32>
    %156 = vector.broadcast %137 : vector<1x128xf32> to vector<8x128xf32>
    %157 = arith.addf %155, %156 : vector<8x128xf32>
    %c0_54 = arith.constant 0 : index
    %c0_55 = arith.constant 0 : index
    %c0_56 = arith.constant 0 : index
    %158 = vector.load %arg16[%c0_54, %c0_55, %c0_56] : memref<1x8x128xf32, #tpu.memory_space<vmem>>, vector<1x8x128xf32>
    %159 = vector.shape_cast %158 : vector<1x8x128xf32> to vector<8x128xf32>
    %160 = vector.shape_cast %157 : vector<8x128xf32> to vector<1x8x128xf32>
    tpu.vector_store %arg16[%c0_54, %c0_55, %c0_56], %160 {strides = array<i32>} : memref<1x8x128xf32, #tpu.memory_space<vmem>>, vector<1x8x128xf32>,
    return
  }
  func.func @transform_0(%arg0: i32, %arg1: i32) -> (i32, i32, i32) {
    %c0_i32 = arith.constant 0 : i32
    %c0_i32_0 = arith.constant 0 : i32
    %c0_i32_1 = arith.constant 0 : i32
    return %arg0, %c0_i32, %c0_i32_0 : i32, i32, i32
  }
  func.func @transform_1(%arg0: i32, %arg1: i32) -> (i32, i32, i32) {
    %c0_i32 = arith.constant 0 : i32
    %c0_i32_0 = arith.constant 0 : i32
    %c0_i32_1 = arith.constant 0 : i32
    return %arg0, %c0_i32, %c0_i32_0 : i32, i32, i32
  }
  func.func @transform_2(%arg0: i32, %arg1: i32) -> (i32, i32) {
    %c0_i32 = arith.constant 0 : i32
    %c0_i32_0 = arith.constant 0 : i32
    %c0_i32_1 = arith.constant 0 : i32
    return %c0_i32, %c0_i32_0 : i32, i32
  }
  func.func @transform_3(%arg0: i32, %arg1: i32) -> (i32, i32) {
    %c0_i32 = arith.constant 0 : i32
    %c0_i32_0 = arith.constant 0 : i32
    %c0_i32_1 = arith.constant 0 : i32
    return %c0_i32, %c0_i32_0 : i32, i32
  }
  func.func @transform_4(%arg0: i32, %arg1: i32) -> (i32, i32) {
    %c0_i32 = arith.constant 0 : i32
    %c0_i32_0 = arith.constant 0 : i32
    %c0_i32_1 = arith.constant 0 : i32
    return %c0_i32, %c0_i32_0 : i32, i32
  }
  func.func @transform_5(%arg0: i32, %arg1: i32) -> (i32, i32) {
    %c0_i32 = arith.constant 0 : i32
    %c0_i32_0 = arith.constant 0 : i32
    %c0_i32_1 = arith.constant 0 : i32
    return %c0_i32, %c0_i32_0 : i32, i32
  }
  func.func @transform_6(%arg0: i32, %arg1: i32) -> (i32, i32) {
    %c0_i32 = arith.constant 0 : i32
    %c0_i32_0 = arith.constant 0 : i32
    %c0_i32_1 = arith.constant 0 : i32
    return %c0_i32, %c0_i32_0 : i32, i32
  }
  func.func @transform_7(%arg0: i32, %arg1: i32) -> (i32, i32) {
    %c0_i32 = arith.constant 0 : i32
    %c0_i32_0 = arith.constant 0 : i32
    %c0_i32_1 = arith.constant 0 : i32
    return %c0_i32, %c0_i32_0 : i32, i32
  }
  func.func @transform_8(%arg0: i32, %arg1: i32) -> (i32, i32) {
    %c0_i32 = arith.constant 0 : i32
    %c0_i32_0 = arith.constant 0 : i32
    %c0_i32_1 = arith.constant 0 : i32
    return %c0_i32, %c0_i32_0 : i32, i32
  }
  func.func @transform_9(%arg0: i32, %arg1: i32) -> (i32, i32) {
    %c0_i32 = arith.constant 0 : i32
    %c0_i32_0 = arith.constant 0 : i32
    %c0_i32_1 = arith.constant 0 : i32
    return %c0_i32, %c0_i32_0 : i32, i32
  }
  func.func @transform_10(%arg0: i32, %arg1: i32) -> (i32, i32) {
    %c0_i32 = arith.constant 0 : i32
    %c0_i32_0 = arith.constant 0 : i32
    %c0_i32_1 = arith.constant 0 : i32
    return %c0_i32, %c0_i32_0 : i32, i32
  }
  func.func @transform_11(%arg0: i32, %arg1: i32) -> (i32, i32) {
    %c0_i32 = arith.constant 0 : i32
    %c0_i32_0 = arith.constant 0 : i32
    %c0_i32_1 = arith.constant 0 : i32
    return %c0_i32, %c0_i32_0 : i32, i32
  }
  func.func @transform_12(%arg0: i32, %arg1: i32) -> (i32, i32) {
    %c0_i32 = arith.constant 0 : i32
    %c0_i32_0 = arith.constant 0 : i32
    %c0_i32_1 = arith.constant 0 : i32
    return %c0_i32, %c0_i32_0 : i32, i32
  }
  func.func @transform_13(%arg0: i32, %arg1: i32) -> (i32, i32) {
    %c0_i32 = arith.constant 0 : i32
    %c0_i32_0 = arith.constant 0 : i32
    %c0_i32_1 = arith.constant 0 : i32
    return %c0_i32, %c0_i32_0 : i32, i32
  }
  func.func @transform_14(%arg0: i32, %arg1: i32) -> (i32, i32, i32) {
    %c0_i32 = arith.constant 0 : i32
    %c0_i32_0 = arith.constant 0 : i32
    %c0_i32_1 = arith.constant 0 : i32
    return %arg0, %c0_i32, %c0_i32_0 : i32, i32, i32
  }
}

</mosaic_0001>

<bundles_post_ra>
// kernel: tpu_custom_call.1
= control target key start
LH: loop header
LB: loop body
LE: loop exit
PB: predicated region body
PF: predicated region fallthrough
CT: control target
= control target key end

     0   :  { %s3725_s0 = inlined_call_operand.hbm [shape: f32[2,8,128], index: 0, kind: input, shape index: {}]   ;;  %s3726_s1 = inlined_call_operand.hbm [shape: f32[2,1,8], index: 1, kind: input, shape index: {}]   ;;  %s3727_s2 = inlined_call_operand.hbm [shape: bf16[128,384], index: 2, kind: input, shape index: {}]   ;;  %s3728_s3 = inlined_call_operand.vmem [shape: f32[1,384], index: 3, kind: input, shape index: {}]   ;;  %s3729_s4 = inlined_call_operand.hbm [shape: bf16[128,128], index: 4, kind: input, shape index: {}]   ;;  %s3730_s5 = inlined_call_operand.vmem [shape: f32[1,128], index: 5, kind: input, shape index: {}]   ;;  %s3731_s6 = inlined_call_operand.vmem [shape: f32[1,128], index: 6, kind: input, shape index: {}]   ;;  %s3732_s7 = inlined_call_operand.vmem [shape: f32[1,128], index: 7, kind: input, shape index: {}]   ;;  %s3733_s8 = inlined_call_operand.hbm [shape: bf16[128,512], index: 8, kind: input, shape index: {}]   ;;  %s3734_s9 = inlined_call_operand.vmem [shape: f32[1,512], index: 9, kind: input, shape index: {}]   ;;  %s3735_s10 = inlined_call_operand.hbm [shape: bf16[512,128], index: 10, kind: input, shape index: {}]   ;;  %s3736_s11 = inlined_call_operand.vmem [shape: f32[1,128], index: 11, kind: input, shape index: {}]   ;;  %s3737_s12 = inlined_call_operand.vmem [shape: f32[1,128], index: 12, kind: input, shape index: {}]   ;;  %s3738_s13 = inlined_call_operand.vmem [shape: f32[1,128], index: 13, kind: input, shape index: {}]   ;;  %s3739_s14 = inlined_call_operand.hbm [shape: f32[2,8,128], index: 14, kind: output, shape index: {}]  }
   0x1   :  { %3749 = sst [smem:[#allocation30_spill]] %s3725_s0 }
   0x2   :  { %3750 = sst [smem:[#allocation31_spill]] %s3727_s2 }
   0x3   :  { %3751 = sst [smem:[#allocation32_spill]] %s3729_s4 }
   0x4   :  { %3752 = sst [smem:[#allocation33_spill]] %s3733_s8 }
   0x5   :  { %3753 = sst [smem:[#allocation34_spill]] %s3735_s10 }
   0x6   :  { %3754 = sst [smem:[#allocation35_spill]] %s3737_s12 }
   0x7   :  { %3755 = sst [smem:[#allocation36_spill]] %s3738_s13 }
   0x8   :  { %3756 = sst [smem:[#allocation37_spill]] %s3739_s14 }
   0x9   :  { %19 = vsyncpa [#allocation4], 0 }
   0xa   :  { %21 = vsyncpa [#allocation4 + $0x1], 0 }
   0xb   :  { %22 = vsyncpa [#allocation7], 0 }
   0xc   :  { %24 = vsyncpa [#allocation7 + $0x1], 0 }
   0xd   :  { %25 = vsyncpa [#allocation10], 0 }
   0xe   :  { %26 = vsyncpa [#allocation13], 0 }
   0xf   :  { %27 = vsyncpa [#allocation5], 0 }
  0x10   :  { %29 = vsyncpa [#allocation5 + $0x1], 0  ;;  %s3325_s29 = smov 0   ;;  %s3327_s30 = smov 0  }
  0x11   :  { %s3329_s15 = smov 0   ;;  %s3331_s16 = smov 0  }
  0x12   :  { %s3333_s17 = smov 0   ;;  %s3335_s18 = smov 0  }
  0x13   :  { %s3337_s19 = smov 0   ;;  %s3339_s20 = smov 0  }
  0x14 LB: > { %3757 = sst [smem:[#allocation21_spill]] %s3200_s29  ;;  %s3366_s21 = sadd.s32 4294967295, %s3228_s20   ;;  %s3228_s20 = sphi %s3339_s20, %s35_s20   ;;  %s3224_s19 = sphi %s3337_s19, %s3794_s19   ;;  %s3220_s18 = sphi %s3335_s18, %s3789_s18   ;;  %s3216_s17 = sphi %s3333_s17, %s3793_s17   ;;  %s3212_s16 = sphi %s3331_s16, %s3788_s16   ;;  %s3208_s15 = sphi %s3329_s15, %s3787_s15   ;;  %s3204_s30 = sphi %s3327_s30, %s3792_s30   ;;  %s3200_s29 = sphi %s3325_s29, %s3791_s29  }
  0x15   : > { %3758 = sst [smem:[#allocation22_spill]] %s3208_s15  ;;  %p2363_p0 = scmp.ge.s32.totalorder %s3228_s20, 1 }
  0x16   : > { %3759 = sst [smem:[#allocation23_spill]] %s3216_s17  ;;  %p68_p1 = scmp.eq.s32.totalorder %s3366_s21, 0 }
  0x17   : > { %3760 = sst [smem:[#allocation24_spill]] %s3220_s18  ;;  %p382_p2 = scmp.lt.s32.totalorder %s3228_s20, 5 }
  0x18   : > { %3761 = sst [smem:[#allocation25_spill]] %s3228_s20  ;;  %s3230_s23 = smov [#allocation8]  }
  0x19   : > { %p3371_p3 = pnand %p2363_p0, %p382_p2  ;;  %s394_s24 = sshll.u32 %s3230_s23, 4  ;;  %s395_s24 = int_to_ptr.vmem [resolvable:$true] %s394_s24 }
  0x1a   : > { %s3231_s26 = smov [#allocation9]   ;;  %s2967_s28 = scalar_lea.vmem %s395_s24, 3072 }
  0x1b   : > { %p2685_p4 = pneg %p3371_p3  ;;  %s410_s27 = sshll.u32 %s3231_s26, 4  ;;  %s411_s27 = int_to_ptr.vmem [resolvable:$true] %s410_s27 }
  0x1c   : > { %p2968_p7 = scmp.ne.s32.totalorder %s395_s24, %s2967_s28  ;;  %p2975_p10 = scmp.lt.s32.totalorder %s395_s24, %s395_s24 }
  0x1d   : > { %p3379_p5 = pnand %p2685_p4, %p68_p1  ;;  %p2976_p11 = scmp.lt.s32.totalorder %s2967_s28, %s2967_s28 }
  0x1f   : > { %p2958_p6 = pneg %p3379_p5  ;;  %p2977_p12 = por %p2976_p11, %p2975_p10 }
  0x21   : > { %p2970_p8 = pnand %p2968_p7, %p2958_p6 }
  0x23   : > { %p2971_p9 = pneg %p2970_p8 }
  0x25   : > { %p2978_p13 = pnand %p2977_p12, %p2971_p9 }
  0x27   : > { %2981 = shalt.err (!%p2978_p13)
}
  0x28   : > { %s3232_s23 = smov 192   ;;  %s3233_s14 = smov 12  }
  0x29   : > { %s3764_s2 = sld [smem:[#allocation31_spill]]  ;;  %s2993_s12 = scalar_lea.vmem %s411_s27, 1024 }
  0x2a   : > { %p2994_p0 = scmp.ne.s32.totalorder %s411_s27, %s2993_s12  ;;  %p3001_p7 = scmp.lt.s32.totalorder %s411_s27, %s411_s27 }
  0x2b   : > { %p3002_p8 = scmp.lt.s32.totalorder %s2993_s12, %s2993_s12 }
  0x2c   : > { %p2996_p2 = pnand %p2994_p0, %p2958_p6 }
  0x2d   : > { %p3003_p10 = por %p3002_p8, %p3001_p7 }
  0x2e   : > { %p2997_p4 = pneg %p2996_p2 }
  0x2f   : > { %2688 = dma.hbm_to_vmem [thread:$0]  (!%p3379_p5), %s3764_s2, 3072, %s395_s24, [#allocation7], %s3232_s23, %s3232_s23, %s3233_s14  }
  0x30   : > { %p3004_p9 = pnand %p3003_p10, %p2997_p4 }
  0x32   : > { %3007 = shalt.err (!%p3004_p9)
}
  0x33   : > { %s3741_s28 = smov 64   ;;  %s3235_s17 = smov 4  }
  0x34   : > { %s3765_s4 = sld [smem:[#allocation32_spill]]  ;;  %s3236_s24 = smov [#allocation11]  }
  0x35   : > { %s432_s23 = sshll.u32 %s3236_s24, 4  ;;  %s433_s23 = int_to_ptr.vmem [resolvable:$true] %s432_s23 }
  0x36   : > { %s3019_s26 = scalar_lea.vmem %s433_s23, 4096  ;;  %p3027_p0 = scmp.lt.s32.totalorder %s433_s23, %s433_s23 }
  0x37   : > { %p3020_p11 = scmp.ne.s32.totalorder %s433_s23, %s3019_s26  ;;  %p3028_p2 = scmp.lt.s32.totalorder %s3019_s26, %s3019_s26 }
  0x39   : > { %p3022_p12 = pnand %p3020_p11, %p2958_p6  ;;  %p3029_p4 = por %p3028_p2, %p3027_p0 }
  0x3a   : > { %2691 = dma.hbm_to_vmem [thread:$0]  (!%p3379_p5), %s3765_s4, 1024, %s411_s27, [#allocation10], %s3741_s28, %s3741_s28, %s3235_s17  }
  0x3b   : > { %p3023_p13 = pneg %p3022_p12 }
  0x3d   : > { %p3030_p7 = pnand %p3029_p4, %p3023_p13 }
  0x3f   : > { %3033 = shalt.err (!%p3030_p7)
}
  0x40   : > { %s3237_s12 = smov 256   ;;  %s3238_s2 = smov 16  }
  0x41   : > { %s3766_s8 = sld [smem:[#allocation33_spill]]  ;;  %s3239_s14 = smov [#allocation12]  }
  0x42   : > { %s448_s24 = sshll.u32 %s3239_s14, 4  ;;  %s449_s24 = int_to_ptr.vmem [resolvable:$true] %s448_s24 }
  0x43   : > { %s3045_s28 = scalar_lea.vmem %s449_s24, 4096  ;;  %p3053_p11 = scmp.lt.s32.totalorder %s449_s24, %s449_s24 }
  0x44   : > { %p3046_p8 = scmp.ne.s32.totalorder %s449_s24, %s3045_s28  ;;  %p3054_p12 = scmp.lt.s32.totalorder %s3045_s28, %s3045_s28 }
  0x46   : > { %p3048_p10 = pnand %p3046_p8, %p2958_p6  ;;  %p3055_p13 = por %p3054_p12, %p3053_p11 }
  0x47   : > { %2694 = dma.hbm_to_vmem [thread:$0]  (!%p3379_p5), %s3766_s8, 4096, %s433_s23, [#allocation10], %s3237_s12, %s3237_s12, %s3238_s2  }
  0x48   : > { %p3049_p9 = pneg %p3048_p10 }
  0x4a   : > { %p3056_p0 = pnand %p3055_p13, %p3049_p9 }
  0x4c   : > { %3059 = shalt.err (!%p3056_p0)
}
  0x4d   : > { %s3767_s26 = smov 64   ;;  %s3768_s10 = sld [smem:[#allocation34_spill]] }
  0x4e   : > { %s2362_s25 = sadd.s32 4294967294, %s3228_s20   ;;  %s44_s28 = sadd.s32 1, %s3220_s18 }
  0x4f   : > { %p45_p6 = scmp.ge.s32.totalorder %s44_s28, 2  ;;  %s47_s12 = sadd.s32 1, %s3224_s19 }
  0x50   : > { %s54_s27 = sadd.s32 1, %s3208_s15  ;;  %p61_p2 = scmp.ne.s32.totalorder %s3208_s15, %s3204_s30 }
  0x51   : > { %s3796_s28 = smov (%p45_p6, %s44_s28), 0  ;;  %s3798_s12 = smov (!%p45_p6, %s47_s12), %s3224_s19 }
  0x52   : > { %3769 = sst [smem:[#allocation26_spill]] %s3796_s28  ;;  %p62_p4 = scmp.eq.s32.totalorder %s3228_s20, 0 }
  0x53   : > { %2697 = dma.hbm_to_vmem [thread:$0]  (!%p3379_p5), %s3768_s10, 4096, %s449_s24, [#allocation13], %s3767_s26, %s3767_s26, %s3235_s17  }
  0x54   : > { %p67_p7 = scmp.ne.s32.totalorder %s3204_s30, %s3200_s29  ;;  %p49_p8 = scmp.ge.s32.totalorder %s3798_s12, 2 }
  0x55   : > { %p369_p10 = scmp.eq.s32.totalorder %s3366_s21, 3  ;;  %p3436_p9 = por %p62_p4, %p61_p2 }
  0x56   : > { %p3442_p5 = por %p68_p1, %p67_p7  ;;  %s3800_s12 = smov (%p49_p8, %s3798_s12), 0 }
  0x57   : > { %3772 = sst [smem:[#allocation27_spill]] %s3800_s12  ;;  %p3448_p11 = por %p369_p10, %p61_p2 }
  0x58   : > { %p375_p12 = scmp.eq.s32.totalorder %s2362_s25, 3  ;;  %s51_s24 = ssub.s32 %s3224_s19, %s3800_s12 }
  0x59   : > { %p2713_p13 = scmp.lt.s32.totalorder %s3228_s20, 4  ;;  %p52_p0 = scmp.eq.s32.totalorder %s51_s24, 0 }
  0x5a   : > { %p3455_p6 = por %p375_p12, %p67_p7  ;;  %s3460_s2 = sand.u32 1, %s3208_s15  }
  0x5b   : > { %s2370_s23 = sshll.u32 %s3224_s19, 7  ;;  %s2369_s8 = sshll.u32 %s3460_s2, 3 }
  0x5c   : > { %s3774_s26 = scalar_select %p3455_p6, 1, 0 }
  0x5d   : > { %s3464_s4 = scalar_select %p52_p0, %s3208_s15, %s54_s27  }
  0x5e   : > { %3775 = sst [smem:[#allocation28_spill]] %s3774_s26  ;;  %s475_s25 = scalar_lea.vmem [#allocation3], %s2369_s8 }
  0x5f   : > { %3776 = sst [smem:[#allocation29_spill]] %s3464_s4  ;;  %s482_s12 = sshll.u32 %s475_s25, 4  ;;  %s483_s12 = int_to_ptr.vmem [resolvable:$true] %s482_s12 }
  0x60   : > { %s3777_s0 = sld [smem:[#allocation30_spill]]  ;;  %p3472_p2 = pnand %p2713_p13, %p3436_p9 }
  0x61   : > { %s489_s26 = sand.u32 1, %s3228_s20   ;;  %s472_s29 = scalar_lea.sflag [#allocation4], %s3460_s2 }
  0x62   : > { %p3062_p4 = pneg %p3472_p2  ;;  %s3073_s27 = scalar_lea.vmem %s483_s12, 128 }
  0x63   : > { %p3074_p7 = scmp.ne.s32.totalorder %s483_s12, %s3073_s27  ;;  %s3240_s8 = smov [#allocation3]  }
  0x64   : > { %s3078_s10 = sshll.u32 %s3240_s8, 4  ;;  %s3079_s10 = int_to_ptr.vmem [resolvable:$false] %s3078_s10 }
  0x65   : > { %p3076_p8 = pnand %p3074_p7, %p3062_p4  ;;  %s3080_s28 = scalar_lea.vmem %s3079_s10, 256 }
  0x66   : > { %s480_s18 = scalar_lea.hbm %s3777_s0, %s2370_s23  ;;  %p3081_p9 = scmp.lt.s32.totalorder %s483_s12, %s3079_s10 }
  0x67   : > { %p3077_p10 = pneg %p3076_p8  ;;  %p3082_p12 = scmp.lt.s32.totalorder %s3080_s28, %s3073_s27 }
  0x69   : > { %p3083_p13 = por %p3082_p12, %p3081_p9 }
  0x6b   : > { %p3084_p0 = pnand %p3083_p13, %p3077_p10 }
  0x6d   : > { %3087 = shalt.err (!%p3084_p0)
}
  0x6e   : > { %2701 = dma.hbm_to_vmem [thread:$0]  (!%p3472_p2), %s480_s18, 128, %s483_s12, %s472_s29  }
  0x6f   : > { %s2371_s17 = sshll.u32 %s3224_s19, 4  ;;  %s492_s4 = scalar_lea.vmem [#allocation6], %s3460_s2 }
  0x70   : > { %s497_s0 = scalar_lea.hbm %s3726_s1, %s2371_s17  ;;  %s499_s8 = sshll.u32 %s492_s4, 4  ;;  %s500_s8 = int_to_ptr.vmem [resolvable:$true] %s499_s8 }
  0x71   : > { %s490_s15 = scalar_lea.sflag [#allocation7], %s489_s26  ;;  %s3101_s10 = scalar_lea.vmem %s500_s8, 16 }
  0x72   : > { %p3102_p7 = scmp.ne.s32.totalorder %s500_s8, %s3101_s10  ;;  %s3241_s27 = smov [#allocation6]  }
  0x73   : > { %s3106_s28 = sshll.u32 %s3241_s27, 4  ;;  %s3107_s28 = int_to_ptr.vmem [resolvable:$false] %s3106_s28 }
  0x74   : > { %p3104_p8 = pnand %p3102_p7, %p3062_p4  ;;  %s3108_s20 = scalar_lea.vmem %s3107_s28, 32 }
  0x75   : > { %p3109_p9 = scmp.lt.s32.totalorder %s500_s8, %s3107_s28  ;;  %p3110_p12 = scmp.lt.s32.totalorder %s3108_s20, %s3101_s10 }
  0x76   : > { %p3105_p10 = pneg %p3104_p8 }
  0x77   : > { %p3111_p13 = por %p3110_p12, %p3109_p9 }
  0x79   : > { %p3112_p0 = pnand %p3111_p13, %p3105_p10 }
  0x7b   : > { %3115 = shalt.err (!%p3112_p0)
}
  0x7c   : > { %2704 = dma.hbm_to_vmem [thread:$0]  (!%p3472_p2), %s497_s0, 16, %s500_s8, %s490_s15  }
  0x7d   : > { %508 = sbr.rel (%p3371_p3) target bundleno = 2456 (0x998), region = 76  ;;  %s3498_s4 = sand.u32 (!%p3371_p3), 1, %s3204_s30  }
  0x7e   : > { %s2373_s29 = sshll.u32 (!%p3371_p3), %s3498_s4, 3  ;;  %s511_s18 = scalar_lea.sflag (!%p3371_p3), [#allocation4], %s3498_s4 }
  0x7f   : > { %s514_s12 = scalar_lea.vmem (!%p3371_p3), [#allocation3], %s2373_s29 }
  0x82   : > { %3175 = dma.done.wait (%p3442_p5), %s511_s18, 128  }
  0x83   : > { %3177 = vsyncadd (%p3442_p5), %s511_s18, 4294967168  ;;  %s519_s0 = sand.u32 1, %s3366_s21   ;;  %s522_s20 = scalar_lea.vmem [#allocation6], %s3498_s4 }
  0x84   : > { %s520_s15 = scalar_lea.sflag [#allocation7], %s519_s0 }
  0x85   : > { %3179 = dma.done.wait (%p3442_p5), %s520_s15, 16  }
  0x86   : > { %3181 = vsyncadd (%p3442_p5), %s520_s15, 4294967280 }
  0x87   : > { %3183 = dma.done.wait (%p68_p1), [#allocation7], 3072  }
  0x88   : > { %3185 = vsyncadd (%p68_p1), [#allocation7], 4294964224 }
  0x89   : > { %3187 = dma.done.wait (%p68_p1), [#allocation10], 5120  }
  0x8a   : > { %3189 = vsyncadd (%p68_p1), [#allocation10], 4294962176 }
  0x8b   : > { %3191 = dma.done.wait (%p68_p1), [#allocation13], 4096  }
  0x8c   : > { %3193 = vsyncadd (%p68_p1), [#allocation13], 4294963200  ;;  %s3524_s22 = scalar_lea.vmem [#allocation14], %s2373_s29  ;;  %p2379_p3 = scmp.ne.s32.totalorder %s3212_s16, 0 }
  0x8e   : > { %591 = sbr.rel (%p2379_p3) target bundleno = 160 (0xa0), region = 104 }
  0x93   : > { %v592_v0 = vld [vmem:[%s514_s12] sm:$0xff]  ;;  %v594_v1 = vlaneseq  ;;  %v2381_v4 = vld [vmem:[%s522_s20] ss:$0 sm:$0xff]  ;;  %v3242_v5 = vmov 0.0   ;;  %vm611_vm1 = vcmask 64512  }
  0x94   : > { %593 = vst [vmem:[%s3524_s22] sm:$0xff] %v592_v0 }
  0x95   : > { %v595_v2 = vshrl.u32 %v594_v1, 7  ;;  %v597_v3 = vand.u32 127, %v594_v1 }
  0x97   : > { %vm598_vm0 = vcmp.ge.s32.totalorder %v595_v2, %v597_v3 }
  0x98   : > { %v2380_v6 = vsel %vm598_vm0, 1.0, %v3242_v5 }
  0x99   : > { %v608_v7 = vmul.f32 %v2381_v4, %v2380_v6 }
  0x9b   : > { %v2382_v8 = vadd.f32 -1.0, %v608_v7 }
  0x9d   : > { %v610_v9 = vmul.f32 1e+09, %v2382_v8 }
  0x9f   : > { %612 = vst.msk [vmem:[#allocation2] sm:$0xff] %vm611_vm1, %v610_v9 }
  0xa0 PF: > { %v2800_v10 = vld [vmem:[#allocation8 + $0xac] ss:$12 sps:$4 sm:$0xff]   ;;  %v2802_v11 = vld [vmem:[#allocation8 + $0xa8] ss:$12 sps:$4 sm:$0xff]   ;;  %v3243_v12 = vmov 0   ;;  %v3244_v13 = vmov 0.0   ;;  %v649_v38 = vlaneseq }
  0xa1   : > { %824 = vmatprep.mubr.bf16.mxu0 %v3243_v12  ;;  %2575 = vmatprep.subr.bf16.mxu1 %v3244_v13  ;;  %v2803_v14 = vld [vmem:[#allocation8 + $0x94] ss:$12 sps:$4 sm:$0xff]   ;;  %v2805_v15 = vld [vmem:[#allocation8 + $0x90] ss:$12 sps:$4 sm:$0xff]   ;;  %v2808_v17 = vld [vmem:[#allocation8 + $0x78] ss:$12 sps:$4 sm:$0xff]  }
  0xa2   : > { %792 = vmatprep.subr.bf16.mxu0 %v2800_v10  ;;  %v2806_v16 = vld [vmem:[#allocation8 + $0x7c] ss:$12 sps:$4 sm:$0xff]   ;;  %v2809_v18 = vld [vmem:[#allocation8 + $0x64] ss:$12 sps:$4 sm:$0xff]   ;;  %v2811_v19 = vld [vmem:[#allocation8 + $0x60] ss:$12 sps:$4 sm:$0xff]  }
  0xa3   : > { %793 = vmatpush1.bf16.msra.mxu0 %v2802_v11  ;;  %v2824_v20 = vld [vmem:[#allocation8 + $0xb0] ss:$12 sps:$4 sm:$0xff]   ;;  %v2812_v21 = vld [vmem:[#allocation8 + $0x4c] ss:$12 sps:$4 sm:$0xff]   ;;  %v2814_v23 = vld [vmem:[#allocation8 + $0x48] ss:$12 sps:$4 sm:$0xff]  }
  0xa4   : > { %794 = vmatprep.subr.bf16.mxu0 %v2803_v14  ;;  %2576 = vmatpush3.bf16.msra.mxu1 %v2824_v20  ;;  %v2825_v22 = vld [vmem:[#allocation8 + $0x98] ss:$12 sps:$4 sm:$0xff]   ;;  %v2815_v24 = vld [vmem:[#allocation8 + $0x34] ss:$12 sps:$4 sm:$0xff]   ;;  %v2817_v25 = vld [vmem:[#allocation8 + $0x30] ss:$12 sps:$4 sm:$0xff]  }
  0xa5   : > { %2577 = vmatprep.subr.bf16.mxu1 %v3244_v13  ;;  %v2826_v26 = vld [vmem:[#allocation8 + $0x80] ss:$12 sps:$4 sm:$0xff]   ;;  %v2818_v27 = vld [vmem:[#allocation8 + $0x1c] ss:$12 sps:$4 sm:$0xff]   ;;  %v2820_v29 = vld [vmem:[#allocation8 + $0x18] ss:$12 sps:$4 sm:$0xff]  }
  0xa6   : > { %v2827_v28 = vld [vmem:[#allocation8 + $0x68] ss:$12 sps:$4 sm:$0xff]   ;;  %v2821_v30 = vld [vmem:[#allocation8 + $0x4] ss:$12 sps:$4 sm:$0xff]   ;;  %v2823_v32 = vld [vmem:[#allocation8] ss:$12 sps:$4 sm:$0xff]  }
  0xa7   : > { %795 = vmatpush1.bf16.msra.mxu0 %v2805_v15  ;;  %v2828_v31 = vld [vmem:[#allocation8 + $0x50] ss:$12 sps:$4 sm:$0xff]   ;;  %v3534_v33 = vld [vmem:[%s3524_s22] sm:$0xff]  ;;  %vm3245_vm2 = vmmov 0   ;;  %v3550_v39 = vshrl.u32 %v649_v38, 7  ;;  %vm898_vm3 = vcmask 261120  }
  0xa8   : > { %796 = vmatprep.subr.bf16.mxu0 %v2806_v16  ;;  %2578 = vmatpush3.bf16.msra.mxu1 %v2825_v22  ;;  %v2829_v34 = vld [vmem:[#allocation8 + $0x38] ss:$12 sps:$4 sm:$0xff]   ;;  %v614_v35 = vpack.c.bf16 %v3534_v33, %v3534_v33  ;;  %v2830_v36 = vld [vmem:[#allocation8 + $0x20] ss:$12 sps:$4 sm:$0xff]   ;;  %v2831_v37 = vld [vmem:[#allocation8 + $0x8] ss:$12 sps:$4 sm:$0xff]  }
  0xa9   : > { %2579 = vmatprep.subr.bf16.mxu1 %v3244_v13  ;;  %2591 = vmatprep.mubr.msk.bf16.mxu1 %vm3245_vm2, %v3244_v13  ;;  %v655_v40 = vsub.s32 1, %v3550_v39  ;;  %v651_v41 = vsub.s32 0, %v3550_v39  ;;  %v647_v42 = vld [vmem:[%s3728_s3] sm:$0x7]  ;;  %s3246_s13 = smov 64   ;;  %s3247_s26 = smov 96  }
  0xaa   : > { %s3248_s2 = smov 32   ;;  %v659_v54 = vsub.s32 2, %v3550_v39  ;;  %vm1147_vm4 = vcmask 1043456   ;;  %v897_v8 = vld [vmem:[#allocation2] sm:$0xff]  ;;  %vm1083_vm5 = vcmask 64512   ;;  %vm1354_vm6 = vcmask 523264  }
  0xab   : > { %797 = vmatpush1.bf16.msra.mxu0 %v2808_v17  ;;  %v656_v43 = vrot.slane %v647_v42, %v655_v40  ;;  %v652_v45 = vrot.slane %v647_v42, %v651_v41  ;;  %vm1356_vm7 = vcmask 785408   ;;  %s3779_s12 = sld [smem:[#allocation23_spill]]  ;;  %s2209_s8 = scalar_lea.sflag [#allocation5], %s3498_s4 }
  0xac   : > { %798 = vmatprep.subr.bf16.mxu0 %v2809_v18  ;;  %2580 = vmatpush3.bf16.msra.mxu1 %v2826_v26  ;;  %v660_v55 = vrot.slane %v647_v42, %v659_v54  ;;  %s3780_s20 = sld [smem:[#allocation35_spill]]  ;;  %s3249_s27 = smov [#allocation14]  }
  0xad   : > { %2581 = vmatprep.subr.bf16.mxu1 %v3244_v13  ;;  %s3782_s23 = sld [smem:[#allocation37_spill]]  ;;  %s3120_s28 = sshll.u32 %s3249_s27, 4  ;;  %s3121_s28 = int_to_ptr.vmem [resolvable:$false] %s3120_s28 }
  0xae   : > { %s3122_s29 = scalar_lea.vmem %s3121_s28, 256 }
  0xaf   : > { %799 = vmatpush1.bf16.msra.mxu0 %v2811_v19 }
  0xb0   : > { %800 = vmatprep.subr.bf16.mxu0 %v2812_v21  ;;  %2582 = vmatpush3.bf16.msra.mxu1 %v2827_v28 }
  0xb1   : > { %2583 = vmatprep.subr.bf16.mxu1 %v3244_v13 }
  0xb3   : > { %801 = vmatpush1.bf16.msra.mxu0 %v2814_v23 }
  0xb4   : > { %802 = vmatprep.subr.bf16.mxu0 %v2815_v24  ;;  %2584 = vmatpush3.bf16.msra.mxu1 %v2828_v31 }
  0xb5   : > { %2585 = vmatprep.subr.bf16.mxu1 %v3244_v13 }
  0xb7   : > { %803 = vmatpush1.bf16.msra.mxu0 %v2817_v25 }
  0xb8   : > { %804 = vmatprep.subr.bf16.mxu0 %v2818_v27  ;;  %2586 = vmatpush3.bf16.msra.mxu1 %v2829_v34 }
  0xb9   : > { %2587 = vmatprep.subr.bf16.mxu1 %v3244_v13 }
  0xbb   : > { %805 = vmatpush1.bf16.msra.mxu0 %v2820_v29 }
  0xbc   : > { %806 = vmatprep.subr.bf16.mxu0 %v2821_v30  ;;  %2588 = vmatpush3.bf16.msra.mxu1 %v2830_v36 }
  0xbd   : > { %2589 = vmatprep.subr.bf16.mxu1 %v3244_v13 }
  0xbf   : > { %807 = vmatpush1.bf16.msra.mxu0 %v2823_v32 }
  0xc0   : > { %2619 = vmatprep.subr.bf16.mxu0 %v3244_v13  ;;  %2590 = vmatpush3.bf16.msra.mxu1 %v2831_v37 }
  0xc1   : > { %2595 = vmatprep.subr.bf16.mxu1 %v3244_v13 }
  0xc2   : > { %825 = vmatmul.mubr.bf16.vlgmr.msra.gmra.mxu0 %v614_v35 }
  0xc3   : > { %2621 = vmatprep.mubr.msk.bf16.mxu0 %vm3245_vm2, %v3244_v13  ;;  %2592 = vmatmul.mubr.bf16.vlgmr.msra.gmra.mxu1 %v614_v35 }
  0xc4   : > { %2597 = vmatprep.mubr.msk.bf16.mxu1 %vm3245_vm2, %v3244_v13 }
 0x182   : > { %v826_v44 = vpop.f32.mrf.mxu0 }
 0x183   : > { %v827_v49 = vadd.f32 %v826_v44, %v652_v45  ;;  %v867_v56 = vpop.f32.mrf.mxu1 }
 0x184   : > { %v828_v46 = vpop.f32.mrf.mxu0  ;;  %v868_v57 = vadd.f32 %v867_v56, %v660_v55 }
 0x185   : > { %v829_v47 = vadd.f32 %v828_v46, %v656_v43  ;;  %v873_v53 = vpack.c.bf16 %v827_v49, %v827_v49  ;;  %v2593_v58 = vpop.f32.mrf.mxu1 }
 0x186   : > { %v830_v48 = vpop.f32.mrf.mxu0  ;;  %v3575_v59 = vpack.c.bf16 %v868_v57, %v868_v57 }
 0x187   : > { %v874_v50 = vpack.c.bf16 %v829_v47, %v829_v47  ;;  %v870_v60 = vpop.f32.mrf.mxu1 }
 0x188   : > { %v831_v51 = vpop.f32.mrf.mxu0  ;;  %v1149_v62 = vsel %vm1147_vm4, %v3575_v59, 0 }
 0x189   : > { %886 = vrot.lane.b32.xlu1 %v874_v50, %s3246_s13  ;;  %884 = vrot.lane.b32.xlu0 %v874_v50, %s3247_s26  ;;  %v903_v52 = vsel %vm898_vm3, %v874_v50, 0  ;;  %v2594_v61 = vpop.f32.mrf.mxu1 }
 0x18a   : > { %2596 = vmatpush3.bf16.xpose.msra.mxu1 %v903_v52  ;;  %2620 = vmatpush3.bf16.msra.mxu0 %v1149_v62 }
 0x18b   : > { %2601 = vmatprep.subr.bf16.mxu1 %v3244_v13  ;;  %2631 = vmatprep.subr.bf16.mxu0 %v3244_v13 }
 0x18d   : > { %879 = vrot.lane.b32.xlu1 %v873_v53, %s3246_s13  ;;  %877 = vrot.lane.b32.xlu0 %v873_v53, %s3247_s26 }
 0x191   : > { %881 = vrot.lane.b32.xlu1 %v873_v53, %s3248_s2  ;;  %888 = vrot.lane.b32.xlu0 %v874_v50, %s3248_s2 }
 0x192   : > { %2598 = vmatmul.mubr.msk.bf16.vlgmr.msra.gmra.mxu1 %vm898_vm3, %v873_v53 }
 0x193   : > { %2603 = vmatprep.mubr.msk.bf16.mxu1 %vm3245_vm2, %v3244_v13 }
 0x195   : > { %891 = vrot.lane.b32.xlu1 %v3575_v59, %s3247_s26 }
 0x1fb   : > { %v885_v63 = vpop.permute.xlu0 %884  ;;  %v887_v1 = vpop.permute.xlu1 %886 }
 0x1fc   : > { %v949_v0 = vsel %vm898_vm3, %v885_v63, 0  ;;  %v995_v3 = vsel %vm898_vm3, %v887_v1, 0 }
 0x1fd   : > { %2602 = vmatpush3.bf16.xpose.msra.mxu1 %v949_v0 }
 0x1fe   : > { %2607 = vmatprep.subr.bf16.mxu1 %v3244_v13 }
 0x1ff   : > { %v878_v2 = vpop.permute.xlu0 %877  ;;  %v880_v5 = vpop.permute.xlu1 %879 }
 0x203   : > { %v889_v4 = vpop.permute.xlu0 %888  ;;  %v882_v7 = vpop.permute.xlu1 %881 }
 0x204   : > { %2604 = vmatmul.mubr.msk.bf16.vlgmr.msra.gmra.mxu1 %vm898_vm3, %v878_v2  ;;  %v1041_v6 = vsel %vm898_vm3, %v889_v4, 0 }
 0x205   : > { %2608 = vmatpush3.bf16.xpose.msra.mxu1 %v995_v3  ;;  %2609 = vmatprep.mubr.msk.bf16.mxu1 %vm3245_vm2, %v3244_v13 }
 0x206   : > { %2613 = vmatprep.subr.bf16.mxu1 %v3244_v13 }
 0x207   : > { %v892_v17 = vpop.permute.xlu1 %891 }
 0x208   : > { %v1195_v18 = vsel %vm1147_vm4, %v892_v17, 0 }
 0x20c   : > { %2610 = vmatmul.mubr.msk.bf16.vlgmr.msra.gmra.mxu1 %vm898_vm3, %v880_v5 }
 0x20d   : > { %2614 = vmatpush3.bf16.xpose.msra.mxu1 %v1041_v6  ;;  %2615 = vmatprep.mubr.msk.bf16.mxu1 %vm3245_vm2, %v3244_v13 }
 0x20e   : > { %2625 = vmatprep.subr.bf16.mxu1 %v3244_v13 }
 0x214   : > { %2616 = vmatmul.mubr.msk.bf16.vlgmr.msra.gmra.mxu1 %vm898_vm3, %v882_v7 }
 0x215   : > { %2627 = vmatprep.mubr.msk.bf16.mxu1 %vm3245_vm2, %v3244_v13  ;;  %2626 = vmatpush3.bf16.msra.mxu1 %v1195_v18 }
 0x216   : > { %2637 = vmatprep.subr.bf16.mxu1 %v3244_v13 }
 0x252   : > { %v939_v9 = vpop.f32.mrf.mxu1 }
 0x253   : > { %v940_v10 = vadd.f32 %v939_v9, %v897_v8 }
 0x254   : > { %v2599_v11 = vpop.f32.mrf.mxu1 }
 0x255   : > { %v1084_v14 = vsel %vm1083_vm5, %v940_v10, -inf  ;;  %v2833_v11 = vld [vmem:[#allocation9 + $0x30] sm:$0xff]  }
 0x256   : > { %1085 = vmax.xlane.f32.xlu0 %v1084_v14  ;;  %v942_v15 = vpop.f32.mrf.mxu1  ;;  %v2834_v14 = vld [vmem:[#allocation9 + $0x28] sm:$0xff]  }
 0x258   : > { %v2600_v16 = vpop.f32.mrf.mxu1 }
 0x2c4   : > { %v985_v19 = vpop.f32.mrf.mxu1 }
 0x2c5   : > { %v986_v20 = vadd.f32 %v985_v19, %v897_v8 }
 0x2c6   : > { %v2605_v21 = vpop.f32.mrf.mxu1 }
 0x2c7   : > { %v1087_v22 = vsel %vm1083_vm5, %v986_v20, -inf }
 0x2c8   : > { %1088 = vmax.xlane.f32.xlu1 %v1087_v22  ;;  %v988_v23 = vpop.f32.mrf.mxu1 }
 0x2ca   : > { %v2606_v24 = vpop.f32.mrf.mxu1 }
 0x2cc   : > { %v1031_v25 = vpop.f32.mrf.mxu1 }
 0x2cd   : > { %v1032_v26 = vadd.f32 %v1031_v25, %v897_v8 }
 0x2ce   : > { %v2611_v27 = vpop.f32.mrf.mxu1 }
 0x2cf   : > { %v1090_v28 = vsel %vm1083_vm5, %v1032_v26, -inf }
 0x2d0   : > { %1091 = vmax.xlane.f32.xlu0 %v1090_v28  ;;  %v1034_v29 = vpop.f32.mrf.mxu1  ;;  %v2835_v28 = vld [vmem:[#allocation9 + $0x20] sm:$0xff]  }
 0x2d2   : > { %v2612_v30 = vpop.f32.mrf.mxu1 }
 0x2d3   : > { %v2836_v30 = vld [vmem:[#allocation9 + $0x18] sm:$0xff]  }
 0x2d4   : > { %v1077_v31 = vpop.f32.mrf.mxu1 }
 0x2d5   : > { %v1078_v32 = vadd.f32 %v1077_v31, %v897_v8 }
 0x2d6   : > { %v2617_v34 = vpop.f32.mrf.mxu1 }
 0x2d7   : > { %v1093_v35 = vsel %vm1083_vm5, %v1078_v32, -inf }
 0x2d8   : > { %1094 = vmax.xlane.f32.xlu0 %v1093_v35  ;;  %v1080_v36 = vpop.f32.mrf.mxu1  ;;  %v2837_v35 = vld [vmem:[#allocation9 + $0x10] sm:$0xff]  }
 0x2d9   : > { %895 = vrot.lane.b32.xlu1 %v3575_v59, %s3248_s2 }
 0x2da   : > { %v2618_v37 = vpop.f32.mrf.mxu1 }
 0x2df   : > { %v3605_v38 = vpop.xlane.xlu0 %1085 }
 0x2e0   : > { %v1108_v42 = vsub.f32 %v940_v10, %v3605_v38  ;;  %v2832_v10 = vld [vmem:[#allocation9 + $0x38] sm:$0xff]  }
 0x2e2   : > { %v1112_v43 = vmul.f32 1.442695, %v1108_v42 }
 0x2e4   : > { %2920 = vpow2.f32 %v1112_v43  ;;  %v2838_v43 = vld [vmem:[#allocation9 + $0x8] sm:$0xff]  }
 0x2ee   : > { %893 = vrot.lane.b32.xlu0 %v3575_v59, %s3246_s13 }
 0x2f1   : > { %v2921_v44 = vpop.eup %2920 }
 0x2f2   : > { %v1140_v45 = vpack.c.bf16 %v2921_v44, %v2921_v44  ;;  %v1124_v63 = vsel %vm1083_vm5, %v2921_v44, 0.0 }
 0x2f4   : > { %2622 = vmatmul.mubr.msk.bf16.vlgmr.msra.gmra.mxu0 %vm1083_vm5, %v1140_v45 }
 0x2f5   : > { %2633 = vmatprep.mubr.msk.bf16.mxu0 %vm3245_vm2, %v3244_v13 }
 0x351   : > { %v1089_v46 = vpop.xlane.xlu1 %1088 }
 0x352   : > { %v1109_v47 = vsub.f32 %v986_v20, %v1089_v46  ;;  %v1097_v15 = vsub.f32 -inf, %v1089_v46 }
 0x354   : > { %v1114_v48 = vmul.f32 1.442695, %v1109_v47  ;;  %v1102_v16 = vmul.f32 1.442695, %v1097_v15 }
 0x355   : > { %v896_v56 = vpop.permute.xlu1 %895 }
 0x356   : > { %2922 = vpow2.f32 %v1114_v48  ;;  %v1287_v62 = vsel %vm1147_vm4, %v896_v56, 0 }
 0x359   : > { %v1092_v49 = vpop.xlane.xlu0 %1091 }
 0x35a   : > { %v1110_v50 = vsub.f32 %v1032_v26, %v1092_v49  ;;  %v1098_v17 = vsub.f32 -inf, %v1092_v49  ;;  %v2839_v49 = vld [vmem:[#allocation9] sm:$0xff]  }
 0x35c   : > { %v1116_v51 = vmul.f32 1.442695, %v1110_v50  ;;  %v1104_v18 = vmul.f32 1.442695, %v1098_v17 }
 0x35e   : > { %2924 = vpow2.f32 %v1116_v51 }
 0x361   : > { %v1095_v52 = vpop.xlane.xlu0 %1094 }
 0x362   : > { %v1111_v53 = vsub.f32 %v1078_v32, %v1095_v52  ;;  %v1099_v19 = vsub.f32 -inf, %v1095_v52 }
 0x363   : > { %v2923_v55 = vpop.eup %2922 }
 0x364   : > { %v1118_v57 = vmul.f32 1.442695, %v1111_v53  ;;  %v1127_v58 = vsel %vm1083_vm5, %v2923_v55, 0.0  ;;  %v1141_v60 = vpack.c.bf16 %v2923_v55, %v2923_v55  ;;  %v1106_v20 = vmul.f32 1.442695, %v1099_v19 }
 0x365   : > { %v894_v59 = vpop.permute.xlu0 %893  ;;  %1128 = vadd.xlane.f32.xlu1 %v1127_v58 }
 0x366   : > { %v1241_v61 = vsel %vm1147_vm4, %v894_v59, 0  ;;  %2926 = vpow2.f32 %v1118_v57  ;;  %2628 = vmatmul.mubr.msk.bf16.vlgmr.msra.gmra.mxu1 %vm1083_vm5, %v1141_v60 }
 0x367   : > { %2632 = vmatpush3.bf16.msra.mxu0 %v1241_v61  ;;  %2638 = vmatpush3.bf16.msra.mxu1 %v1287_v62  ;;  %2928 = vpow2.f32 %v1102_v16 }
 0x368   : > { %2639 = vmatprep.mubr.msk.bf16.mxu1 %vm3245_vm2, %v3244_v13  ;;  %2643 = vmatprep.subr.bf16.mxu0 %v3244_v13  ;;  %2930 = vpow2.f32 %v1104_v18  ;;  %v2415_v18 = vld [vmem:[%s3730_s5] ss:$0 sm:$0xff] }
 0x369   : > { %1125 = vadd.xlane.f32.xlu1 %v1124_v63  ;;  %2932 = vpow2.f32 %v1106_v20 }
 0x36b   : > { %v2925_v0 = vpop.eup %2924 }
 0x36c   : > { %v1130_v1 = vsel %vm1083_vm5, %v2925_v0, 0.0  ;;  %v1142_v2 = vpack.c.bf16 %v2925_v0, %v2925_v0  ;;  %v1096_v0 = vsub.f32 -inf, %v3605_v38 }
 0x36d   : > { %1131 = vadd.xlane.f32.xlu0 %v1130_v1 }
 0x36e   : > { %2634 = vmatmul.mubr.msk.bf16.vlgmr.msra.gmra.mxu0 %vm1083_vm5, %v1142_v2  ;;  %v1100_v1 = vmul.f32 1.442695, %v1096_v0 }
 0x36f   : > { %2659 = vmatprep.mubr.msk.bf16.mxu0 %vm3245_vm2, %v3244_v13  ;;  %2644 = vmatpush3.bf16.msra.mxu0 %v2832_v10 }
 0x370   : > { %2645 = vmatprep.subr.bf16.mxu0 %v3244_v13 }
 0x373   : > { %v2927_v3 = vpop.eup %2926  ;;  %2646 = vmatpush3.bf16.msra.mxu0 %v2833_v11 }
 0x374   : > { %v1133_v4 = vsel %vm1083_vm5, %v2927_v3, 0.0  ;;  %v1143_v5 = vpack.c.bf16 %v2927_v3, %v2927_v3  ;;  %2647 = vmatprep.subr.bf16.mxu0 %v3244_v13  ;;  %v2929_v21 = vpop.eup %2928 }
 0x375   : > { %1134 = vadd.xlane.f32.xlu0 %v1133_v4  ;;  %v1121_v23 = vmul.f32 0.0, %v2929_v21  ;;  %v2931_v25 = vpop.eup %2930 }
 0x376   : > { %2640 = vmatmul.mubr.msk.bf16.vlgmr.msra.gmra.mxu1 %vm1083_vm5, %v1143_v5  ;;  %v1122_v27 = vmul.f32 0.0, %v2931_v25  ;;  %v2933_v31 = vpop.eup %2932  ;;  %v2842_v25 = vld [vmem:[#allocation11 + $0xe4] ss:$16 sps:$4 sm:$0xff]  }
 0x377   : > { %1746 = vmatprep.mubr.bf16.mxu1 %v3243_v12  ;;  %2648 = vmatpush3.bf16.msra.mxu0 %v2834_v14  ;;  %v1123_v34 = vmul.f32 0.0, %v2933_v31 }
 0x378   : > { %2649 = vmatprep.subr.bf16.mxu0 %v3244_v13  ;;  %1714 = vmatprep.subr.bf16.mxu1 %v2842_v25  ;;  %v2903_v25 = vld [vmem:[#allocation12 + $0xa0] sm:$0xff]  }
 0x37b   : > { %2650 = vmatpush3.bf16.msra.mxu0 %v2835_v28  ;;  %v2848_v28 = vld [vmem:[#allocation11 + $0xc4] ss:$16 sps:$4 sm:$0xff]  }
 0x37c   : > { %2651 = vmatprep.subr.bf16.mxu0 %v3244_v13 }
 0x37f   : > { %2652 = vmatpush3.bf16.msra.mxu0 %v2836_v30  ;;  %v2849_v30 = vld [vmem:[#allocation11 + $0xc8] ss:$16 sps:$4 sm:$0xff]  }
 0x380   : > { %2653 = vmatprep.subr.bf16.mxu0 %v3244_v13 }
 0x383   : > { %2654 = vmatpush3.bf16.msra.mxu0 %v2837_v35  ;;  %v2854_v35 = vld [vmem:[#allocation11 + $0xa4] ss:$16 sps:$4 sm:$0xff]  }
 0x384   : > { %2655 = vmatprep.subr.bf16.mxu0 %v3244_v13 }
 0x387   : > { %2656 = vmatpush3.bf16.msra.mxu0 %v2838_v43  ;;  %v2858_v43 = vld [vmem:[#allocation11 + $0x80] ss:$16 sps:$4 sm:$0xff]  }
 0x388   : > { %2657 = vmatprep.subr.bf16.mxu0 %v3244_v13 }
 0x38b   : > { %2658 = vmatpush3.bf16.msra.mxu0 %v2839_v49  ;;  %v2864_v49 = vld [vmem:[#allocation11 + $0x60] ss:$16 sps:$4 sm:$0xff]  }
 0x3b4   : > { %v3628_v6 = vpop.f32.mrf.mxu0 }
 0x3b6   : > { %v2623_v7 = vpop.f32.mrf.mxu0 }
 0x3b8   : > { %v1188_v8 = vpop.f32.mrf.mxu0 }
 0x3ba   : > { %v2624_v9 = vpop.f32.mrf.mxu0 }
 0x3ee   : > { %v1129_v22 = vpop.xlane.xlu1 %1128 }
 0x3ef   : > { %v1137_v24 = vadd.f32 %v1129_v22, %v1121_v23 }
 0x3f1   : > { %2934 = vrcp.f32 %v1137_v24  ;;  %v2840_v24 = vld [vmem:[#allocation11 + $0xe0] ss:$16 sps:$4 sm:$0xff]  }
 0x3f2   : > { %v1126_v3 = vpop.xlane.xlu1 %1125  ;;  %1715 = vmatpush1.bf16.msra.mxu1 %v2840_v24  ;;  %v2902_v24 = vld [vmem:[#allocation12 + $0x20] sm:$0xff]  }
 0x3f3   : > { %1716 = vmatprep.subr.bf16.mxu1 %v2848_v28  ;;  %v2906_v28 = vld [vmem:[#allocation12 + $0x18] sm:$0xff]  }
 0x3f6   : > { %v1132_v26 = vpop.xlane.xlu0 %1131 }
 0x3f7   : > { %v1138_v29 = vadd.f32 %v1132_v26, %v1122_v27  ;;  %v2843_v26 = vld [vmem:[#allocation11 + $0xe8] ss:$16 sps:$4 sm:$0xff]  }
 0x3f9   : > { %2936 = vrcp.f32 %v1138_v29  ;;  %v2851_v29 = vld [vmem:[#allocation11 + $0xcc] ss:$16 sps:$4 sm:$0xff]  }
 0x3fe   : > { %v1135_v32 = vpop.xlane.xlu0 %1134  ;;  %v2935_v44 = vpop.eup %2934 }
 0x3ff   : > { %v1139_v37 = vadd.f32 %v1135_v32, %v1123_v34 }
 0x401   : > { %2938 = vrcp.f32 %v1139_v37  ;;  %v2852_v37 = vld [vmem:[#allocation11 + $0xa0] ss:$16 sps:$4 sm:$0xff]  }
 0x402   : > { %2940 = vpow2.f32 %v1100_v1 }
 0x406   : > { %v2937_v52 = vpop.eup %2936 }
 0x40e   : > { %v2939_v60 = vpop.eup %2938 }
 0x40f   : > { %v2941_v2 = vpop.eup %2940 }
 0x410   : > { %v1120_v4 = vmul.f32 0.0, %v2941_v2 }
 0x412   : > { %v1136_v5 = vadd.f32 %v1126_v3, %v1120_v4  ;;  %v1329_v8 = vadd.f32 %v3628_v6, %v1120_v4  ;;  %v2424_v3 = vld [vmem:[%s3731_s6] ss:$0 sm:$0xff] }
 0x414   : > { %2942 = vrcp.f32 %v1136_v5  ;;  %v2425_v5 = vld [vmem:[%s3732_s7] ss:$0 sm:$0xff] }
 0x421   : > { %v2943_v7 = vpop.eup %2942 }
 0x422   : > { %v1337_v11 = vmul.f32 %v2943_v7, %v1329_v8 }
 0x426   : > { %v1231_v36 = vpop.f32.mrf.mxu1 }
 0x427   : > { %v1330_v42 = vadd.f32 %v1231_v36, %v1121_v23  ;;  %v2857_v36 = vld [vmem:[#allocation11 + $0xac] ss:$16 sps:$4 sm:$0xff]  }
 0x428   : > { %v2629_v45 = vpop.f32.mrf.mxu1 }
 0x429   : > { %v1338_v46 = vmul.f32 %v2935_v44, %v1330_v42  ;;  %v2855_v42 = vld [vmem:[#allocation11 + $0xa8] ss:$16 sps:$4 sm:$0xff]   ;;  %v2860_v44 = vld [vmem:[#allocation11 + $0x84] ss:$16 sps:$4 sm:$0xff]  }
 0x42a   : > { %v1234_v47 = vpop.f32.mrf.mxu1  ;;  %v2861_v45 = vld [vmem:[#allocation11 + $0x88] ss:$16 sps:$4 sm:$0xff]  }
 0x42b   : > { %1342 = vrot.lane.b32.xlu0 %v1338_v46, %s3248_s2  ;;  %v2863_v46 = vld [vmem:[#allocation11 + $0x8c] ss:$16 sps:$4 sm:$0xff]   ;;  %v2866_v47 = vld [vmem:[#allocation11 + $0x64] ss:$16 sps:$4 sm:$0xff]   ;;  %s2222_s2 = sshll.u32 %s3524_s22, 4  ;;  %s2223_s2 = int_to_ptr.vmem [resolvable:$true] %s2222_s2 }
 0x42c   : > { %v2630_v48 = vpop.f32.mrf.mxu1  ;;  %s3116_s10 = scalar_lea.vmem %s2223_s2, 128  ;;  %p3123_p4 = scmp.lt.s32.totalorder %s2223_s2, %s3121_s28 }
 0x42d   : > { %v2869_v48 = vld [vmem:[#allocation11 + $0x6c] ss:$16 sps:$4 sm:$0xff]   ;;  %p3117_p1 = scmp.ne.s32.totalorder %s2223_s2, %s3116_s10  ;;  %p3124_p7 = scmp.lt.s32.totalorder %s3122_s29, %s3116_s10 }
 0x42e   : > { %v1277_v50 = vpop.f32.mrf.mxu0 }
 0x42f   : > { %v1331_v51 = vadd.f32 %v1277_v50, %v1122_v27  ;;  %v2845_v27 = vld [vmem:[#allocation11 + $0xec] ss:$16 sps:$4 sm:$0xff]   ;;  %v2867_v50 = vld [vmem:[#allocation11 + $0x68] ss:$16 sps:$4 sm:$0xff]   ;;  %p3118_p5 = pnand %p3117_p1, %p3448_p11  ;;  %p3125_p8 = por %p3124_p7, %p3123_p4 }
 0x430   : > { %v2635_v53 = vpop.f32.mrf.mxu0  ;;  %1755 = vmatprep.subr.bf16.mxu0 %v2845_v27  ;;  %v2905_v27 = vld [vmem:[#allocation12 + $0xd8] sm:$0xff]  }
 0x431   : > { %v1339_v55 = vmul.f32 %v2937_v52, %v1331_v51  ;;  %v2872_v51 = vld [vmem:[#allocation11 + $0x44] ss:$16 sps:$4 sm:$0xff]   ;;  %v2875_v52 = vld [vmem:[#allocation11 + $0x4c] ss:$16 sps:$4 sm:$0xff]   ;;  %v2870_v53 = vld [vmem:[#allocation11 + $0x40] ss:$16 sps:$4 sm:$0xff]   ;;  %p3119_p2 = pneg %p3118_p5 }
 0x432   : > { %v1280_v56 = vpop.f32.mrf.mxu0 }
 0x433   : > { %1346 = vrot.lane.b32.xlu1 %v1339_v55, %s3246_s13  ;;  %v2873_v55 = vld [vmem:[#allocation11 + $0x48] ss:$16 sps:$4 sm:$0xff]   ;;  %v2878_v56 = vld [vmem:[#allocation11 + $0x24] ss:$16 sps:$4 sm:$0xff]   ;;  %s3781_s13 = sld [smem:[#allocation36_spill]]  ;;  %p3126_p10 = pnand %p3125_p8, %p3119_p2 }
 0x434   : > { %v2636_v57 = vpop.f32.mrf.mxu0 }
 0x435   : > { %v2881_v57 = vld [vmem:[#allocation11 + $0x2c] ss:$16 sps:$4 sm:$0xff]  }
 0x436   : > { %v1323_v58 = vpop.f32.mrf.mxu1 }
 0x437   : > { %v1332_v59 = vadd.f32 %v1323_v58, %v1123_v34  ;;  %v2876_v58 = vld [vmem:[#allocation11 + $0x20] ss:$16 sps:$4 sm:$0xff]  }
 0x438   : > { %v2641_v61 = vpop.f32.mrf.mxu1 }
 0x439   : > { %v1340_v62 = vmul.f32 %v2939_v60, %v1332_v59  ;;  %v2879_v59 = vld [vmem:[#allocation11 + $0x28] ss:$16 sps:$4 sm:$0xff]   ;;  %v2884_v60 = vld [vmem:[#allocation11 + $0x4] ss:$16 sps:$4 sm:$0xff]   ;;  %v2887_v61 = vld [vmem:[#allocation11 + $0xc] ss:$16 sps:$4 sm:$0xff]  }
 0x43a   : > { %v1326_v63 = vpop.f32.mrf.mxu1 }
 0x43b   : > { %1350 = vrot.lane.b32.xlu1 %v1340_v62, %s3247_s26  ;;  %v2882_v62 = vld [vmem:[#allocation11] ss:$16 sps:$4 sm:$0xff]   ;;  %v2885_v63 = vld [vmem:[#allocation11 + $0x8] ss:$16 sps:$4 sm:$0xff]   ;;  %s2494_s26 = sshll.u32 %s3779_s12, 7 }
 0x43c   : > { %v2642_v13 = vpop.f32.mrf.mxu1  ;;  %s2220_s25 = scalar_lea.hbm %s3782_s23, %s2494_s26 }
 0x49d   : > { %v1343_v9 = vpop.permute.xlu0 %1342 }
 0x49e   : > { %v1353_v14 = vsel %vm898_vm3, %v1337_v11, %v1343_v9  ;;  %v2889_v11 = vld [vmem:[#allocation12 + $0xf8] sm:$0xff]  }
 0x4a5   : > { %v1347_v10 = vpop.permute.xlu1 %1346 }
 0x4a6   : > { %v1355_v15 = vsel %vm1354_vm6, %v1353_v14, %v1347_v10  ;;  %v2888_v10 = vld [vmem:[#allocation12 + $0x78] sm:$0xff]  }
 0x4a7   : > { %v2890_v14 = vld [vmem:[#allocation12 + $0x38] sm:$0xff]  }
 0x4ad   : > { %v1351_v16 = vpop.permute.xlu1 %1350 }
 0x4ae   : > { %v1357_v38 = vsel %vm1356_vm7, %v1355_v15, %v1351_v16  ;;  %v2891_v15 = vld [vmem:[#allocation12 + $0xb8] sm:$0xff]   ;;  %v2892_v16 = vld [vmem:[#allocation12 + $0x70] sm:$0xff]  }
 0x4af   : > { %v1358_v17 = vpack.c.bf16 %v1357_v38, %v1357_v38  ;;  %v2893_v38 = vld [vmem:[#allocation12 + $0xf0] sm:$0xff]  }
 0x4b1   : > { %2660 = vmatmul.mubr.bf16.vlgmr.msra.gmra.mxu0 %v1358_v17  ;;  %v2894_v17 = vld [vmem:[#allocation12 + $0x30] sm:$0xff]  }
 0x4b2   : > { %1787 = vmatprep.mubr.bf16.mxu0 %v3243_v12  ;;  %v2846_v12 = vld [vmem:[#allocation11 + $0xc0] ss:$16 sps:$4 sm:$0xff]   ;;  %1756 = vmatpush1.bf16.msra.mxu0 %v2843_v26  ;;  %v2904_v26 = vld [vmem:[#allocation12 + $0x58] sm:$0xff]  }
 0x4b3   : > { %1757 = vmatprep.subr.bf16.mxu0 %v2851_v29  ;;  %1717 = vmatpush1.bf16.msra.mxu1 %v2846_v12  ;;  %v2907_v29 = vld [vmem:[#allocation12 + $0x98] sm:$0xff]   ;;  %v2908_v12 = vld [vmem:[#allocation12 + $0x50] sm:$0xff]  }
 0x4b4   : > { %1718 = vmatprep.subr.bf16.mxu1 %v2854_v35  ;;  %v2914_v35 = vld [vmem:[#allocation12 + $0x8] sm:$0xff]  }
 0x4b6   : > { %1758 = vmatpush1.bf16.msra.mxu0 %v2849_v30  ;;  %v2909_v30 = vld [vmem:[#allocation12 + $0xd0] sm:$0xff]  }
 0x4b7   : > { %1759 = vmatprep.subr.bf16.mxu0 %v2857_v36  ;;  %1719 = vmatpush1.bf16.msra.mxu1 %v2852_v37  ;;  %v2915_v36 = vld [vmem:[#allocation12 + $0x88] sm:$0xff]   ;;  %v2916_v37 = vld [vmem:[#allocation12 + $0x40] sm:$0xff]  }
 0x4b8   : > { %1720 = vmatprep.subr.bf16.mxu1 %v2860_v44  ;;  %v2919_v44 = vld [vmem:[#allocation12 + $0x80] sm:$0xff]  }
 0x4ba   : > { %1760 = vmatpush1.bf16.msra.mxu0 %v2855_v42  ;;  %v2917_v42 = vld [vmem:[#allocation12 + $0xc0] sm:$0xff]  }
 0x4bb   : > { %1761 = vmatprep.subr.bf16.mxu0 %v2863_v46  ;;  %1721 = vmatpush1.bf16.msra.mxu1 %v2858_v43  ;;  %v2918_v43 = vld [vmem:[#allocation12] sm:$0xff]   ;;  %v1548_v46 = vsub.s32 3, %v3550_v39 }
 0x4bc   : > { %1722 = vmatprep.subr.bf16.mxu1 %v2866_v47 }
 0x4be   : > { %1762 = vmatpush1.bf16.msra.mxu0 %v2861_v45  ;;  %v1532_v45 = vld [vmem:[%s3734_s9] sm:$0xf] }
 0x4bf   : > { %1763 = vmatprep.subr.bf16.mxu0 %v2869_v48  ;;  %1723 = vmatpush1.bf16.msra.mxu1 %v2864_v49  ;;  %v1537_v47 = vrot.slane %v1532_v45, %v651_v41  ;;  %v1545_v48 = vrot.slane %v1532_v45, %v659_v54 }
 0x4c0   : > { %1724 = vmatprep.subr.bf16.mxu1 %v2872_v51  ;;  %v1541_v51 = vrot.slane %v1532_v45, %v655_v40 }
 0x4c2   : > { %1764 = vmatpush1.bf16.msra.mxu0 %v2867_v50 }
 0x4c3   : > { %1765 = vmatprep.subr.bf16.mxu0 %v2875_v52  ;;  %1725 = vmatpush1.bf16.msra.mxu1 %v2870_v53  ;;  %v1549_v52 = vrot.slane %v1532_v45, %v1548_v46 }
 0x4c4   : > { %1726 = vmatprep.subr.bf16.mxu1 %v2878_v56 }
 0x4c6   : > { %1766 = vmatpush1.bf16.msra.mxu0 %v2873_v55 }
 0x4c7   : > { %1767 = vmatprep.subr.bf16.mxu0 %v2881_v57  ;;  %1727 = vmatpush1.bf16.msra.mxu1 %v2876_v58 }
 0x4c8   : > { %1728 = vmatprep.subr.bf16.mxu1 %v2884_v60 }
 0x4ca   : > { %1768 = vmatpush1.bf16.msra.mxu0 %v2879_v59 }
 0x4cb   : > { %1769 = vmatprep.subr.bf16.mxu0 %v2887_v61  ;;  %1729 = vmatpush1.bf16.msra.mxu1 %v2882_v62 }
 0x4cc   : > { %2531 = vmatprep.subr.bf16.mxu1 %v2888_v10 }
 0x4ce   : > { %1770 = vmatpush1.bf16.msra.mxu0 %v2885_v63 }
 0x4cf   : > { %2553 = vmatprep.subr.bf16.mxu0 %v2889_v11 }
 0x571   : > { %v1464_v19 = vpop.f32.mrf.mxu0 }
 0x572   : > { %v1465_v6 = vadd.f32 %v2415_v18, %v1464_v19  ;;  %v2895_v18 = vld [vmem:[#allocation12 + $0xb0] sm:$0xff]   ;;  %v2896_v19 = vld [vmem:[#allocation12 + $0x68] sm:$0xff]  }
 0x573   : > { %v2661_v20 = vpop.f32.mrf.mxu0 }
 0x574   : > { %v1470_v21 = vadd.f32 %v1465_v6, %v3534_v33  ;;  %v2897_v6 = vld [vmem:[#allocation12 + $0xe8] sm:$0xff]  }
 0x575   : > { %v1467_v22 = vpop.f32.mrf.mxu0  ;;  %v2898_v20 = vld [vmem:[#allocation12 + $0x28] sm:$0xff]  }
 0x576   : > { %1473 = vadd.xlane.f32.xlu0 %v1470_v21  ;;  %v2900_v22 = vld [vmem:[#allocation12 + $0x60] sm:$0xff]  }
 0x577   : > { %v2662_v23 = vpop.f32.mrf.mxu0 }
 0x578   : > { %v2901_v23 = vld [vmem:[#allocation12 + $0xe0] sm:$0xff]  }
 0x5ff   : > { %v1474_v33 = vpop.xlane.xlu0 %1473 }
 0x600   : > { %v1476_v31 = vmul.f32 0.0078125, %v1474_v33  ;;  %v2910_v33 = vld [vmem:[#allocation12 + $0x10] sm:$0xff]  }
 0x602   : > { %v1477_v32 = vsub.f32 %v1470_v21, %v1476_v31  ;;  %v2899_v21 = vld [vmem:[#allocation12 + $0xa8] sm:$0xff]   ;;  %v2911_v31 = vld [vmem:[#allocation12 + $0x90] sm:$0xff]  }
 0x604   : > { %v1478_v34 = vmul.f32 %v1477_v32, %v1477_v32 }
 0x606   : > { %1479 = vadd.xlane.f32.xlu1 %v1478_v34  ;;  %v2913_v34 = vld [vmem:[#allocation12 + $0xc8] sm:$0xff]  }
 0x68f   : > { %v1480_v13 = vpop.xlane.xlu1 %1479 }
 0x690   : > { %v1481_v0 = vmul.f32 0.0078125, %v1480_v13 }
 0x692   : > { %v1482_v1 = vadd.f32 1e-05, %v1481_v0 }
 0x694   : > { %2944 = vrsqrt.f32 %v1482_v1 }
 0x6a1   : > { %v2945_v2 = vpop.eup %2944 }
 0x6a2   : > { %v1484_v4 = vmul.f32 %v2945_v2, %v1477_v32  ;;  %v2912_v32 = vld [vmem:[#allocation12 + $0x48] sm:$0xff]  }
 0x6a4   : > { %v1491_v7 = vmul.f32 %v2424_v3, %v1484_v4 }
 0x6a6   : > { %v3654_v8 = vadd.f32 %v2425_v5, %v1491_v7 }
 0x6a8   : > { %v1499_v9 = vpack.c.bf16 %v3654_v8, %v3654_v8 }
 0x6aa   : > { %1747 = vmatmul.mubr.bf16.vlgmr.msra.gmra.mxu1 %v1499_v9  ;;  %1788 = vmatmul.mubr.bf16.vlgmr.msra.gmra.mxu0 %v1499_v9 }
 0x6ab   : > { %2532 = vmatpush3.bf16.msra.mxu1 %v2890_v14  ;;  %2554 = vmatpush3.bf16.msra.mxu0 %v2891_v15 }
 0x6ac   : > { %2533 = vmatprep.subr.bf16.mxu1 %v2892_v16  ;;  %2555 = vmatprep.subr.bf16.mxu0 %v2893_v38 }
 0x6af   : > { %2534 = vmatpush3.bf16.msra.mxu1 %v2894_v17  ;;  %2556 = vmatpush3.bf16.msra.mxu0 %v2895_v18 }
 0x6b0   : > { %2535 = vmatprep.subr.bf16.mxu1 %v2896_v19  ;;  %2557 = vmatprep.subr.bf16.mxu0 %v2897_v6 }
 0x6b3   : > { %2536 = vmatpush3.bf16.msra.mxu1 %v2898_v20  ;;  %2558 = vmatpush3.bf16.msra.mxu0 %v2899_v21 }
 0x6b4   : > { %2537 = vmatprep.subr.bf16.mxu1 %v2900_v22  ;;  %2559 = vmatprep.subr.bf16.mxu0 %v2901_v23 }
 0x6b7   : > { %2538 = vmatpush3.bf16.msra.mxu1 %v2902_v24  ;;  %2560 = vmatpush3.bf16.msra.mxu0 %v2903_v25 }
 0x6b8   : > { %2539 = vmatprep.subr.bf16.mxu1 %v2904_v26  ;;  %2561 = vmatprep.subr.bf16.mxu0 %v2905_v27 }
 0x6bb   : > { %2540 = vmatpush3.bf16.msra.mxu1 %v2906_v28  ;;  %2562 = vmatpush3.bf16.msra.mxu0 %v2907_v29 }
 0x6bc   : > { %2541 = vmatprep.subr.bf16.mxu1 %v2908_v12  ;;  %2563 = vmatprep.subr.bf16.mxu0 %v2909_v30 }
 0x6bf   : > { %2542 = vmatpush3.bf16.msra.mxu1 %v2910_v33  ;;  %2564 = vmatpush3.bf16.msra.mxu0 %v2911_v31 }
 0x6c0   : > { %2543 = vmatprep.subr.bf16.mxu1 %v2912_v32  ;;  %2565 = vmatprep.subr.bf16.mxu0 %v2913_v34 }
 0x6c3   : > { %2544 = vmatpush3.bf16.msra.mxu1 %v2914_v35  ;;  %2566 = vmatpush3.bf16.msra.mxu0 %v2915_v36 }
 0x6c4   : > { %2545 = vmatprep.subr.bf16.mxu1 %v2916_v37  ;;  %2567 = vmatprep.subr.bf16.mxu0 %v2917_v42  ;;  %v2458_v42 = vld [vmem:[%s3736_s11] ss:$0 sm:$0xff] }
 0x6c7   : > { %2546 = vmatpush3.bf16.msra.mxu1 %v2918_v43  ;;  %2568 = vmatpush3.bf16.msra.mxu0 %v2919_v44 }
 0x76a   : > { %v1748_v49 = vpop.f32.mrf.mxu1  ;;  %v1789_v50 = vpop.f32.mrf.mxu0 }
 0x76b   : > { %v1749_v53 = vadd.f32 %v1748_v49, %v1537_v47  ;;  %v1790_v55 = vadd.f32 %v1789_v50, %v1545_v48 }
 0x76c   : > { %v1750_v56 = vpop.f32.mrf.mxu1  ;;  %v1791_v57 = vpop.f32.mrf.mxu0 }
 0x76d   : > { %v1800_v58 = vmul.f32 %v1749_v53, %v1749_v53  ;;  %v1802_v59 = vmul.f32 %v1790_v55, %v1790_v55  ;;  %v1751_v60 = vadd.f32 %v1750_v56, %v1541_v51  ;;  %v1792_v61 = vadd.f32 %v1791_v57, %v1549_v52 }
 0x76e   : > { %v1752_v62 = vpop.f32.mrf.mxu1  ;;  %v1793_v63 = vpop.f32.mrf.mxu0  ;;  %v1796_v22 = vmul.f32 0.5, %v1749_v53  ;;  %v1798_v24 = vmul.f32 0.5, %v1790_v55 }
 0x76f   : > { %v1804_v41 = vmul.f32 %v1800_v58, %v1749_v53  ;;  %v1806_v13 = vmul.f32 %v1802_v59, %v1790_v55  ;;  %v1801_v0 = vmul.f32 %v1751_v60, %v1751_v60  ;;  %v1803_v54 = vmul.f32 %v1792_v61, %v1792_v61  ;;  %v2491_v63 = vld [vmem:[%s3780_s20] ss:$0 sm:$0xff] }
 0x770   : > { %v1753_v1 = vpop.f32.mrf.mxu1  ;;  %v1794_v2 = vpop.f32.mrf.mxu0  ;;  %v1797_v25 = vmul.f32 0.5, %v1751_v60  ;;  %v1799_v27 = vmul.f32 0.5, %v1792_v61 }
 0x771   : > { %v1808_v3 = vmul.f32 0.044715, %v1804_v41  ;;  %v1810_v39 = vmul.f32 0.044715, %v1806_v13  ;;  %v1805_v40 = vmul.f32 %v1801_v0, %v1751_v60  ;;  %v1807_v4 = vmul.f32 %v1803_v54, %v1792_v61  ;;  %v2492_v41 = vld [vmem:[%s3781_s13] ss:$0 sm:$0xff] }
 0x773   : > { %v1812_v5 = vadd.f32 %v1808_v3, %v1749_v53  ;;  %v1814_v7 = vadd.f32 %v1810_v39, %v1790_v55  ;;  %v1809_v9 = vmul.f32 0.044715, %v1805_v40  ;;  %v1811_v10 = vmul.f32 0.044715, %v1807_v4 }
 0x775   : > { %v1816_v11 = vmul.f32 0.7978846, %v1812_v5  ;;  %v1818_v14 = vmul.f32 0.7978846, %v1814_v7  ;;  %v1813_v15 = vadd.f32 %v1809_v9, %v1751_v60  ;;  %v1815_v16 = vadd.f32 %v1811_v10, %v1792_v61 }
 0x777   : > { %2946 = vtanh.f32 %v1816_v11  ;;  %v1817_v38 = vmul.f32 0.7978846, %v1813_v15  ;;  %v1819_v17 = vmul.f32 0.7978846, %v1815_v16 }
 0x778   : > { %2948 = vtanh.f32 %v1818_v14 }
 0x779   : > { %2950 = vtanh.f32 %v1817_v38 }
 0x77a   : > { %2952 = vtanh.f32 %v1819_v17 }
 0x784   : > { %v2947_v18 = vpop.eup %2946 }
 0x785   : > { %v2949_v19 = vpop.eup %2948  ;;  %v1824_v6 = vadd.f32 1.0, %v2947_v18 }
 0x786   : > { %v1826_v20 = vadd.f32 1.0, %v2949_v19  ;;  %v2951_v21 = vpop.eup %2950 }
 0x787   : > { %v2953_v23 = vpop.eup %2952  ;;  %v1825_v26 = vadd.f32 1.0, %v2951_v21  ;;  %v1828_v29 = vmul.f32 %v1824_v6, %v1796_v22 }
 0x788   : > { %v1827_v28 = vadd.f32 1.0, %v2953_v23  ;;  %v1830_v30 = vmul.f32 %v1826_v20, %v1798_v24 }
 0x789   : > { %v1829_v12 = vmul.f32 %v1825_v26, %v1797_v25  ;;  %v1832_v34 = vpack.c.bf16 %v1828_v29, %v1828_v29 }
 0x78a   : > { %v1831_v33 = vmul.f32 %v1827_v28, %v1799_v27  ;;  %v1834_v35 = vpack.c.bf16 %v1830_v30, %v1830_v30 }
 0x78b   : > { %v1833_v31 = vpack.c.bf16 %v1829_v12, %v1829_v12 }
 0x78c   : > { %v1835_v32 = vpack.c.bf16 %v1831_v33, %v1831_v33 }
 0x78d   : > { %2131 = vmatprep.mubr.bf16.mxu1 %v1833_v31 }
 0x78e   : > { %2171 = vmatprep.mubr.bf16.mxu0 %v1835_v32  ;;  %2132 = vmatmul.mubr.bf16.vlgmr.msra.gmra.mxu1 %v1832_v34 }
 0x78f   : > { %2172 = vmatmul.mubr.bf16.vlgmr.msra.gmra.mxu0 %v1834_v35 }
 0x84e   : > { %v2547_v36 = vpop.f32.mrf.mxu1 }
 0x84f   : > { %v2569_v37 = vpop.f32.mrf.mxu0 }
 0x850   : > { %v2548_v43 = vpop.f32.mrf.mxu1 }
 0x851   : > { %v2549_v44 = vadd.f32 %v2548_v43, %v2547_v36  ;;  %v2570_v45 = vpop.f32.mrf.mxu0 }
 0x852   : > { %v2550_v46 = vpop.f32.mrf.mxu1  ;;  %v2571_v48 = vadd.f32 %v2570_v45, %v2569_v37 }
 0x853   : > { %v2134_v47 = vadd.f32 %v2549_v44, %v2458_v42  ;;  %v2572_v49 = vpop.f32.mrf.mxu0 }
 0x854   : > { %v2551_v50 = vpop.f32.mrf.mxu1 }
 0x855   : > { %v2174_v51 = vadd.f32 %v2571_v48, %v2134_v47  ;;  %v2573_v52 = vpop.f32.mrf.mxu0 }
 0x857   : > { %v2179_v53 = vadd.f32 %v2174_v51, %v3654_v8 }
 0x859   : > { %2182 = vadd.xlane.f32.xlu0 %v2179_v53 }
 0x8e2   : > { %v2183_v55 = vpop.xlane.xlu0 %2182 }
 0x8e3   : > { %v2184_v56 = vmul.f32 0.0078125, %v2183_v55 }
 0x8e5   : > { %v2185_v57 = vsub.f32 %v2179_v53, %v2184_v56 }
 0x8e7   : > { %v2186_v58 = vmul.f32 %v2185_v57, %v2185_v57 }
 0x8e9   : > { %2187 = vadd.xlane.f32.xlu0 %v2186_v58 }
 0x972   : > { %v2188_v59 = vpop.xlane.xlu0 %2187 }
 0x973   : > { %v2189_v60 = vmul.f32 0.0078125, %v2188_v59 }
 0x975   : > { %v2190_v61 = vadd.f32 1e-05, %v2189_v60 }
 0x977   : > { %2954 = vrsqrt.f32 %v2190_v61 }
 0x984   : > { %v2955_v62 = vpop.eup %2954 }
 0x985   : > { %v2192_v8 = vmul.f32 %v2955_v62, %v2185_v57 }
 0x987   : > { %v2199_v13 = vmul.f32 %v2491_v63, %v2192_v8 }
 0x989   : > { %v2206_v0 = vadd.f32 %v2492_v41, %v2199_v13 }
 0x98b   : > { %2207 = vst [vmem:[%s3524_s22] sm:$0xff] %v2206_v0 }
 0x98c   : > { %3129 = shalt.err (!%p3126_p10)
}
 0x98d   : > { %s3130_s18 = scalar_lea.hbm %s2220_s25, 128  ;;  %s3134_s12 = scalar_lea.hbm %s3782_s23, 256 }
 0x98e   : > { %p3131_p9 = scmp.ne.s32.totalorder %s2220_s25, %s3130_s18  ;;  %p3135_p0 = scmp.lt.s32.totalorder %s2220_s25, %s3782_s23 }
 0x98f   : > { %p3136_p3 = scmp.lt.s32.totalorder %s3134_s12, %s3130_s18 }
 0x990   : > { %p3132_p12 = pnand %p3131_p9, %p3448_p11 }
 0x991   : > { %p3137_p1 = por %p3136_p3, %p3135_p0 }
 0x992   : > { %p3133_p13 = pneg %p3132_p12 }
 0x994   : > { %p3138_p5 = pnand %p3137_p1, %p3133_p13 }
 0x996   : > { %3141 = shalt.err (!%p3138_p5)
}
 0x997   : > { %2683 = dma.vmem_to_hbm [thread:$0]  (%p3448_p11), %s2223_s2, 128, %s2220_s25, %s2209_s8  }
 0x998 PF: > { %s3783_s20 = sld [smem:[#allocation25_spill]] }
 0x999   : > { %s3784_s16 = sld [smem:[#allocation21_spill]] }
 0x99e   : > { %p2718_p2 = scmp.ge.s32.totalorder %s3783_s20, 2 }
 0x99f   : > { %s2234_s13 = sand.u32 1, %s3784_s16  }
 0x9a0   : > { %p2706_p4 = pnand %p2718_p2, %p3455_p6  ;;  %s2235_s26 = scalar_lea.sflag [#allocation5], %s2234_s13 }
 0x9a2   : > { %p2707_p7 = pneg %p2706_p4 }
 0x9a4   : > { %3195 = dma.done.wait (%p2707_p7), %s2235_s26, 128  }
 0x9a5   : > { %3197 = vsyncadd (%p2707_p7), %s2235_s26, 4294967168  ;;  %s35_s20 = sadd.s32 1, %s3783_s20   ;;  %s3786_s24 = sld [smem:[#allocation22_spill]] }
 0x9a6   : > { %p32_p8 = scmp.ge.s32.totalorder %s35_s20, 6   ;;  %s3787_s15 = sld [smem:[#allocation29_spill]] }
 0x9a7   : > { %s3788_s16 = sld [smem:[#allocation24_spill]]  ;;  %s3791_s29 = smov %s3204_s30 }
 0x9a8   : > { %s3789_s18 = sld [smem:[#allocation26_spill]]  ;;  %s3793_s17 = smov %s3224_s19 }
 0x9a9   : > { %s3790_s14 = sld [smem:[#allocation27_spill]] }
 0x9ab   : > { %s3792_s30 = smov %s3786_s24  ;;  %34 = sbr.rel (!%p32_p8) target bundleno = 20 (0x14), region = 154 }
 0x9af   : > { %s3794_s19 = smov %s3790_s14 }
 0x9b0   :  { %2240 = vsyncpa [#allocation4], 1 }
 0x9b1   :  { %2242 = vsyncpa [#allocation4 + $0x1], 1 }
 0x9b2   :  { %2243 = vsyncpa [#allocation7], 1 }
 0x9b3   :  { %2245 = vsyncpa [#allocation7 + $0x1], 1 }
 0x9b4   :  { %2246 = vsyncpa [#allocation10], 1 }
 0x9b5   :  { %2247 = vsyncpa [#allocation13], 1 }
 0x9b6   :  { %2248 = vsyncpa [#allocation5], 1 }
 0x9b7   :  { %2250 = vsyncpa [#allocation5 + $0x1], 1 }

// kernel: tpu_custom_call.1
= control target key start
LH: loop header
LB: loop body
LE: loop exit
PB: predicated region body
PF: predicated region fallthrough
CT: control target
= control target key end

     0   :  { %s3725_s0 = inlined_call_operand.hbm [shape: f32[2,8,128], index: 0, kind: input, shape index: {}]   ;;  %s3726_s1 = inlined_call_operand.hbm [shape: f32[2,1,8], index: 1, kind: input, shape index: {}]   ;;  %s3727_s2 = inlined_call_operand.hbm [shape: bf16[128,384], index: 2, kind: input, shape index: {}]   ;;  %s3728_s3 = inlined_call_operand.vmem [shape: f32[1,384], index: 3, kind: input, shape index: {}]   ;;  %s3729_s4 = inlined_call_operand.hbm [shape: bf16[128,128], index: 4, kind: input, shape index: {}]   ;;  %s3730_s5 = inlined_call_operand.vmem [shape: f32[1,128], index: 5, kind: input, shape index: {}]   ;;  %s3731_s6 = inlined_call_operand.vmem [shape: f32[1,128], index: 6, kind: input, shape index: {}]   ;;  %s3732_s7 = inlined_call_operand.vmem [shape: f32[1,128], index: 7, kind: input, shape index: {}]   ;;  %s3733_s8 = inlined_call_operand.hbm [shape: bf16[128,512], index: 8, kind: input, shape index: {}]   ;;  %s3734_s9 = inlined_call_operand.vmem [shape: f32[1,512], index: 9, kind: input, shape index: {}]   ;;  %s3735_s10 = inlined_call_operand.hbm [shape: bf16[512,128], index: 10, kind: input, shape index: {}]   ;;  %s3736_s11 = inlined_call_operand.vmem [shape: f32[1,128], index: 11, kind: input, shape index: {}]   ;;  %s3737_s12 = inlined_call_operand.vmem [shape: f32[1,128], index: 12, kind: input, shape index: {}]   ;;  %s3738_s13 = inlined_call_operand.vmem [shape: f32[1,128], index: 13, kind: input, shape index: {}]   ;;  %s3739_s14 = inlined_call_operand.hbm [shape: f32[2,8,128], index: 14, kind: output, shape index: {}]  }
   0x1   :  { %3749 = sst [smem:[#allocation30_spill]] %s3725_s0 }
   0x2   :  { %3750 = sst [smem:[#allocation31_spill]] %s3727_s2 }
   0x3   :  { %3751 = sst [smem:[#allocation32_spill]] %s3729_s4 }
   0x4   :  { %3752 = sst [smem:[#allocation33_spill]] %s3733_s8 }
   0x5   :  { %3753 = sst [smem:[#allocation34_spill]] %s3735_s10 }
   0x6   :  { %3754 = sst [smem:[#allocation35_spill]] %s3737_s12 }
   0x7   :  { %3755 = sst [smem:[#allocation36_spill]] %s3738_s13 }
   0x8   :  { %3756 = sst [smem:[#allocation37_spill]] %s3739_s14 }
   0x9   :  { %19 = vsyncpa [#allocation4], 0 }
   0xa   :  { %21 = vsyncpa [#allocation4 + $0x1], 0 }
   0xb   :  { %22 = vsyncpa [#allocation7], 0 }
   0xc   :  { %24 = vsyncpa [#allocation7 + $0x1], 0 }
   0xd   :  { %25 = vsyncpa [#allocation10], 0 }
   0xe   :  { %26 = vsyncpa [#allocation13], 0 }
   0xf   :  { %27 = vsyncpa [#allocation5], 0 }
  0x10   :  { %29 = vsyncpa [#allocation5 + $0x1], 0  ;;  %s3325_s29 = smov 0   ;;  %s3327_s30 = smov 0  }
  0x11   :  { %s3329_s15 = smov 0   ;;  %s3331_s16 = smov 0  }
  0x12   :  { %s3333_s17 = smov 0   ;;  %s3335_s18 = smov 0  }
  0x13   :  { %s3337_s19 = smov 0   ;;  %s3339_s20 = smov 0  }
  0x14 LB: > { %3757 = sst [smem:[#allocation21_spill]] %s3200_s29  ;;  %s3366_s21 = sadd.s32 4294967295, %s3228_s20   ;;  %s3228_s20 = sphi %s3339_s20, %s35_s20   ;;  %s3224_s19 = sphi %s3337_s19, %s3794_s19   ;;  %s3220_s18 = sphi %s3335_s18, %s3789_s18   ;;  %s3216_s17 = sphi %s3333_s17, %s3793_s17   ;;  %s3212_s16 = sphi %s3331_s16, %s3788_s16   ;;  %s3208_s15 = sphi %s3329_s15, %s3787_s15   ;;  %s3204_s30 = sphi %s3327_s30, %s3792_s30   ;;  %s3200_s29 = sphi %s3325_s29, %s3791_s29  }
  0x15   : > { %3758 = sst [smem:[#allocation22_spill]] %s3208_s15  ;;  %p2363_p0 = scmp.ge.s32.totalorder %s3228_s20, 1 }
  0x16   : > { %3759 = sst [smem:[#allocation23_spill]] %s3216_s17  ;;  %p68_p1 = scmp.eq.s32.totalorder %s3366_s21, 0 }
  0x17   : > { %3760 = sst [smem:[#allocation24_spill]] %s3220_s18  ;;  %p382_p2 = scmp.lt.s32.totalorder %s3228_s20, 5 }
  0x18   : > { %3761 = sst [smem:[#allocation25_spill]] %s3228_s20  ;;  %s3230_s23 = smov [#allocation8]  }
  0x19   : > { %p3371_p3 = pnand %p2363_p0, %p382_p2  ;;  %s394_s24 = sshll.u32 %s3230_s23, 4  ;;  %s395_s24 = int_to_ptr.vmem [resolvable:$true] %s394_s24 }
  0x1a   : > { %s3231_s26 = smov [#allocation9]   ;;  %s2967_s28 = scalar_lea.vmem %s395_s24, 3072 }
  0x1b   : > { %p2685_p4 = pneg %p3371_p3  ;;  %s410_s27 = sshll.u32 %s3231_s26, 4  ;;  %s411_s27 = int_to_ptr.vmem [resolvable:$true] %s410_s27 }
  0x1c   : > { %p2968_p7 = scmp.ne.s32.totalorder %s395_s24, %s2967_s28  ;;  %p2975_p10 = scmp.lt.s32.totalorder %s395_s24, %s395_s24 }
  0x1d   : > { %p3379_p5 = pnand %p2685_p4, %p68_p1  ;;  %p2976_p11 = scmp.lt.s32.totalorder %s2967_s28, %s2967_s28 }
  0x1f   : > { %p2958_p6 = pneg %p3379_p5  ;;  %p2977_p12 = por %p2976_p11, %p2975_p10 }
  0x21   : > { %p2970_p8 = pnand %p2968_p7, %p2958_p6 }
  0x23   : > { %p2971_p9 = pneg %p2970_p8 }
  0x25   : > { %p2978_p13 = pnand %p2977_p12, %p2971_p9 }
  0x27   : > { %2981 = shalt.err (!%p2978_p13)
}
  0x28   : > { %s3232_s23 = smov 192   ;;  %s3233_s14 = smov 12  }
  0x29   : > { %s3764_s2 = sld [smem:[#allocation31_spill]]  ;;  %s2993_s12 = scalar_lea.vmem %s411_s27, 1024 }
  0x2a   : > { %p2994_p0 = scmp.ne.s32.totalorder %s411_s27, %s2993_s12  ;;  %p3001_p7 = scmp.lt.s32.totalorder %s411_s27, %s411_s27 }
  0x2b   : > { %p3002_p8 = scmp.lt.s32.totalorder %s2993_s12, %s2993_s12 }
  0x2c   : > { %p2996_p2 = pnand %p2994_p0, %p2958_p6 }
  0x2d   : > { %p3003_p10 = por %p3002_p8, %p3001_p7 }
  0x2e   : > { %p2997_p4 = pneg %p2996_p2 }
  0x2f   : > { %2688 = dma.hbm_to_vmem [thread:$0]  (!%p3379_p5), %s3764_s2, 3072, %s395_s24, [#allocation7], %s3232_s23, %s3232_s23, %s3233_s14  }
  0x30   : > { %p3004_p9 = pnand %p3003_p10, %p2997_p4 }
  0x32   : > { %3007 = shalt.err (!%p3004_p9)
}
  0x33   : > { %s3741_s28 = smov 64   ;;  %s3235_s17 = smov 4  }
  0x34   : > { %s3765_s4 = sld [smem:[#allocation32_spill]]  ;;  %s3236_s24 = smov [#allocation11]  }
  0x35   : > { %s432_s23 = sshll.u32 %s3236_s24, 4  ;;  %s433_s23 = int_to_ptr.vmem [resolvable:$true] %s432_s23 }
  0x36   : > { %s3019_s26 = scalar_lea.vmem %s433_s23, 4096  ;;  %p3027_p0 = scmp.lt.s32.totalorder %s433_s23, %s433_s23 }
  0x37   : > { %p3020_p11 = scmp.ne.s32.totalorder %s433_s23, %s3019_s26  ;;  %p3028_p2 = scmp.lt.s32.totalorder %s3019_s26, %s3019_s26 }
  0x39   : > { %p3022_p12 = pnand %p3020_p11, %p2958_p6  ;;  %p3029_p4 = por %p3028_p2, %p3027_p0 }
  0x3a   : > { %2691 = dma.hbm_to_vmem [thread:$0]  (!%p3379_p5), %s3765_s4, 1024, %s411_s27, [#allocation10], %s3741_s28, %s3741_s28, %s3235_s17  }
  0x3b   : > { %p3023_p13 = pneg %p3022_p12 }
  0x3d   : > { %p3030_p7 = pnand %p3029_p4, %p3023_p13 }
  0x3f   : > { %3033 = shalt.err (!%p3030_p7)
}
  0x40   : > { %s3237_s12 = smov 256   ;;  %s3238_s2 = smov 16  }
  0x41   : > { %s3766_s8 = sld [smem:[#allocation33_spill]]  ;;  %s3239_s14 = smov [#allocation12]  }
  0x42   : > { %s448_s24 = sshll.u32 %s3239_s14, 4  ;;  %s449_s24 = int_to_ptr.vmem [resolvable:$true] %s448_s24 }
  0x43   : > { %s3045_s28 = scalar_lea.vmem %s449_s24, 4096  ;;  %p3053_p11 = scmp.lt.s32.totalorder %s449_s24, %s449_s24 }
  0x44   : > { %p3046_p8 = scmp.ne.s32.totalorder %s449_s24, %s3045_s28  ;;  %p3054_p12 = scmp.lt.s32.totalorder %s3045_s28, %s3045_s28 }
  0x46   : > { %p3048_p10 = pnand %p3046_p8, %p2958_p6  ;;  %p3055_p13 = por %p3054_p12, %p3053_p11 }
  0x47   : > { %2694 = dma.hbm_to_vmem [thread:$0]  (!%p3379_p5), %s3766_s8, 4096, %s433_s23, [#allocation10], %s3237_s12, %s3237_s12, %s3238_s2  }
  0x48   : > { %p3049_p9 = pneg %p3048_p10 }
  0x4a   : > { %p3056_p0 = pnand %p3055_p13, %p3049_p9 }
  0x4c   : > { %3059 = shalt.err (!%p3056_p0)
}
  0x4d   : > { %s3767_s26 = smov 64   ;;  %s3768_s10 = sld [smem:[#allocation34_spill]] }
  0x4e   : > { %s2362_s25 = sadd.s32 4294967294, %s3228_s20   ;;  %s44_s28 = sadd.s32 1, %s3220_s18 }
  0x4f   : > { %p45_p6 = scmp.ge.s32.totalorder %s44_s28, 2  ;;  %s47_s12 = sadd.s32 1, %s3224_s19 }
  0x50   : > { %s54_s27 = sadd.s32 1, %s3208_s15  ;;  %p61_p2 = scmp.ne.s32.totalorder %s3208_s15, %s3204_s30 }
  0x51   : > { %s3796_s28 = smov (%p45_p6, %s44_s28), 0  ;;  %s3798_s12 = smov (!%p45_p6, %s47_s12), %s3224_s19 }
  0x52   : > { %3769 = sst [smem:[#allocation26_spill]] %s3796_s28  ;;  %p62_p4 = scmp.eq.s32.totalorder %s3228_s20, 0 }
  0x53   : > { %2697 = dma.hbm_to_vmem [thread:$0]  (!%p3379_p5), %s3768_s10, 4096, %s449_s24, [#allocation13], %s3767_s26, %s3767_s26, %s3235_s17  }
  0x54   : > { %p67_p7 = scmp.ne.s32.totalorder %s3204_s30, %s3200_s29  ;;  %p49_p8 = scmp.ge.s32.totalorder %s3798_s12, 2 }
  0x55   : > { %p369_p10 = scmp.eq.s32.totalorder %s3366_s21, 3  ;;  %p3436_p9 = por %p62_p4, %p61_p2 }
  0x56   : > { %p3442_p5 = por %p68_p1, %p67_p7  ;;  %s3800_s12 = smov (%p49_p8, %s3798_s12), 0 }
  0x57   : > { %3772 = sst [smem:[#allocation27_spill]] %s3800_s12  ;;  %p3448_p11 = por %p369_p10, %p61_p2 }
  0x58   : > { %p375_p12 = scmp.eq.s32.totalorder %s2362_s25, 3  ;;  %s51_s24 = ssub.s32 %s3224_s19, %s3800_s12 }
  0x59   : > { %p2713_p13 = scmp.lt.s32.totalorder %s3228_s20, 4  ;;  %p52_p0 = scmp.eq.s32.totalorder %s51_s24, 0 }
  0x5a   : > { %p3455_p6 = por %p375_p12, %p67_p7  ;;  %s3460_s2 = sand.u32 1, %s3208_s15  }
  0x5b   : > { %s2370_s23 = sshll.u32 %s3224_s19, 7  ;;  %s2369_s8 = sshll.u32 %s3460_s2, 3 }
  0x5c   : > { %s3774_s26 = scalar_select %p3455_p6, 1, 0 }
  0x5d   : > { %s3464_s4 = scalar_select %p52_p0, %s3208_s15, %s54_s27  }
  0x5e   : > { %3775 = sst [smem:[#allocation28_spill]] %s3774_s26  ;;  %s475_s25 = scalar_lea.vmem [#allocation3], %s2369_s8 }
  0x5f   : > { %3776 = sst [smem:[#allocation29_spill]] %s3464_s4  ;;  %s482_s12 = sshll.u32 %s475_s25, 4  ;;  %s483_s12 = int_to_ptr.vmem [resolvable:$true] %s482_s12 }
  0x60   : > { %s3777_s0 = sld [smem:[#allocation30_spill]]  ;;  %p3472_p2 = pnand %p2713_p13, %p3436_p9 }
  0x61   : > { %s489_s26 = sand.u32 1, %s3228_s20   ;;  %s472_s29 = scalar_lea.sflag [#allocation4], %s3460_s2 }
  0x62   : > { %p3062_p4 = pneg %p3472_p2  ;;  %s3073_s27 = scalar_lea.vmem %s483_s12, 128 }
  0x63   : > { %p3074_p7 = scmp.ne.s32.totalorder %s483_s12, %s3073_s27  ;;  %s3240_s8 = smov [#allocation3]  }
  0x64   : > { %s3078_s10 = sshll.u32 %s3240_s8, 4  ;;  %s3079_s10 = int_to_ptr.vmem [resolvable:$false] %s3078_s10 }
  0x65   : > { %p3076_p8 = pnand %p3074_p7, %p3062_p4  ;;  %s3080_s28 = scalar_lea.vmem %s3079_s10, 256 }
  0x66   : > { %s480_s18 = scalar_lea.hbm %s3777_s0, %s2370_s23  ;;  %p3081_p9 = scmp.lt.s32.totalorder %s483_s12, %s3079_s10 }
  0x67   : > { %p3077_p10 = pneg %p3076_p8  ;;  %p3082_p12 = scmp.lt.s32.totalorder %s3080_s28, %s3073_s27 }
  0x69   : > { %p3083_p13 = por %p3082_p12, %p3081_p9 }
  0x6b   : > { %p3084_p0 = pnand %p3083_p13, %p3077_p10 }
  0x6d   : > { %3087 = shalt.err (!%p3084_p0)
}
  0x6e   : > { %2701 = dma.hbm_to_vmem [thread:$0]  (!%p3472_p2), %s480_s18, 128, %s483_s12, %s472_s29  }
  0x6f   : > { %s2371_s17 = sshll.u32 %s3224_s19, 4  ;;  %s492_s4 = scalar_lea.vmem [#allocation6], %s3460_s2 }
  0x70   : > { %s497_s0 = scalar_lea.hbm %s3726_s1, %s2371_s17  ;;  %s499_s8 = sshll.u32 %s492_s4, 4  ;;  %s500_s8 = int_to_ptr.vmem [resolvable:$true] %s499_s8 }
  0x71   : > { %s490_s15 = scalar_lea.sflag [#allocation7], %s489_s26  ;;  %s3101_s10 = scalar_lea.vmem %s500_s8, 16 }
  0x72   : > { %p3102_p7 = scmp.ne.s32.totalorder %s500_s8, %s3101_s10  ;;  %s3241_s27 = smov [#allocation6]  }
  0x73   : > { %s3106_s28 = sshll.u32 %s3241_s27, 4  ;;  %s3107_s28 = int_to_ptr.vmem [resolvable:$false] %s3106_s28 }
  0x74   : > { %p3104_p8 = pnand %p3102_p7, %p3062_p4  ;;  %s3108_s20 = scalar_lea.vmem %s3107_s28, 32 }
  0x75   : > { %p3109_p9 = scmp.lt.s32.totalorder %s500_s8, %s3107_s28  ;;  %p3110_p12 = scmp.lt.s32.totalorder %s3108_s20, %s3101_s10 }
  0x76   : > { %p3105_p10 = pneg %p3104_p8 }
  0x77   : > { %p3111_p13 = por %p3110_p12, %p3109_p9 }
  0x79   : > { %p3112_p0 = pnand %p3111_p13, %p3105_p10 }
  0x7b   : > { %3115 = shalt.err (!%p3112_p0)
}
  0x7c   : > { %2704 = dma.hbm_to_vmem [thread:$0]  (!%p3472_p2), %s497_s0, 16, %s500_s8, %s490_s15  }
  0x7d   : > { %508 = sbr.rel (%p3371_p3) target bundleno = 2456 (0x998), region = 76  ;;  %s3498_s4 = sand.u32 (!%p3371_p3), 1, %s3204_s30  }
  0x7e   : > { %s2373_s29 = sshll.u32 (!%p3371_p3), %s3498_s4, 3  ;;  %s511_s18 = scalar_lea.sflag (!%p3371_p3), [#allocation4], %s3498_s4 }
  0x7f   : > { %s514_s12 = scalar_lea.vmem (!%p3371_p3), [#allocation3], %s2373_s29 }
  0x82   : > { %3175 = dma.done.wait (%p3442_p5), %s511_s18, 128  }
  0x83   : > { %3177 = vsyncadd (%p3442_p5), %s511_s18, 4294967168  ;;  %s519_s0 = sand.u32 1, %s3366_s21   ;;  %s522_s20 = scalar_lea.vmem [#allocation6], %s3498_s4 }
  0x84   : > { %s520_s15 = scalar_lea.sflag [#allocation7], %s519_s0 }
  0x85   : > { %3179 = dma.done.wait (%p3442_p5), %s520_s15, 16  }
  0x86   : > { %3181 = vsyncadd (%p3442_p5), %s520_s15, 4294967280 }
  0x87   : > { %3183 = dma.done.wait (%p68_p1), [#allocation7], 3072  }
  0x88   : > { %3185 = vsyncadd (%p68_p1), [#allocation7], 4294964224 }
  0x89   : > { %3187 = dma.done.wait (%p68_p1), [#allocation10], 5120  }
  0x8a   : > { %3189 = vsyncadd (%p68_p1), [#allocation10], 4294962176 }
  0x8b   : > { %3191 = dma.done.wait (%p68_p1), [#allocation13], 4096  }
  0x8c   : > { %3193 = vsyncadd (%p68_p1), [#allocation13], 4294963200  ;;  %s3524_s22 = scalar_lea.vmem [#allocation14], %s2373_s29  ;;  %p2379_p3 = scmp.ne.s32.totalorder %s3212_s16, 0 }
  0x8e   : > { %591 = sbr.rel (%p2379_p3) target bundleno = 160 (0xa0), region = 104 }
  0x93   : > { %v592_v0 = vld [vmem:[%s514_s12] sm:$0xff]  ;;  %v594_v1 = vlaneseq  ;;  %v2381_v4 = vld [vmem:[%s522_s20] ss:$0 sm:$0xff]  ;;  %v3242_v5 = vmov 0.0   ;;  %vm611_vm1 = vcmask 64512  }
  0x94   : > { %593 = vst [vmem:[%s3524_s22] sm:$0xff] %v592_v0 }
  0x95   : > { %v595_v2 = vshrl.u32 %v594_v1, 7  ;;  %v597_v3 = vand.u32 127, %v594_v1 }
  0x97   : > { %vm598_vm0 = vcmp.ge.s32.totalorder %v595_v2, %v597_v3 }
  0x98   : > { %v2380_v6 = vsel %vm598_vm0, 1.0, %v3242_v5 }
  0x99   : > { %v608_v7 = vmul.f32 %v2381_v4, %v2380_v6 }
  0x9b   : > { %v2382_v8 = vadd.f32 -1.0, %v608_v7 }
  0x9d   : > { %v610_v9 = vmul.f32 1e+09, %v2382_v8 }
  0x9f   : > { %612 = vst.msk [vmem:[#allocation2] sm:$0xff] %vm611_vm1, %v610_v9 }
  0xa0 PF: > { %v2800_v10 = vld [vmem:[#allocation8 + $0xac] ss:$12 sps:$4 sm:$0xff]   ;;  %v2802_v11 = vld [vmem:[#allocation8 + $0xa8] ss:$12 sps:$4 sm:$0xff]   ;;  %v3243_v12 = vmov 0   ;;  %v3244_v13 = vmov 0.0   ;;  %v649_v38 = vlaneseq }
  0xa1   : > { %824 = vmatprep.mubr.bf16.mxu0 %v3243_v12  ;;  %2575 = vmatprep.subr.bf16.mxu1 %v3244_v13  ;;  %v2803_v14 = vld [vmem:[#allocation8 + $0x94] ss:$12 sps:$4 sm:$0xff]   ;;  %v2805_v15 = vld [vmem:[#allocation8 + $0x90] ss:$12 sps:$4 sm:$0xff]   ;;  %v2808_v17 = vld [vmem:[#allocation8 + $0x78] ss:$12 sps:$4 sm:$0xff]  }
  0xa2   : > { %792 = vmatprep.subr.bf16.mxu0 %v2800_v10  ;;  %v2806_v16 = vld [vmem:[#allocation8 + $0x7c] ss:$12 sps:$4 sm:$0xff]   ;;  %v2809_v18 = vld [vmem:[#allocation8 + $0x64] ss:$12 sps:$4 sm:$0xff]   ;;  %v2811_v19 = vld [vmem:[#allocation8 + $0x60] ss:$12 sps:$4 sm:$0xff]  }
  0xa3   : > { %793 = vmatpush1.bf16.msra.mxu0 %v2802_v11  ;;  %v2824_v20 = vld [vmem:[#allocation8 + $0xb0] ss:$12 sps:$4 sm:$0xff]   ;;  %v2812_v21 = vld [vmem:[#allocation8 + $0x4c] ss:$12 sps:$4 sm:$0xff]   ;;  %v2814_v23 = vld [vmem:[#allocation8 + $0x48] ss:$12 sps:$4 sm:$0xff]  }
  0xa4   : > { %794 = vmatprep.subr.bf16.mxu0 %v2803_v14  ;;  %2576 = vmatpush3.bf16.msra.mxu1 %v2824_v20  ;;  %v2825_v22 = vld [vmem:[#allocation8 + $0x98] ss:$12 sps:$4 sm:$0xff]   ;;  %v2815_v24 = vld [vmem:[#allocation8 + $0x34] ss:$12 sps:$4 sm:$0xff]   ;;  %v2817_v25 = vld [vmem:[#allocation8 + $0x30] ss:$12 sps:$4 sm:$0xff]  }
  0xa5   : > { %2577 = vmatprep.subr.bf16.mxu1 %v3244_v13  ;;  %v2826_v26 = vld [vmem:[#allocation8 + $0x80] ss:$12 sps:$4 sm:$0xff]   ;;  %v2818_v27 = vld [vmem:[#allocation8 + $0x1c] ss:$12 sps:$4 sm:$0xff]   ;;  %v2820_v29 = vld [vmem:[#allocation8 + $0x18] ss:$12 sps:$4 sm:$0xff]  }
  0xa6   : > { %v2827_v28 = vld [vmem:[#allocation8 + $0x68] ss:$12 sps:$4 sm:$0xff]   ;;  %v2821_v30 = vld [vmem:[#allocation8 + $0x4] ss:$12 sps:$4 sm:$0xff]   ;;  %v2823_v32 = vld [vmem:[#allocation8] ss:$12 sps:$4 sm:$0xff]  }
  0xa7   : > { %795 = vmatpush1.bf16.msra.mxu0 %v2805_v15  ;;  %v2828_v31 = vld [vmem:[#allocation8 + $0x50] ss:$12 sps:$4 sm:$0xff]   ;;  %v3534_v33 = vld [vmem:[%s3524_s22] sm:$0xff]  ;;  %vm3245_vm2 = vmmov 0   ;;  %v3550_v39 = vshrl.u32 %v649_v38, 7  ;;  %vm898_vm3 = vcmask 261120  }
  0xa8   : > { %796 = vmatprep.subr.bf16.mxu0 %v2806_v16  ;;  %2578 = vmatpush3.bf16.msra.mxu1 %v2825_v22  ;;  %v2829_v34 = vld [vmem:[#allocation8 + $0x38] ss:$12 sps:$4 sm:$0xff]   ;;  %v614_v35 = vpack.c.bf16 %v3534_v33, %v3534_v33  ;;  %v2830_v36 = vld [vmem:[#allocation8 + $0x20] ss:$12 sps:$4 sm:$0xff]   ;;  %v2831_v37 = vld [vmem:[#allocation8 + $0x8] ss:$12 sps:$4 sm:$0xff]  }
  0xa9   : > { %2579 = vmatprep.subr.bf16.mxu1 %v3244_v13  ;;  %2591 = vmatprep.mubr.msk.bf16.mxu1 %vm3245_vm2, %v3244_v13  ;;  %v655_v40 = vsub.s32 1, %v3550_v39  ;;  %v651_v41 = vsub.s32 0, %v3550_v39  ;;  %v647_v42 = vld [vmem:[%s3728_s3] sm:$0x7]  ;;  %s3246_s13 = smov 64   ;;  %s3247_s26 = smov 96  }
  0xaa   : > { %s3248_s2 = smov 32   ;;  %v659_v54 = vsub.s32 2, %v3550_v39  ;;  %vm1147_vm4 = vcmask 1043456   ;;  %v897_v8 = vld [vmem:[#allocation2] sm:$0xff]  ;;  %vm1083_vm5 = vcmask 64512   ;;  %vm1354_vm6 = vcmask 523264  }
  0xab   : > { %797 = vmatpush1.bf16.msra.mxu0 %v2808_v17  ;;  %v656_v43 = vrot.slane %v647_v42, %v655_v40  ;;  %v652_v45 = vrot.slane %v647_v42, %v651_v41  ;;  %vm1356_vm7 = vcmask 785408   ;;  %s3779_s12 = sld [smem:[#allocation23_spill]]  ;;  %s2209_s8 = scalar_lea.sflag [#allocation5], %s3498_s4 }
  0xac   : > { %798 = vmatprep.subr.bf16.mxu0 %v2809_v18  ;;  %2580 = vmatpush3.bf16.msra.mxu1 %v2826_v26  ;;  %v660_v55 = vrot.slane %v647_v42, %v659_v54  ;;  %s3780_s20 = sld [smem:[#allocation35_spill]]  ;;  %s3249_s27 = smov [#allocation14]  }
  0xad   : > { %2581 = vmatprep.subr.bf16.mxu1 %v3244_v13  ;;  %s3782_s23 = sld [smem:[#allocation37_spill]]  ;;  %s3120_s28 = sshll.u32 %s3249_s27, 4  ;;  %s3121_s28 = int_to_ptr.vmem [resolvable:$false] %s3120_s28 }
  0xae   : > { %s3122_s29 = scalar_lea.vmem %s3121_s28, 256 }
  0xaf   : > { %799 = vmatpush1.bf16.msra.mxu0 %v2811_v19 }
  0xb0   : > { %800 = vmatprep.subr.bf16.mxu0 %v2812_v21  ;;  %2582 = vmatpush3.bf16.msra.mxu1 %v2827_v28 }
  0xb1   : > { %2583 = vmatprep.subr.bf16.mxu1 %v3244_v13 }
  0xb3   : > { %801 = vmatpush1.bf16.msra.mxu0 %v2814_v23 }
  0xb4   : > { %802 = vmatprep.subr.bf16.mxu0 %v2815_v24  ;;  %2584 = vmatpush3.bf16.msra.mxu1 %v2828_v31 }
  0xb5   : > { %2585 = vmatprep.subr.bf16.mxu1 %v3244_v13 }
  0xb7   : > { %803 = vmatpush1.bf16.msra.mxu0 %v2817_v25 }
  0xb8   : > { %804 = vmatprep.subr.bf16.mxu0 %v2818_v27  ;;  %2586 = vmatpush3.bf16.msra.mxu1 %v2829_v34 }
  0xb9   : > { %2587 = vmatprep.subr.bf16.mxu1 %v3244_v13 }
  0xbb   : > { %805 = vmatpush1.bf16.msra.mxu0 %v2820_v29 }
  0xbc   : > { %806 = vmatprep.subr.bf16.mxu0 %v2821_v30  ;;  %2588 = vmatpush3.bf16.msra.mxu1 %v2830_v36 }
  0xbd   : > { %2589 = vmatprep.subr.bf16.mxu1 %v3244_v13 }
  0xbf   : > { %807 = vmatpush1.bf16.msra.mxu0 %v2823_v32 }
  0xc0   : > { %2619 = vmatprep.subr.bf16.mxu0 %v3244_v13  ;;  %2590 = vmatpush3.bf16.msra.mxu1 %v2831_v37 }
  0xc1   : > { %2595 = vmatprep.subr.bf16.mxu1 %v3244_v13 }
  0xc2   : > { %825 = vmatmul.mubr.bf16.vlgmr.msra.gmra.mxu0 %v614_v35 }
  0xc3   : > { %2621 = vmatprep.mubr.msk.bf16.mxu0 %vm3245_vm2, %v3244_v13  ;;  %2592 = vmatmul.mubr.bf16.vlgmr.msra.gmra.mxu1 %v614_v35 }
  0xc4   : > { %2597 = vmatprep.mubr.msk.bf16.mxu1 %vm3245_vm2, %v3244_v13 }
 0x182   : > { %v826_v44 = vpop.f32.mrf.mxu0 }
 0x183   : > { %v827_v49 = vadd.f32 %v826_v44, %v652_v45  ;;  %v867_v56 = vpop.f32.mrf.mxu1 }
 0x184   : > { %v828_v46 = vpop.f32.mrf.mxu0  ;;  %v868_v57 = vadd.f32 %v867_v56, %v660_v55 }
 0x185   : > { %v829_v47 = vadd.f32 %v828_v46, %v656_v43  ;;  %v873_v53 = vpack.c.bf16 %v827_v49, %v827_v49  ;;  %v2593_v58 = vpop.f32.mrf.mxu1 }
 0x186   : > { %v830_v48 = vpop.f32.mrf.mxu0  ;;  %v3575_v59 = vpack.c.bf16 %v868_v57, %v868_v57 }
 0x187   : > { %v874_v50 = vpack.c.bf16 %v829_v47, %v829_v47  ;;  %v870_v60 = vpop.f32.mrf.mxu1 }
 0x188   : > { %v831_v51 = vpop.f32.mrf.mxu0  ;;  %v1149_v62 = vsel %vm1147_vm4, %v3575_v59, 0 }
 0x189   : > { %886 = vrot.lane.b32.xlu1 %v874_v50, %s3246_s13  ;;  %884 = vrot.lane.b32.xlu0 %v874_v50, %s3247_s26  ;;  %v903_v52 = vsel %vm898_vm3, %v874_v50, 0  ;;  %v2594_v61 = vpop.f32.mrf.mxu1 }
 0x18a   : > { %2596 = vmatpush3.bf16.xpose.msra.mxu1 %v903_v52  ;;  %2620 = vmatpush3.bf16.msra.mxu0 %v1149_v62 }
 0x18b   : > { %2601 = vmatprep.subr.bf16.mxu1 %v3244_v13  ;;  %2631 = vmatprep.subr.bf16.mxu0 %v3244_v13 }
 0x18d   : > { %879 = vrot.lane.b32.xlu1 %v873_v53, %s3246_s13  ;;  %877 = vrot.lane.b32.xlu0 %v873_v53, %s3247_s26 }
 0x191   : > { %881 = vrot.lane.b32.xlu1 %v873_v53, %s3248_s2  ;;  %888 = vrot.lane.b32.xlu0 %v874_v50, %s3248_s2 }
 0x192   : > { %2598 = vmatmul.mubr.msk.bf16.vlgmr.msra.gmra.mxu1 %vm898_vm3, %v873_v53 }
 0x193   : > { %2603 = vmatprep.mubr.msk.bf16.mxu1 %vm3245_vm2, %v3244_v13 }
 0x195   : > { %891 = vrot.lane.b32.xlu1 %v3575_v59, %s3247_s26 }
 0x1fb   : > { %v885_v63 = vpop.permute.xlu0 %884  ;;  %v887_v1 = vpop.permute.xlu1 %886 }
 0x1fc   : > { %v949_v0 = vsel %vm898_vm3, %v885_v63, 0  ;;  %v995_v3 = vsel %vm898_vm3, %v887_v1, 0 }
 0x1fd   : > { %2602 = vmatpush3.bf16.xpose.msra.mxu1 %v949_v0 }
 0x1fe   : > { %2607 = vmatprep.subr.bf16.mxu1 %v3244_v13 }
 0x1ff   : > { %v878_v2 = vpop.permute.xlu0 %877  ;;  %v880_v5 = vpop.permute.xlu1 %879 }
 0x203   : > { %v889_v4 = vpop.permute.xlu0 %888  ;;  %v882_v7 = vpop.permute.xlu1 %881 }
 0x204   : > { %2604 = vmatmul.mubr.msk.bf16.vlgmr.msra.gmra.mxu1 %vm898_vm3, %v878_v2  ;;  %v1041_v6 = vsel %vm898_vm3, %v889_v4, 0 }
 0x205   : > { %2608 = vmatpush3.bf16.xpose.msra.mxu1 %v995_v3  ;;  %2609 = vmatprep.mubr.msk.bf16.mxu1 %vm3245_vm2, %v3244_v13 }
 0x206   : > { %2613 = vmatprep.subr.bf16.mxu1 %v3244_v13 }
 0x207   : > { %v892_v17 = vpop.permute.xlu1 %891 }
 0x208   : > { %v1195_v18 = vsel %vm1147_vm4, %v892_v17, 0 }
 0x20c   : > { %2610 = vmatmul.mubr.msk.bf16.vlgmr.msra.gmra.mxu1 %vm898_vm3, %v880_v5 }
 0x20d   : > { %2614 = vmatpush3.bf16.xpose.msra.mxu1 %v1041_v6  ;;  %2615 = vmatprep.mubr.msk.bf16.mxu1 %vm3245_vm2, %v3244_v13 }
 0x20e   : > { %2625 = vmatprep.subr.bf16.mxu1 %v3244_v13 }
 0x214   : > { %2616 = vmatmul.mubr.msk.bf16.vlgmr.msra.gmra.mxu1 %vm898_vm3, %v882_v7 }
 0x215   : > { %2627 = vmatprep.mubr.msk.bf16.mxu1 %vm3245_vm2, %v3244_v13  ;;  %2626 = vmatpush3.bf16.msra.mxu1 %v1195_v18 }
 0x216   : > { %2637 = vmatprep.subr.bf16.mxu1 %v3244_v13 }
 0x252   : > { %v939_v9 = vpop.f32.mrf.mxu1 }
 0x253   : > { %v940_v10 = vadd.f32 %v939_v9, %v897_v8 }
 0x254   : > { %v2599_v11 = vpop.f32.mrf.mxu1 }
 0x255   : > { %v1084_v14 = vsel %vm1083_vm5, %v940_v10, -inf  ;;  %v2833_v11 = vld [vmem:[#allocation9 + $0x30] sm:$0xff]  }
 0x256   : > { %1085 = vmax.xlane.f32.xlu0 %v1084_v14  ;;  %v942_v15 = vpop.f32.mrf.mxu1  ;;  %v2834_v14 = vld [vmem:[#allocation9 + $0x28] sm:$0xff]  }
 0x258   : > { %v2600_v16 = vpop.f32.mrf.mxu1 }
 0x2c4   : > { %v985_v19 = vpop.f32.mrf.mxu1 }
 0x2c5   : > { %v986_v20 = vadd.f32 %v985_v19, %v897_v8 }
 0x2c6   : > { %v2605_v21 = vpop.f32.mrf.mxu1 }
 0x2c7   : > { %v1087_v22 = vsel %vm1083_vm5, %v986_v20, -inf }
 0x2c8   : > { %1088 = vmax.xlane.f32.xlu1 %v1087_v22  ;;  %v988_v23 = vpop.f32.mrf.mxu1 }
 0x2ca   : > { %v2606_v24 = vpop.f32.mrf.mxu1 }
 0x2cc   : > { %v1031_v25 = vpop.f32.mrf.mxu1 }
 0x2cd   : > { %v1032_v26 = vadd.f32 %v1031_v25, %v897_v8 }
 0x2ce   : > { %v2611_v27 = vpop.f32.mrf.mxu1 }
 0x2cf   : > { %v1090_v28 = vsel %vm1083_vm5, %v1032_v26, -inf }
 0x2d0   : > { %1091 = vmax.xlane.f32.xlu0 %v1090_v28  ;;  %v1034_v29 = vpop.f32.mrf.mxu1  ;;  %v2835_v28 = vld [vmem:[#allocation9 + $0x20] sm:$0xff]  }
 0x2d2   : > { %v2612_v30 = vpop.f32.mrf.mxu1 }
 0x2d3   : > { %v2836_v30 = vld [vmem:[#allocation9 + $0x18] sm:$0xff]  }
 0x2d4   : > { %v1077_v31 = vpop.f32.mrf.mxu1 }
 0x2d5   : > { %v1078_v32 = vadd.f32 %v1077_v31, %v897_v8 }
 0x2d6   : > { %v2617_v34 = vpop.f32.mrf.mxu1 }
 0x2d7   : > { %v1093_v35 = vsel %vm1083_vm5, %v1078_v32, -inf }
 0x2d8   : > { %1094 = vmax.xlane.f32.xlu0 %v1093_v35  ;;  %v1080_v36 = vpop.f32.mrf.mxu1  ;;  %v2837_v35 = vld [vmem:[#allocation9 + $0x10] sm:$0xff]  }
 0x2d9   : > { %895 = vrot.lane.b32.xlu1 %v3575_v59, %s3248_s2 }
 0x2da   : > { %v2618_v37 = vpop.f32.mrf.mxu1 }
 0x2df   : > { %v3605_v38 = vpop.xlane.xlu0 %1085 }
 0x2e0   : > { %v1108_v42 = vsub.f32 %v940_v10, %v3605_v38  ;;  %v2832_v10 = vld [vmem:[#allocation9 + $0x38] sm:$0xff]  }
 0x2e2   : > { %v1112_v43 = vmul.f32 1.442695, %v1108_v42 }
 0x2e4   : > { %2920 = vpow2.f32 %v1112_v43  ;;  %v2838_v43 = vld [vmem:[#allocation9 + $0x8] sm:$0xff]  }
 0x2ee   : > { %893 = vrot.lane.b32.xlu0 %v3575_v59, %s3246_s13 }
 0x2f1   : > { %v2921_v44 = vpop.eup %2920 }
 0x2f2   : > { %v1140_v45 = vpack.c.bf16 %v2921_v44, %v2921_v44  ;;  %v1124_v63 = vsel %vm1083_vm5, %v2921_v44, 0.0 }
 0x2f4   : > { %2622 = vmatmul.mubr.msk.bf16.vlgmr.msra.gmra.mxu0 %vm1083_vm5, %v1140_v45 }
 0x2f5   : > { %2633 = vmatprep.mubr.msk.bf16.mxu0 %vm3245_vm2, %v3244_v13 }
 0x351   : > { %v1089_v46 = vpop.xlane.xlu1 %1088 }
 0x352   : > { %v1109_v47 = vsub.f32 %v986_v20, %v1089_v46  ;;  %v1097_v15 = vsub.f32 -inf, %v1089_v46 }
 0x354   : > { %v1114_v48 = vmul.f32 1.442695, %v1109_v47  ;;  %v1102_v16 = vmul.f32 1.442695, %v1097_v15 }
 0x355   : > { %v896_v56 = vpop.permute.xlu1 %895 }
 0x356   : > { %2922 = vpow2.f32 %v1114_v48  ;;  %v1287_v62 = vsel %vm1147_vm4, %v896_v56, 0 }
 0x359   : > { %v1092_v49 = vpop.xlane.xlu0 %1091 }
 0x35a   : > { %v1110_v50 = vsub.f32 %v1032_v26, %v1092_v49  ;;  %v1098_v17 = vsub.f32 -inf, %v1092_v49  ;;  %v2839_v49 = vld [vmem:[#allocation9] sm:$0xff]  }
 0x35c   : > { %v1116_v51 = vmul.f32 1.442695, %v1110_v50  ;;  %v1104_v18 = vmul.f32 1.442695, %v1098_v17 }
 0x35e   : > { %2924 = vpow2.f32 %v1116_v51 }
 0x361   : > { %v1095_v52 = vpop.xlane.xlu0 %1094 }
 0x362   : > { %v1111_v53 = vsub.f32 %v1078_v32, %v1095_v52  ;;  %v1099_v19 = vsub.f32 -inf, %v1095_v52 }
 0x363   : > { %v2923_v55 = vpop.eup %2922 }
 0x364   : > { %v1118_v57 = vmul.f32 1.442695, %v1111_v53  ;;  %v1127_v58 = vsel %vm1083_vm5, %v2923_v55, 0.0  ;;  %v1141_v60 = vpack.c.bf16 %v2923_v55, %v2923_v55  ;;  %v1106_v20 = vmul.f32 1.442695, %v1099_v19 }
 0x365   : > { %v894_v59 = vpop.permute.xlu0 %893  ;;  %1128 = vadd.xlane.f32.xlu1 %v1127_v58 }
 0x366   : > { %v1241_v61 = vsel %vm1147_vm4, %v894_v59, 0  ;;  %2926 = vpow2.f32 %v1118_v57  ;;  %2628 = vmatmul.mubr.msk.bf16.vlgmr.msra.gmra.mxu1 %vm1083_vm5, %v1141_v60 }
 0x367   : > { %2632 = vmatpush3.bf16.msra.mxu0 %v1241_v61  ;;  %2638 = vmatpush3.bf16.msra.mxu1 %v1287_v62  ;;  %2928 = vpow2.f32 %v1102_v16 }
 0x368   : > { %2639 = vmatprep.mubr.msk.bf16.mxu1 %vm3245_vm2, %v3244_v13  ;;  %2643 = vmatprep.subr.bf16.mxu0 %v3244_v13  ;;  %2930 = vpow2.f32 %v1104_v18  ;;  %v2415_v18 = vld [vmem:[%s3730_s5] ss:$0 sm:$0xff] }
 0x369   : > { %1125 = vadd.xlane.f32.xlu1 %v1124_v63  ;;  %2932 = vpow2.f32 %v1106_v20 }
 0x36b   : > { %v2925_v0 = vpop.eup %2924 }
 0x36c   : > { %v1130_v1 = vsel %vm1083_vm5, %v2925_v0, 0.0  ;;  %v1142_v2 = vpack.c.bf16 %v2925_v0, %v2925_v0  ;;  %v1096_v0 = vsub.f32 -inf, %v3605_v38 }
 0x36d   : > { %1131 = vadd.xlane.f32.xlu0 %v1130_v1 }
 0x36e   : > { %2634 = vmatmul.mubr.msk.bf16.vlgmr.msra.gmra.mxu0 %vm1083_vm5, %v1142_v2  ;;  %v1100_v1 = vmul.f32 1.442695, %v1096_v0 }
 0x36f   : > { %2659 = vmatprep.mubr.msk.bf16.mxu0 %vm3245_vm2, %v3244_v13  ;;  %2644 = vmatpush3.bf16.msra.mxu0 %v2832_v10 }
 0x370   : > { %2645 = vmatprep.subr.bf16.mxu0 %v3244_v13 }
 0x373   : > { %v2927_v3 = vpop.eup %2926  ;;  %2646 = vmatpush3.bf16.msra.mxu0 %v2833_v11 }
 0x374   : > { %v1133_v4 = vsel %vm1083_vm5, %v2927_v3, 0.0  ;;  %v1143_v5 = vpack.c.bf16 %v2927_v3, %v2927_v3  ;;  %2647 = vmatprep.subr.bf16.mxu0 %v3244_v13  ;;  %v2929_v21 = vpop.eup %2928 }
 0x375   : > { %1134 = vadd.xlane.f32.xlu0 %v1133_v4  ;;  %v1121_v23 = vmul.f32 0.0, %v2929_v21  ;;  %v2931_v25 = vpop.eup %2930 }
 0x376   : > { %2640 = vmatmul.mubr.msk.bf16.vlgmr.msra.gmra.mxu1 %vm1083_vm5, %v1143_v5  ;;  %v1122_v27 = vmul.f32 0.0, %v2931_v25  ;;  %v2933_v31 = vpop.eup %2932  ;;  %v2842_v25 = vld [vmem:[#allocation11 + $0xe4] ss:$16 sps:$4 sm:$0xff]  }
 0x377   : > { %1746 = vmatprep.mubr.bf16.mxu1 %v3243_v12  ;;  %2648 = vmatpush3.bf16.msra.mxu0 %v2834_v14  ;;  %v1123_v34 = vmul.f32 0.0, %v2933_v31 }
 0x378   : > { %2649 = vmatprep.subr.bf16.mxu0 %v3244_v13  ;;  %1714 = vmatprep.subr.bf16.mxu1 %v2842_v25  ;;  %v2903_v25 = vld [vmem:[#allocation12 + $0xa0] sm:$0xff]  }
 0x37b   : > { %2650 = vmatpush3.bf16.msra.mxu0 %v2835_v28  ;;  %v2848_v28 = vld [vmem:[#allocation11 + $0xc4] ss:$16 sps:$4 sm:$0xff]  }
 0x37c   : > { %2651 = vmatprep.subr.bf16.mxu0 %v3244_v13 }
 0x37f   : > { %2652 = vmatpush3.bf16.msra.mxu0 %v2836_v30  ;;  %v2849_v30 = vld [vmem:[#allocation11 + $0xc8] ss:$16 sps:$4 sm:$0xff]  }
 0x380   : > { %2653 = vmatprep.subr.bf16.mxu0 %v3244_v13 }
 0x383   : > { %2654 = vmatpush3.bf16.msra.mxu0 %v2837_v35  ;;  %v2854_v35 = vld [vmem:[#allocation11 + $0xa4] ss:$16 sps:$4 sm:$0xff]  }
 0x384   : > { %2655 = vmatprep.subr.bf16.mxu0 %v3244_v13 }
 0x387   : > { %2656 = vmatpush3.bf16.msra.mxu0 %v2838_v43  ;;  %v2858_v43 = vld [vmem:[#allocation11 + $0x80] ss:$16 sps:$4 sm:$0xff]  }
 0x388   : > { %2657 = vmatprep.subr.bf16.mxu0 %v3244_v13 }
 0x38b   : > { %2658 = vmatpush3.bf16.msra.mxu0 %v2839_v49  ;;  %v2864_v49 = vld [vmem:[#allocation11 + $0x60] ss:$16 sps:$4 sm:$0xff]  }
 0x3b4   : > { %v3628_v6 = vpop.f32.mrf.mxu0 }
 0x3b6   : > { %v2623_v7 = vpop.f32.mrf.mxu0 }
 0x3b8   : > { %v1188_v8 = vpop.f32.mrf.mxu0 }
 0x3ba   : > { %v2624_v9 = vpop.f32.mrf.mxu0 }
 0x3ee   : > { %v1129_v22 = vpop.xlane.xlu1 %1128 }
 0x3ef   : > { %v1137_v24 = vadd.f32 %v1129_v22, %v1121_v23 }
 0x3f1   : > { %2934 = vrcp.f32 %v1137_v24  ;;  %v2840_v24 = vld [vmem:[#allocation11 + $0xe0] ss:$16 sps:$4 sm:$0xff]  }
 0x3f2   : > { %v1126_v3 = vpop.xlane.xlu1 %1125  ;;  %1715 = vmatpush1.bf16.msra.mxu1 %v2840_v24  ;;  %v2902_v24 = vld [vmem:[#allocation12 + $0x20] sm:$0xff]  }
 0x3f3   : > { %1716 = vmatprep.subr.bf16.mxu1 %v2848_v28  ;;  %v2906_v28 = vld [vmem:[#allocation12 + $0x18] sm:$0xff]  }
 0x3f6   : > { %v1132_v26 = vpop.xlane.xlu0 %1131 }
 0x3f7   : > { %v1138_v29 = vadd.f32 %v1132_v26, %v1122_v27  ;;  %v2843_v26 = vld [vmem:[#allocation11 + $0xe8] ss:$16 sps:$4 sm:$0xff]  }
 0x3f9   : > { %2936 = vrcp.f32 %v1138_v29  ;;  %v2851_v29 = vld [vmem:[#allocation11 + $0xcc] ss:$16 sps:$4 sm:$0xff]  }
 0x3fe   : > { %v1135_v32 = vpop.xlane.xlu0 %1134  ;;  %v2935_v44 = vpop.eup %2934 }
 0x3ff   : > { %v1139_v37 = vadd.f32 %v1135_v32, %v1123_v34 }
 0x401   : > { %2938 = vrcp.f32 %v1139_v37  ;;  %v2852_v37 = vld [vmem:[#allocation11 + $0xa0] ss:$16 sps:$4 sm:$0xff]  }
 0x402   : > { %2940 = vpow2.f32 %v1100_v1 }
 0x406   : > { %v2937_v52 = vpop.eup %2936 }
 0x40e   : > { %v2939_v60 = vpop.eup %2938 }
 0x40f   : > { %v2941_v2 = vpop.eup %2940 }
 0x410   : > { %v1120_v4 = vmul.f32 0.0, %v2941_v2 }
 0x412   : > { %v1136_v5 = vadd.f32 %v1126_v3, %v1120_v4  ;;  %v1329_v8 = vadd.f32 %v3628_v6, %v1120_v4  ;;  %v2424_v3 = vld [vmem:[%s3731_s6] ss:$0 sm:$0xff] }
 0x414   : > { %2942 = vrcp.f32 %v1136_v5  ;;  %v2425_v5 = vld [vmem:[%s3732_s7] ss:$0 sm:$0xff] }
 0x421   : > { %v2943_v7 = vpop.eup %2942 }
 0x422   : > { %v1337_v11 = vmul.f32 %v2943_v7, %v1329_v8 }
 0x426   : > { %v1231_v36 = vpop.f32.mrf.mxu1 }
 0x427   : > { %v1330_v42 = vadd.f32 %v1231_v36, %v1121_v23  ;;  %v2857_v36 = vld [vmem:[#allocation11 + $0xac] ss:$16 sps:$4 sm:$0xff]  }
 0x428   : > { %v2629_v45 = vpop.f32.mrf.mxu1 }
 0x429   : > { %v1338_v46 = vmul.f32 %v2935_v44, %v1330_v42  ;;  %v2855_v42 = vld [vmem:[#allocation11 + $0xa8] ss:$16 sps:$4 sm:$0xff]   ;;  %v2860_v44 = vld [vmem:[#allocation11 + $0x84] ss:$16 sps:$4 sm:$0xff]  }
 0x42a   : > { %v1234_v47 = vpop.f32.mrf.mxu1  ;;  %v2861_v45 = vld [vmem:[#allocation11 + $0x88] ss:$16 sps:$4 sm:$0xff]  }
 0x42b   : > { %1342 = vrot.lane.b32.xlu0 %v1338_v46, %s3248_s2  ;;  %v2863_v46 = vld [vmem:[#allocation11 + $0x8c] ss:$16 sps:$4 sm:$0xff]   ;;  %v2866_v47 = vld [vmem:[#allocation11 + $0x64] ss:$16 sps:$4 sm:$0xff]   ;;  %s2222_s2 = sshll.u32 %s3524_s22, 4  ;;  %s2223_s2 = int_to_ptr.vmem [resolvable:$true] %s2222_s2 }
 0x42c   : > { %v2630_v48 = vpop.f32.mrf.mxu1  ;;  %s3116_s10 = scalar_lea.vmem %s2223_s2, 128  ;;  %p3123_p4 = scmp.lt.s32.totalorder %s2223_s2, %s3121_s28 }
 0x42d   : > { %v2869_v48 = vld [vmem:[#allocation11 + $0x6c] ss:$16 sps:$4 sm:$0xff]   ;;  %p3117_p1 = scmp.ne.s32.totalorder %s2223_s2, %s3116_s10  ;;  %p3124_p7 = scmp.lt.s32.totalorder %s3122_s29, %s3116_s10 }
 0x42e   : > { %v1277_v50 = vpop.f32.mrf.mxu0 }
 0x42f   : > { %v1331_v51 = vadd.f32 %v1277_v50, %v1122_v27  ;;  %v2845_v27 = vld [vmem:[#allocation11 + $0xec] ss:$16 sps:$4 sm:$0xff]   ;;  %v2867_v50 = vld [vmem:[#allocation11 + $0x68] ss:$16 sps:$4 sm:$0xff]   ;;  %p3118_p5 = pnand %p3117_p1, %p3448_p11  ;;  %p3125_p8 = por %p3124_p7, %p3123_p4 }
 0x430   : > { %v2635_v53 = vpop.f32.mrf.mxu0  ;;  %1755 = vmatprep.subr.bf16.mxu0 %v2845_v27  ;;  %v2905_v27 = vld [vmem:[#allocation12 + $0xd8] sm:$0xff]  }
 0x431   : > { %v1339_v55 = vmul.f32 %v2937_v52, %v1331_v51  ;;  %v2872_v51 = vld [vmem:[#allocation11 + $0x44] ss:$16 sps:$4 sm:$0xff]   ;;  %v2875_v52 = vld [vmem:[#allocation11 + $0x4c] ss:$16 sps:$4 sm:$0xff]   ;;  %v2870_v53 = vld [vmem:[#allocation11 + $0x40] ss:$16 sps:$4 sm:$0xff]   ;;  %p3119_p2 = pneg %p3118_p5 }
 0x432   : > { %v1280_v56 = vpop.f32.mrf.mxu0 }
 0x433   : > { %1346 = vrot.lane.b32.xlu1 %v1339_v55, %s3246_s13  ;;  %v2873_v55 = vld [vmem:[#allocation11 + $0x48] ss:$16 sps:$4 sm:$0xff]   ;;  %v2878_v56 = vld [vmem:[#allocation11 + $0x24] ss:$16 sps:$4 sm:$0xff]   ;;  %s3781_s13 = sld [smem:[#allocation36_spill]]  ;;  %p3126_p10 = pnand %p3125_p8, %p3119_p2 }
 0x434   : > { %v2636_v57 = vpop.f32.mrf.mxu0 }
 0x435   : > { %v2881_v57 = vld [vmem:[#allocation11 + $0x2c] ss:$16 sps:$4 sm:$0xff]  }
 0x436   : > { %v1323_v58 = vpop.f32.mrf.mxu1 }
 0x437   : > { %v1332_v59 = vadd.f32 %v1323_v58, %v1123_v34  ;;  %v2876_v58 = vld [vmem:[#allocation11 + $0x20] ss:$16 sps:$4 sm:$0xff]  }
 0x438   : > { %v2641_v61 = vpop.f32.mrf.mxu1 }
 0x439   : > { %v1340_v62 = vmul.f32 %v2939_v60, %v1332_v59  ;;  %v2879_v59 = vld [vmem:[#allocation11 + $0x28] ss:$16 sps:$4 sm:$0xff]   ;;  %v2884_v60 = vld [vmem:[#allocation11 + $0x4] ss:$16 sps:$4 sm:$0xff]   ;;  %v2887_v61 = vld [vmem:[#allocation11 + $0xc] ss:$16 sps:$4 sm:$0xff]  }
 0x43a   : > { %v1326_v63 = vpop.f32.mrf.mxu1 }
 0x43b   : > { %1350 = vrot.lane.b32.xlu1 %v1340_v62, %s3247_s26  ;;  %v2882_v62 = vld [vmem:[#allocation11] ss:$16 sps:$4 sm:$0xff]   ;;  %v2885_v63 = vld [vmem:[#allocation11 + $0x8] ss:$16 sps:$4 sm:$0xff]   ;;  %s2494_s26 = sshll.u32 %s3779_s12, 7 }
 0x43c   : > { %v2642_v13 = vpop.f32.mrf.mxu1  ;;  %s2220_s25 = scalar_lea.hbm %s3782_s23, %s2494_s26 }
 0x49d   : > { %v1343_v9 = vpop.permute.xlu0 %1342 }
 0x49e   : > { %v1353_v14 = vsel %vm898_vm3, %v1337_v11, %v1343_v9  ;;  %v2889_v11 = vld [vmem:[#allocation12 + $0xf8] sm:$0xff]  }
 0x4a5   : > { %v1347_v10 = vpop.permute.xlu1 %1346 }
 0x4a6   : > { %v1355_v15 = vsel %vm1354_vm6, %v1353_v14, %v1347_v10  ;;  %v2888_v10 = vld [vmem:[#allocation12 + $0x78] sm:$0xff]  }
 0x4a7   : > { %v2890_v14 = vld [vmem:[#allocation12 + $0x38] sm:$0xff]  }
 0x4ad   : > { %v1351_v16 = vpop.permute.xlu1 %1350 }
 0x4ae   : > { %v1357_v38 = vsel %vm1356_vm7, %v1355_v15, %v1351_v16  ;;  %v2891_v15 = vld [vmem:[#allocation12 + $0xb8] sm:$0xff]   ;;  %v2892_v16 = vld [vmem:[#allocation12 + $0x70] sm:$0xff]  }
 0x4af   : > { %v1358_v17 = vpack.c.bf16 %v1357_v38, %v1357_v38  ;;  %v2893_v38 = vld [vmem:[#allocation12 + $0xf0] sm:$0xff]  }
 0x4b1   : > { %2660 = vmatmul.mubr.bf16.vlgmr.msra.gmra.mxu0 %v1358_v17  ;;  %v2894_v17 = vld [vmem:[#allocation12 + $0x30] sm:$0xff]  }
 0x4b2   : > { %1787 = vmatprep.mubr.bf16.mxu0 %v3243_v12  ;;  %v2846_v12 = vld [vmem:[#allocation11 + $0xc0] ss:$16 sps:$4 sm:$0xff]   ;;  %1756 = vmatpush1.bf16.msra.mxu0 %v2843_v26  ;;  %v2904_v26 = vld [vmem:[#allocation12 + $0x58] sm:$0xff]  }
 0x4b3   : > { %1757 = vmatprep.subr.bf16.mxu0 %v2851_v29  ;;  %1717 = vmatpush1.bf16.msra.mxu1 %v2846_v12  ;;  %v2907_v29 = vld [vmem:[#allocation12 + $0x98] sm:$0xff]   ;;  %v2908_v12 = vld [vmem:[#allocation12 + $0x50] sm:$0xff]  }
 0x4b4   : > { %1718 = vmatprep.subr.bf16.mxu1 %v2854_v35  ;;  %v2914_v35 = vld [vmem:[#allocation12 + $0x8] sm:$0xff]  }
 0x4b6   : > { %1758 = vmatpush1.bf16.msra.mxu0 %v2849_v30  ;;  %v2909_v30 = vld [vmem:[#allocation12 + $0xd0] sm:$0xff]  }
 0x4b7   : > { %1759 = vmatprep.subr.bf16.mxu0 %v2857_v36  ;;  %1719 = vmatpush1.bf16.msra.mxu1 %v2852_v37  ;;  %v2915_v36 = vld [vmem:[#allocation12 + $0x88] sm:$0xff]   ;;  %v2916_v37 = vld [vmem:[#allocation12 + $0x40] sm:$0xff]  }
 0x4b8   : > { %1720 = vmatprep.subr.bf16.mxu1 %v2860_v44  ;;  %v2919_v44 = vld [vmem:[#allocation12 + $0x80] sm:$0xff]  }
 0x4ba   : > { %1760 = vmatpush1.bf16.msra.mxu0 %v2855_v42  ;;  %v2917_v42 = vld [vmem:[#allocation12 + $0xc0] sm:$0xff]  }
 0x4bb   : > { %1761 = vmatprep.subr.bf16.mxu0 %v2863_v46  ;;  %1721 = vmatpush1.bf16.msra.mxu1 %v2858_v43  ;;  %v2918_v43 = vld [vmem:[#allocation12] sm:$0xff]   ;;  %v1548_v46 = vsub.s32 3, %v3550_v39 }
 0x4bc   : > { %1722 = vmatprep.subr.bf16.mxu1 %v2866_v47 }
 0x4be   : > { %1762 = vmatpush1.bf16.msra.mxu0 %v2861_v45  ;;  %v1532_v45 = vld [vmem:[%s3734_s9] sm:$0xf] }
 0x4bf   : > { %1763 = vmatprep.subr.bf16.mxu0 %v2869_v48  ;;  %1723 = vmatpush1.bf16.msra.mxu1 %v2864_v49  ;;  %v1537_v47 = vrot.slane %v1532_v45, %v651_v41  ;;  %v1545_v48 = vrot.slane %v1532_v45, %v659_v54 }
 0x4c0   : > { %1724 = vmatprep.subr.bf16.mxu1 %v2872_v51  ;;  %v1541_v51 = vrot.slane %v1532_v45, %v655_v40 }
 0x4c2   : > { %1764 = vmatpush1.bf16.msra.mxu0 %v2867_v50 }
 0x4c3   : > { %1765 = vmatprep.subr.bf16.mxu0 %v2875_v52  ;;  %1725 = vmatpush1.bf16.msra.mxu1 %v2870_v53  ;;  %v1549_v52 = vrot.slane %v1532_v45, %v1548_v46 }
 0x4c4   : > { %1726 = vmatprep.subr.bf16.mxu1 %v2878_v56 }
 0x4c6   : > { %1766 = vmatpush1.bf16.msra.mxu0 %v2873_v55 }
 0x4c7   : > { %1767 = vmatprep.subr.bf16.mxu0 %v2881_v57  ;;  %1727 = vmatpush1.bf16.msra.mxu1 %v2876_v58 }
 0x4c8   : > { %1728 = vmatprep.subr.bf16.mxu1 %v2884_v60 }
 0x4ca   : > { %1768 = vmatpush1.bf16.msra.mxu0 %v2879_v59 }
 0x4cb   : > { %1769 = vmatprep.subr.bf16.mxu0 %v2887_v61  ;;  %1729 = vmatpush1.bf16.msra.mxu1 %v2882_v62 }
 0x4cc   : > { %2531 = vmatprep.subr.bf16.mxu1 %v2888_v10 }
 0x4ce   : > { %1770 = vmatpush1.bf16.msra.mxu0 %v2885_v63 }
 0x4cf   : > { %2553 = vmatprep.subr.bf16.mxu0 %v2889_v11 }
 0x571   : > { %v1464_v19 = vpop.f32.mrf.mxu0 }
 0x572   : > { %v1465_v6 = vadd.f32 %v2415_v18, %v1464_v19  ;;  %v2895_v18 = vld [vmem:[#allocation12 + $0xb0] sm:$0xff]   ;;  %v2896_v19 = vld [vmem:[#allocation12 + $0x68] sm:$0xff]  }
 0x573   : > { %v2661_v20 = vpop.f32.mrf.mxu0 }
 0x574   : > { %v1470_v21 = vadd.f32 %v1465_v6, %v3534_v33  ;;  %v2897_v6 = vld [vmem:[#allocation12 + $0xe8] sm:$0xff]  }
 0x575   : > { %v1467_v22 = vpop.f32.mrf.mxu0  ;;  %v2898_v20 = vld [vmem:[#allocation12 + $0x28] sm:$0xff]  }
 0x576   : > { %1473 = vadd.xlane.f32.xlu0 %v1470_v21  ;;  %v2900_v22 = vld [vmem:[#allocation12 + $0x60] sm:$0xff]  }
 0x577   : > { %v2662_v23 = vpop.f32.mrf.mxu0 }
 0x578   : > { %v2901_v23 = vld [vmem:[#allocation12 + $0xe0] sm:$0xff]  }
 0x5ff   : > { %v1474_v33 = vpop.xlane.xlu0 %1473 }
 0x600   : > { %v1476_v31 = vmul.f32 0.0078125, %v1474_v33  ;;  %v2910_v33 = vld [vmem:[#allocation12 + $0x10] sm:$0xff]  }
 0x602   : > { %v1477_v32 = vsub.f32 %v1470_v21, %v1476_v31  ;;  %v2899_v21 = vld [vmem:[#allocation12 + $0xa8] sm:$0xff]   ;;  %v2911_v31 = vld [vmem:[#allocation12 + $0x90] sm:$0xff]  }
 0x604   : > { %v1478_v34 = vmul.f32 %v1477_v32, %v1477_v32 }
 0x606   : > { %1479 = vadd.xlane.f32.xlu1 %v1478_v34  ;;  %v2913_v34 = vld [vmem:[#allocation12 + $0xc8] sm:$0xff]  }
 0x68f   : > { %v1480_v13 = vpop.xlane.xlu1 %1479 }
 0x690   : > { %v1481_v0 = vmul.f32 0.0078125, %v1480_v13 }
 0x692   : > { %v1482_v1 = vadd.f32 1e-05, %v1481_v0 }
 0x694   : > { %2944 = vrsqrt.f32 %v1482_v1 }
 0x6a1   : > { %v2945_v2 = vpop.eup %2944 }
 0x6a2   : > { %v1484_v4 = vmul.f32 %v2945_v2, %v1477_v32  ;;  %v2912_v32 = vld [vmem:[#allocation12 + $0x48] sm:$0xff]  }
 0x6a4   : > { %v1491_v7 = vmul.f32 %v2424_v3, %v1484_v4 }
 0x6a6   : > { %v3654_v8 = vadd.f32 %v2425_v5, %v1491_v7 }
 0x6a8   : > { %v1499_v9 = vpack.c.bf16 %v3654_v8, %v3654_v8 }
 0x6aa   : > { %1747 = vmatmul.mubr.bf16.vlgmr.msra.gmra.mxu1 %v1499_v9  ;;  %1788 = vmatmul.mubr.bf16.vlgmr.msra.gmra.mxu0 %v1499_v9 }
 0x6ab   : > { %2532 = vmatpush3.bf16.msra.mxu1 %v2890_v14  ;;  %2554 = vmatpush3.bf16.msra.mxu0 %v2891_v15 }
 0x6ac   : > { %2533 = vmatprep.subr.bf16.mxu1 %v2892_v16  ;;  %2555 = vmatprep.subr.bf16.mxu0 %v2893_v38 }
 0x6af   : > { %2534 = vmatpush3.bf16.msra.mxu1 %v2894_v17  ;;  %2556 = vmatpush3.bf16.msra.mxu0 %v2895_v18 }
 0x6b0   : > { %2535 = vmatprep.subr.bf16.mxu1 %v2896_v19  ;;  %2557 = vmatprep.subr.bf16.mxu0 %v2897_v6 }
 0x6b3   : > { %2536 = vmatpush3.bf16.msra.mxu1 %v2898_v20  ;;  %2558 = vmatpush3.bf16.msra.mxu0 %v2899_v21 }
 0x6b4   : > { %2537 = vmatprep.subr.bf16.mxu1 %v2900_v22  ;;  %2559 = vmatprep.subr.bf16.mxu0 %v2901_v23 }
 0x6b7   : > { %2538 = vmatpush3.bf16.msra.mxu1 %v2902_v24  ;;  %2560 = vmatpush3.bf16.msra.mxu0 %v2903_v25 }
 0x6b8   : > { %2539 = vmatprep.subr.bf16.mxu1 %v2904_v26  ;;  %2561 = vmatprep.subr.bf16.mxu0 %v2905_v27 }
 0x6bb   : > { %2540 = vmatpush3.bf16.msra.mxu1 %v2906_v28  ;;  %2562 = vmatpush3.bf16.msra.mxu0 %v2907_v29 }
 0x6bc   : > { %2541 = vmatprep.subr.bf16.mxu1 %v2908_v12  ;;  %2563 = vmatprep.subr.bf16.mxu0 %v2909_v30 }
 0x6bf   : > { %2542 = vmatpush3.bf16.msra.mxu1 %v2910_v33  ;;  %2564 = vmatpush3.bf16.msra.mxu0 %v2911_v31 }
 0x6c0   : > { %2543 = vmatprep.subr.bf16.mxu1 %v2912_v32  ;;  %2565 = vmatprep.subr.bf16.mxu0 %v2913_v34 }
 0x6c3   : > { %2544 = vmatpush3.bf16.msra.mxu1 %v2914_v35  ;;  %2566 = vmatpush3.bf16.msra.mxu0 %v2915_v36 }
 0x6c4   : > { %2545 = vmatprep.subr.bf16.mxu1 %v2916_v37  ;;  %2567 = vmatprep.subr.bf16.mxu0 %v2917_v42  ;;  %v2458_v42 = vld [vmem:[%s3736_s11] ss:$0 sm:$0xff] }
 0x6c7   : > { %2546 = vmatpush3.bf16.msra.mxu1 %v2918_v43  ;;  %2568 = vmatpush3.bf16.msra.mxu0 %v2919_v44 }
 0x76a   : > { %v1748_v49 = vpop.f32.mrf.mxu1  ;;  %v1789_v50 = vpop.f32.mrf.mxu0 }
 0x76b   : > { %v1749_v53 = vadd.f32 %v1748_v49, %v1537_v47  ;;  %v1790_v55 = vadd.f32 %v1789_v50, %v1545_v48 }
 0x76c   : > { %v1750_v56 = vpop.f32.mrf.mxu1  ;;  %v1791_v57 = vpop.f32.mrf.mxu0 }
 0x76d   : > { %v1800_v58 = vmul.f32 %v1749_v53, %v1749_v53  ;;  %v1802_v59 = vmul.f32 %v1790_v55, %v1790_v55  ;;  %v1751_v60 = vadd.f32 %v1750_v56, %v1541_v51  ;;  %v1792_v61 = vadd.f32 %v1791_v57, %v1549_v52 }
 0x76e   : > { %v1752_v62 = vpop.f32.mrf.mxu1  ;;  %v1793_v63 = vpop.f32.mrf.mxu0  ;;  %v1796_v22 = vmul.f32 0.5, %v1749_v53  ;;  %v1798_v24 = vmul.f32 0.5, %v1790_v55 }
 0x76f   : > { %v1804_v41 = vmul.f32 %v1800_v58, %v1749_v53  ;;  %v1806_v13 = vmul.f32 %v1802_v59, %v1790_v55  ;;  %v1801_v0 = vmul.f32 %v1751_v60, %v1751_v60  ;;  %v1803_v54 = vmul.f32 %v1792_v61, %v1792_v61  ;;  %v2491_v63 = vld [vmem:[%s3780_s20] ss:$0 sm:$0xff] }
 0x770   : > { %v1753_v1 = vpop.f32.mrf.mxu1  ;;  %v1794_v2 = vpop.f32.mrf.mxu0  ;;  %v1797_v25 = vmul.f32 0.5, %v1751_v60  ;;  %v1799_v27 = vmul.f32 0.5, %v1792_v61 }
 0x771   : > { %v1808_v3 = vmul.f32 0.044715, %v1804_v41  ;;  %v1810_v39 = vmul.f32 0.044715, %v1806_v13  ;;  %v1805_v40 = vmul.f32 %v1801_v0, %v1751_v60  ;;  %v1807_v4 = vmul.f32 %v1803_v54, %v1792_v61  ;;  %v2492_v41 = vld [vmem:[%s3781_s13] ss:$0 sm:$0xff] }
 0x773   : > { %v1812_v5 = vadd.f32 %v1808_v3, %v1749_v53  ;;  %v1814_v7 = vadd.f32 %v1810_v39, %v1790_v55  ;;  %v1809_v9 = vmul.f32 0.044715, %v1805_v40  ;;  %v1811_v10 = vmul.f32 0.044715, %v1807_v4 }
 0x775   : > { %v1816_v11 = vmul.f32 0.7978846, %v1812_v5  ;;  %v1818_v14 = vmul.f32 0.7978846, %v1814_v7  ;;  %v1813_v15 = vadd.f32 %v1809_v9, %v1751_v60  ;;  %v1815_v16 = vadd.f32 %v1811_v10, %v1792_v61 }
 0x777   : > { %2946 = vtanh.f32 %v1816_v11  ;;  %v1817_v38 = vmul.f32 0.7978846, %v1813_v15  ;;  %v1819_v17 = vmul.f32 0.7978846, %v1815_v16 }
 0x778   : > { %2948 = vtanh.f32 %v1818_v14 }
 0x779   : > { %2950 = vtanh.f32 %v1817_v38 }
 0x77a   : > { %2952 = vtanh.f32 %v1819_v17 }
 0x784   : > { %v2947_v18 = vpop.eup %2946 }
 0x785   : > { %v2949_v19 = vpop.eup %2948  ;;  %v1824_v6 = vadd.f32 1.0, %v2947_v18 }
 0x786   : > { %v1826_v20 = vadd.f32 1.0, %v2949_v19  ;;  %v2951_v21 = vpop.eup %2950 }
 0x787   : > { %v2953_v23 = vpop.eup %2952  ;;  %v1825_v26 = vadd.f32 1.0, %v2951_v21  ;;  %v1828_v29 = vmul.f32 %v1824_v6, %v1796_v22 }
 0x788   : > { %v1827_v28 = vadd.f32 1.0, %v2953_v23  ;;  %v1830_v30 = vmul.f32 %v1826_v20, %v1798_v24 }
 0x789   : > { %v1829_v12 = vmul.f32 %v1825_v26, %v1797_v25  ;;  %v1832_v34 = vpack.c.bf16 %v1828_v29, %v1828_v29 }
 0x78a   : > { %v1831_v33 = vmul.f32 %v1827_v28, %v1799_v27  ;;  %v1834_v35 = vpack.c.bf16 %v1830_v30, %v1830_v30 }
 0x78b   : > { %v1833_v31 = vpack.c.bf16 %v1829_v12, %v1829_v12 }
 0x78c   : > { %v1835_v32 = vpack.c.bf16 %v1831_v33, %v1831_v33 }
 0x78d   : > { %2131 = vmatprep.mubr.bf16.mxu1 %v1833_v31 }
 0x78e   : > { %2171 = vmatprep.mubr.bf16.mxu0 %v1835_v32  ;;  %2132 = vmatmul.mubr.bf16.vlgmr.msra.gmra.mxu1 %v1832_v34 }
 0x78f   : > { %2172 = vmatmul.mubr.bf16.vlgmr.msra.gmra.mxu0 %v1834_v35 }
 0x84e   : > { %v2547_v36 = vpop.f32.mrf.mxu1 }
 0x84f   : > { %v2569_v37 = vpop.f32.mrf.mxu0 }
 0x850   : > { %v2548_v43 = vpop.f32.mrf.mxu1 }
 0x851   : > { %v2549_v44 = vadd.f32 %v2548_v43, %v2547_v36  ;;  %v2570_v45 = vpop.f32.mrf.mxu0 }
 0x852   : > { %v2550_v46 = vpop.f32.mrf.mxu1  ;;  %v2571_v48 = vadd.f32 %v2570_v45, %v2569_v37 }
 0x853   : > { %v2134_v47 = vadd.f32 %v2549_v44, %v2458_v42  ;;  %v2572_v49 = vpop.f32.mrf.mxu0 }
 0x854   : > { %v2551_v50 = vpop.f32.mrf.mxu1 }
 0x855   : > { %v2174_v51 = vadd.f32 %v2571_v48, %v2134_v47  ;;  %v2573_v52 = vpop.f32.mrf.mxu0 }
 0x857   : > { %v2179_v53 = vadd.f32 %v2174_v51, %v3654_v8 }
 0x859   : > { %2182 = vadd.xlane.f32.xlu0 %v2179_v53 }
 0x8e2   : > { %v2183_v55 = vpop.xlane.xlu0 %2182 }
 0x8e3   : > { %v2184_v56 = vmul.f32 0.0078125, %v2183_v55 }
 0x8e5   : > { %v2185_v57 = vsub.f32 %v2179_v53, %v2184_v56 }
 0x8e7   : > { %v2186_v58 = vmul.f32 %v2185_v57, %v2185_v57 }
 0x8e9   : > { %2187 = vadd.xlane.f32.xlu0 %v2186_v58 }
 0x972   : > { %v2188_v59 = vpop.xlane.xlu0 %2187 }
 0x973   : > { %v2189_v60 = vmul.f32 0.0078125, %v2188_v59 }
 0x975   : > { %v2190_v61 = vadd.f32 1e-05, %v2189_v60 }
 0x977   : > { %2954 = vrsqrt.f32 %v2190_v61 }
 0x984   : > { %v2955_v62 = vpop.eup %2954 }
 0x985   : > { %v2192_v8 = vmul.f32 %v2955_v62, %v2185_v57 }
 0x987   : > { %v2199_v13 = vmul.f32 %v2491_v63, %v2192_v8 }
 0x989   : > { %v2206_v0 = vadd.f32 %v2492_v41, %v2199_v13 }
 0x98b   : > { %2207 = vst [vmem:[%s3524_s22] sm:$0xff] %v2206_v0 }
 0x98c   : > { %3129 = shalt.err (!%p3126_p10)
}
 0x98d   : > { %s3130_s18 = scalar_lea.hbm %s2220_s25, 128  ;;  %s3134_s12 = scalar_lea.hbm %s3782_s23, 256 }
 0x98e   : > { %p3131_p9 = scmp.ne.s32.totalorder %s2220_s25, %s3130_s18  ;;  %p3135_p0 = scmp.lt.s32.totalorder %s2220_s25, %s3782_s23 }
 0x98f   : > { %p3136_p3 = scmp.lt.s32.totalorder %s3134_s12, %s3130_s18 }
 0x990   : > { %p3132_p12 = pnand %p3131_p9, %p3448_p11 }
 0x991   : > { %p3137_p1 = por %p3136_p3, %p3135_p0 }
 0x992   : > { %p3133_p13 = pneg %p3132_p12 }
 0x994   : > { %p3138_p5 = pnand %p3137_p1, %p3133_p13 }
 0x996   : > { %3141 = shalt.err (!%p3138_p5)
}
 0x997   : > { %2683 = dma.vmem_to_hbm [thread:$0]  (%p3448_p11), %s2223_s2, 128, %s2220_s25, %s2209_s8  }
 0x998 PF: > { %s3783_s20 = sld [smem:[#allocation25_spill]] }
 0x999   : > { %s3784_s16 = sld [smem:[#allocation21_spill]] }
 0x99e   : > { %p2718_p2 = scmp.ge.s32.totalorder %s3783_s20, 2 }
 0x99f   : > { %s2234_s13 = sand.u32 1, %s3784_s16  }
 0x9a0   : > { %p2706_p4 = pnand %p2718_p2, %p3455_p6  ;;  %s2235_s26 = scalar_lea.sflag [#allocation5], %s2234_s13 }
 0x9a2   : > { %p2707_p7 = pneg %p2706_p4 }
 0x9a4   : > { %3195 = dma.done.wait (%p2707_p7), %s2235_s26, 128  }
 0x9a5   : > { %3197 = vsyncadd (%p2707_p7), %s2235_s26, 4294967168  ;;  %s35_s20 = sadd.s32 1, %s3783_s20   ;;  %s3786_s24 = sld [smem:[#allocation22_spill]] }
 0x9a6   : > { %p32_p8 = scmp.ge.s32.totalorder %s35_s20, 6   ;;  %s3787_s15 = sld [smem:[#allocation29_spill]] }
 0x9a7   : > { %s3788_s16 = sld [smem:[#allocation24_spill]]  ;;  %s3791_s29 = smov %s3204_s30 }
 0x9a8   : > { %s3789_s18 = sld [smem:[#allocation26_spill]]  ;;  %s3793_s17 = smov %s3224_s19 }
 0x9a9   : > { %s3790_s14 = sld [smem:[#allocation27_spill]] }
 0x9ab   : > { %s3792_s30 = smov %s3786_s24  ;;  %34 = sbr.rel (!%p32_p8) target bundleno = 20 (0x14), region = 154 }
 0x9af   : > { %s3794_s19 = smov %s3790_s14 }
 0x9b0   :  { %2240 = vsyncpa [#allocation4], 1 }
 0x9b1   :  { %2242 = vsyncpa [#allocation4 + $0x1], 1 }
 0x9b2   :  { %2243 = vsyncpa [#allocation7], 1 }
 0x9b3   :  { %2245 = vsyncpa [#allocation7 + $0x1], 1 }
 0x9b4   :  { %2246 = vsyncpa [#allocation10], 1 }
 0x9b5   :  { %2247 = vsyncpa [#allocation13], 1 }
 0x9b6   :  { %2248 = vsyncpa [#allocation5], 1 }
 0x9b7   :  { %2250 = vsyncpa [#allocation5 + $0x1], 1 }

</bundles_post_ra>
